<compile_context>
chip_gen: v7x
topology: tpu7x:2x2x1
jax: 0.10.0
libtpu: 0.0.40
codegen_flags: <defaults>
</compile_context>

<pallas_src>
import math

import jax
import jax.numpy as jnp
from jax.experimental import pallas as pl
from jax.experimental.pallas import tpu as pltpu

DIM_MODEL = 64
NUM_HEADS = 4
HEAD_DIM = DIM_MODEL // NUM_HEADS
HIDDEN = 128            # hidden_dims = [128]
NUM_LAYERS = 4
LN_EPS = 1e-5
DIN_PAD = 8             # inputdimensions=1 padded to 8 lanes
DOUT_PAD = 128          # outputdimensions=1 padded to 128 (lane-dense store)
SCALE = 1.0 / math.sqrt(HEAD_DIM)

# rows of the per-layer (L, 8, DIM_MODEL) parameter slab (sublane-indexed)
_ROW_B_AO, _ROW_LN1W, _ROW_LN1B, _ROW_B_F2, _ROW_LN2W, _ROW_LN2B = range(6)


def _layer_norm(x, w, b):
    mean = jnp.mean(x, axis=-1, keepdims=True)
    xc = x - mean
    var = jnp.mean(xc * xc, axis=-1, keepdims=True)
    return xc * jax.lax.rsqrt(var + LN_EPS) * w + b


def _forward_rows(x, pe_rows, w_in, w_qkv, w_ao, w_f1, w_f2,
                  b_qkv, b_f1, pvec, w_out, b_out, *, n_batch, seq, recip):
    """Shared math for kernel & bf16-mirrored reference.

    x:        (n_batch*seq, DIN_PAD) f32
    pe_rows:  (n_batch*seq, DIM_MODEL) f32 (positional encoding + input bias)
    w_*:      bf16 weight slabs; b_* / pvec: f32 bias & LayerNorm slabs
    recip:    reciprocal implementation (pl.reciprocal in-kernel, 1/x in ref)
    """
    bf16 = jnp.bfloat16
    f32 = jnp.float32
    N = n_batch * seq
    D = DIM_MODEL

    # input projection + positional encoding (+ f32 input-proj bias, pre-folded
    # into pe_rows wrapper-side)
    h = jnp.dot(x.astype(bf16), w_in, preferred_element_type=f32) + pe_rows

    for l in range(NUM_LAYERS):
        pv = pvec[l]                               # (8, D) f32, sublane-indexed
        b_ao = pv[_ROW_B_AO:_ROW_B_AO + 1, :]
        ln1w = pv[_ROW_LN1W:_ROW_LN1W + 1, :]
        ln1b = pv[_ROW_LN1B:_ROW_LN1B + 1, :]
        b_f2 = pv[_ROW_B_F2:_ROW_B_F2 + 1, :]
        ln2w = pv[_ROW_LN2W:_ROW_LN2W + 1, :]
        ln2b = pv[_ROW_LN2B:_ROW_LN2B + 1, :]

        # ---- fused QKV projection: one (N, D) x (D, 3D) matmul ----
        qkv = jnp.dot(h.astype(bf16), w_qkv[l],
                      preferred_element_type=f32) + b_qkv[l]       # (N, 3D)
        qkv3 = qkv.reshape(n_batch, seq, 3 * D)                    # leading-dim split

        # ---- batched attention (scale pre-folded into w_q/b_q) ----
        ctx_heads = []
        for hd in range(NUM_HEADS):
            lo = hd * HEAD_DIM
            qh = qkv3[:, :, lo:lo + HEAD_DIM].astype(bf16)                     # (BB,S,HD)
            kh = qkv3[:, :, D + lo:D + lo + HEAD_DIM].astype(bf16)
            vh = qkv3[:, :, 2 * D + lo:2 * D + lo + HEAD_DIM].astype(bf16)
            s = jnp.einsum('bqd,bkd->bqk', qh, kh,
                           preferred_element_type=f32)                         # (BB,S,S)
            s = s - jnp.max(s, axis=-1, keepdims=True)
            p = jnp.exp(s)
            p = p * recip(jnp.sum(p, axis=-1, keepdims=True))
            ctx_heads.append(jnp.einsum('bqk,bkd->bqd', p.astype(bf16), vh,
                                        preferred_element_type=f32))           # (BB,S,HD)
        ctx = jnp.concatenate(ctx_heads, axis=-1).reshape(N, D)                # (N, D)

        # single out-projection matmul for the whole block
        attn = jnp.dot(ctx.astype(bf16), w_ao[l],
                       preferred_element_type=f32) + b_ao
        h = _layer_norm(h + attn, ln1w, ln1b)

        # ---- FFN: Linear(64,128) -> ReLU -> Linear(128,64) ----
        f = jnp.dot(h.astype(bf16), w_f1[l], preferred_element_type=f32) + b_f1[l]
        f = jnp.maximum(f, 0.0)
        f = jnp.dot(f.astype(bf16), w_f2[l], preferred_element_type=f32) + b_f2
        h = _layer_norm(h + f, ln2w, ln2b)

    # output projection (Dout padded to DOUT_PAD lanes -> unmasked stores)
    return jnp.dot(h.astype(bf16), w_out, preferred_element_type=f32) + b_out


def _make_kernel(n_batch, seq):
    def kernel(x_ref, pe_ref, w_in_ref, w_qkv_ref, w_ao_ref, w_f1_ref, w_f2_ref,
               b_qkv_ref, b_f1_ref, pvec_ref, w_out_ref, b_out_ref, o_ref):
        o = _forward_rows(
            x_ref[...], pe_ref[...], w_in_ref[...], w_qkv_ref[...], w_ao_ref[...],
            w_f1_ref[...], w_f2_ref[...], b_qkv_ref[...], b_f1_ref[...],
            pvec_ref[...], w_out_ref[...], b_out_ref[...],
            n_batch=n_batch, seq=seq,
            recip=lambda d: pl.reciprocal(d, approx=True))
        o_ref[...] = o.astype(o_ref.dtype)
    return kernel


def sinusoidal_pe(seq_len, d):
    pos = jnp.arange(seq_len, dtype=jnp.float32)[:, None]
    div = jnp.exp(jnp.arange(0, d, 2, dtype=jnp.float32) * (-math.log(10000.0) / d))
    pe = jnp.zeros((seq_len, d), jnp.float32)
    pe = pe.at[:, 0::2].set(jnp.sin(pos * div))
    pe = pe.at[:, 1::2].set(jnp.cos(pos * div))
    return pe


def init_params(key, din, dout):
    D, H, L = DIM_MODEL, HIDDEN, NUM_LAYERS
    ks = jax.random.split(key, 16)
    r = lambda k, shape, s: jax.random.normal(k, shape, jnp.float32) * s
    return {
        "w_in": r(ks[0], (din, D), 1.0),
        "b_in": r(ks[1], (D,), 0.1),
        "w_q": r(ks[2], (L, D, D), 1.0 / math.sqrt(D)),
        "b_q": r(ks[3], (L, D), 0.02),
        "w_k": r(ks[4], (L, D, D), 1.0 / math.sqrt(D)),
        "b_k": r(ks[5], (L, D), 0.02),
        "w_v": r(ks[6], (L, D, D), 1.0 / math.sqrt(D)),
        "b_v": r(ks[7], (L, D), 0.02),
        "w_ao": r(ks[8], (L, D, D), 1.0 / math.sqrt(D)),
        "b_ao": r(ks[9], (L, D), 0.02),
        "ln1_w": jnp.ones((L, D), jnp.float32),
        "ln1_b": jnp.zeros((L, D), jnp.float32),
        "w_f1": r(ks[10], (L, D, H), 1.0 / math.sqrt(D)),
        "b_f1": r(ks[11], (L, H), 0.02),
        "w_f2": r(ks[12], (L, H, D), 1.0 / math.sqrt(H)),
        "b_f2": r(ks[13], (L, D), 0.02),
        "ln2_w": jnp.ones((L, D), jnp.float32),
        "ln2_b": jnp.zeros((L, D), jnp.float32),
        "w_out": r(ks[14], (D, dout), 1.0 / math.sqrt(D)),
        "b_out": r(ks[15], (dout,), 0.02),
    }


def prepare_kernel_args(params, din, dout, seq_len):
    """Consolidate the per-layer tensors into a few bf16/f32 slabs."""
    D = DIM_MODEL
    assert din <= DIN_PAD and dout <= DOUT_PAD

    # input projection weight (zero-padded rows), bias stays f32 folded into PE
    w_in = (jnp.zeros((DIN_PAD, D), jnp.float32)
            .at[:din, :].set(params["w_in"]).astype(jnp.bfloat16))
    pe_bias = sinusoidal_pe(seq_len, D) + params["b_in"][None, :]       # (S, D) f32

    # fused QKV weights, 1/sqrt(head_dim) folded into the Q part
    w_qkv = jnp.concatenate(
        [params["w_q"] * SCALE, params["w_k"], params["w_v"]],
        axis=-1).astype(jnp.bfloat16)                                   # (L, D, 3D)
    w_ao = params["w_ao"].astype(jnp.bfloat16)                          # (L, D, D)
    w_f1 = params["w_f1"].astype(jnp.bfloat16)                          # (L, D, H)
    w_f2 = params["w_f2"].astype(jnp.bfloat16)                          # (L, H, D)

    # lane-aligned bias slabs (added by broadcast, no in-kernel lane slicing)
    b_qkv = jnp.concatenate([params["b_q"] * SCALE, params["b_k"], params["b_v"]],
                            axis=-1)[:, None, :]                        # (L, 1, 3D) f32
    b_f1 = params["b_f1"][:, None, :]                                   # (L, 1, H)  f32

    # sublane-indexed slab of D-wide per-layer params: one row per parameter
    zero = jnp.zeros_like(params["b_ao"])
    pvec = jnp.stack([params["b_ao"], params["ln1_w"], params["ln1_b"],
                      params["b_f2"], params["ln2_w"], params["ln2_b"],
                      zero, zero], axis=1)                              # (L, 8, D) f32

    w_out = (jnp.zeros((D, DOUT_PAD), jnp.float32)
             .at[:, :dout].set(params["w_out"]).astype(jnp.bfloat16))
    b_out = jnp.zeros((1, DOUT_PAD), jnp.float32).at[:, :dout].set(params["b_out"][None, :])

    return (pe_bias, w_in, w_qkv, w_ao, w_f1, w_f2, b_qkv, b_f1, pvec, w_out, b_out)


def _pad_rows(x, din):
    B, S, _ = x.shape
    x_pad = jnp.zeros((B, S, DIN_PAD), jnp.float32).at[:, :, :din].set(x)
    return x_pad.reshape(B * S, DIN_PAD)


def _default_block_batch(B, S):
    # Single grid step unless splitting in two still leaves >=256 matmul rows
    # per step (only the 2-TensorCore v7x benefits from >1 step); cap per-step
    # rows so the per-step activation working set stays comfortably in VMEM.
    max_rows_per_step = 4096
    bb = B // 2 if (B % 2 == 0 and (B // 2) * S >= 256) else B
    while bb > 1 and bb * S > max_rows_per_step:
        bb -= 1
        while bb > 1 and B % bb != 0:
            bb -= 1
    return bb


def create_transformer_forward(x, params, dout, block_batch=None):
    B, S, din = x.shape
    args = prepare_kernel_args(params, din, dout, S)
    pe_bias, weights = args[0], args[1:]

    BB = _default_block_batch(B, S) if block_batch is None else block_batch
    assert B % BB == 0
    grid = (B // BB,)
    n_blk = BB * S

    x2 = _pad_rows(x, din)                       # (B*S, DIN_PAD) — flatten wrapper-side
    pe_tiled = jnp.tile(pe_bias, (BB, 1))        # (BB*S, D) — no in-kernel PE concat

    def full_spec(a):
        nd = a.ndim
        return pl.BlockSpec(a.shape, lambda i, _nd=nd: (0,) * _nd)

    in_specs = ([pl.BlockSpec((n_blk, DIN_PAD), lambda i: (i, 0)),
                 full_spec(pe_tiled)]
                + [full_spec(a) for a in weights])
    out_specs = pl.BlockSpec((n_blk, DOUT_PAD), lambda i: (i, 0))

    # Advisory cost estimate (kernel is tiny / launch-bound; helps XLA schedule).
    D, H, L = DIM_MODEL, HIDDEN, NUM_LAYERS
    rows = B * S
    flops = int(2 * rows * (DIN_PAD * D + L * (3 * D * D + D * D + D * H + H * D)
                            + D * DOUT_PAD)
                + 4 * L * B * NUM_HEADS * S * S * HEAD_DIM)
    transcendentals = int(L * B * NUM_HEADS * S * (S + 1) + 2 * L * rows)
    all_args = (x2, pe_tiled) + weights
    bytes_accessed = int(sum(int(a.size) * a.dtype.itemsize for a in all_args)
                         + rows * DOUT_PAD * 4)

    out = pl.pallas_call(
        _make_kernel(BB, S),
        out_shape=jax.ShapeDtypeStruct((B * S, DOUT_PAD), jnp.float32),
        grid=grid,
        in_specs=in_specs,
        out_specs=out_specs,
        compiler_params=pltpu.CompilerParams(dimension_semantics=("parallel",)),
        cost_estimate=pl.CostEstimate(flops=flops,
                                      transcendentals=transcendentals,
                                      bytes_accessed=bytes_accessed),
    )(*all_args)
    return out.reshape(B, S, DOUT_PAD)[:, :, :dout]


def reference_forward(x, params, dout):
    """Pure-JAX mirror of the kernel math (same bf16 matmul operands, f32
    accumulation, exact reciprocal) for tight validation."""
    B, S, din = x.shape
    (pe_bias, w_in, w_qkv, w_ao, w_f1, w_f2, b_qkv, b_f1, pvec,
     w_out, b_out) = prepare_kernel_args(params, din, dout, S)
    x2 = _pad_rows(x, din)
    pe_tiled = jnp.tile(pe_bias, (B, 1))
    o = _forward_rows(x2, pe_tiled, w_in, w_qkv, w_ao, w_f1, w_f2,
                      b_qkv, b_f1, pvec, w_out, b_out,
                      n_batch=B, seq=S, recip=lambda d: 1.0 / d)
    return o.reshape(B, S, DOUT_PAD)[:, :, :dout]


def reference_forward_f32(x, params, dout):
    """Independent full-f32 reference of the PyTorch forward (eval mode)."""
    B, S, _ = x.shape
    pe = sinusoidal_pe(S, DIM_MODEL)
    outs = []
    for b in range(B):
        h = x[b] @ params["w_in"] + params["b_in"][None, :]
        h = h + pe
        for l in range(NUM_LAYERS):
            q = h @ params["w_q"][l] + params["b_q"][l][None, :]
            k = h @ params["w_k"][l] + params["b_k"][l][None, :]
            v = h @ params["w_v"][l] + params["b_v"][l][None, :]
            heads = []
            for hd in range(NUM_HEADS):
                lo, hi = hd * HEAD_DIM, (hd + 1) * HEAD_DIM
                s = (q[:, lo:hi] * SCALE) @ k[:, lo:hi].T
                p = jax.nn.softmax(s, axis=-1)
                heads.append(p @ v[:, lo:hi])
            attn = (jnp.concatenate(heads, axis=-1) @ params["w_ao"][l]
                    + params["b_ao"][l][None, :])
            h = _layer_norm(h + attn, params["ln1_w"][l][None, :],
                            params["ln1_b"][l][None, :])
            f = jnp.maximum(h @ params["w_f1"][l] + params["b_f1"][l][None, :], 0.0)
            f = f @ params["w_f2"][l] + params["b_f2"][l][None, :]
            h = _layer_norm(h + f, params["ln2_w"][l][None, :],
                            params["ln2_b"][l][None, :])
        outs.append(h @ params["w_out"] + params["b_out"][None, :])
    return jnp.stack(outs)


if __name__ == "__main__":
    key = jax.random.PRNGKey(0)
    kx, kp = jax.random.split(key)

    B, S, DIN, DOUT = 2, 8, 1, 1              # batch=2, seq=8, in/out dims = 1
    x = jax.random.normal(kx, (B, S, DIN), jnp.float32)
    params = init_params(kp, DIN, DOUT)

    out = create_transformer_forward(x, params, DOUT)
    out = jax.block_until_ready(out)
    assert out.shape == (B, S, DOUT), out.shape
    assert bool(jnp.all(jnp.isfinite(out)))

    # tight check against the bf16-mirrored reference (covers approx reciprocal)
    ref = reference_forward(x, params, DOUT)
    assert bool(jnp.allclose(out, ref, atol=2e-2, rtol=2e-2)), "kernel/reference mismatch"

    # loose sanity check against the independent full-f32 reference
    ref32 = reference_forward_f32(x, params, DOUT)
    assert bool(jnp.allclose(out, ref32, atol=0.3, rtol=0.3)), "kernel/f32-reference mismatch"

    print("KERNEL_OK")
</pallas_src>

<mosaic_0001>
module attributes {stable_mosaic.version = 11 : i64} {
  func.func @kernel(%arg0: i32, %arg1: memref<16x8xf32, #tpu.memory_space<vmem>>, %arg2: memref<16x64xf32, #tpu.memory_space<vmem>>, %arg3: memref<8x64xbf16, #tpu.memory_space<vmem>>, %arg4: memref<4x64x192xbf16, #tpu.memory_space<vmem>>, %arg5: memref<4x64x64xbf16, #tpu.memory_space<vmem>>, %arg6: memref<4x64x128xbf16, #tpu.memory_space<vmem>>, %arg7: memref<4x128x64xbf16, #tpu.memory_space<vmem>>, %arg8: memref<4x1x192xf32, #tpu.memory_space<vmem>>, %arg9: memref<4x1x128xf32, #tpu.memory_space<vmem>>, %arg10: memref<4x8x64xf32, #tpu.memory_space<vmem>>, %arg11: memref<64x128xbf16, #tpu.memory_space<vmem>>, %arg12: memref<1x128xf32, #tpu.memory_space<vmem>>, %arg13: memref<16x128xf32, #tpu.memory_space<vmem>>) attributes {dimension_semantics = [#tpu.dimension_semantics<parallel>], iteration_bounds = array<i64: 1>, scalar_prefetch = 0 : i64, scratch_operands = 0 : i64, tpu.core_type = #tpu.core_type<tc>, window_params = [{transform_indices = @transform_0, window_bounds = array<i64: 16, 8>}, {pipeline_mode = #tpu.pipeline_mode<synchronous>, transform_indices = @transform_1, window_bounds = array<i64: 16, 64>}, {pipeline_mode = #tpu.pipeline_mode<synchronous>, transform_indices = @transform_2, window_bounds = array<i64: 8, 64>}, {pipeline_mode = #tpu.pipeline_mode<synchronous>, transform_indices = @transform_3, window_bounds = array<i64: 4, 64, 192>}, {pipeline_mode = #tpu.pipeline_mode<synchronous>, transform_indices = @transform_4, window_bounds = array<i64: 4, 64, 64>}, {pipeline_mode = #tpu.pipeline_mode<synchronous>, transform_indices = @transform_5, window_bounds = array<i64: 4, 64, 128>}, {pipeline_mode = #tpu.pipeline_mode<synchronous>, transform_indices = @transform_6, window_bounds = array<i64: 4, 128, 64>}, {pipeline_mode = #tpu.pipeline_mode<synchronous>, transform_indices = @transform_7, window_bounds = array<i64: 4, 1, 192>}, {pipeline_mode = #tpu.pipeline_mode<synchronous>, transform_indices = @transform_8, window_bounds = array<i64: 4, 1, 128>}, {pipeline_mode = #tpu.pipeline_mode<synchronous>, transform_indices = @transform_9, window_bounds = array<i64: 4, 8, 64>}, {pipeline_mode = #tpu.pipeline_mode<synchronous>, transform_indices = @transform_10, window_bounds = array<i64: 64, 128>}, {pipeline_mode = #tpu.pipeline_mode<synchronous>, transform_indices = @transform_11, window_bounds = array<i64: 1, 128>}, {transform_indices = @transform_12, window_bounds = array<i64: 16, 128>}]} {
    %c0 = arith.constant 0 : index
    %c0_0 = arith.constant 0 : index
    %0 = vector.load %arg1[%c0, %c0_0] : memref<16x8xf32, #tpu.memory_space<vmem>>, vector<16x8xf32>
    %c0_1 = arith.constant 0 : index
    %c0_2 = arith.constant 0 : index
    %1 = vector.load %arg2[%c0_1, %c0_2] : memref<16x64xf32, #tpu.memory_space<vmem>>, vector<16x64xf32>
    %c0_3 = arith.constant 0 : index
    %c0_4 = arith.constant 0 : index
    %2 = vector.load %arg3[%c0_3, %c0_4] : memref<8x64xbf16, #tpu.memory_space<vmem>>, vector<8x64xbf16>
    %c0_5 = arith.constant 0 : index
    %c0_6 = arith.constant 0 : index
    %c0_7 = arith.constant 0 : index
    %3 = vector.load %arg4[%c0_5, %c0_6, %c0_7] : memref<4x64x192xbf16, #tpu.memory_space<vmem>>, vector<4x64x192xbf16>
    %c0_8 = arith.constant 0 : index
    %c0_9 = arith.constant 0 : index
    %c0_10 = arith.constant 0 : index
    %4 = vector.load %arg5[%c0_8, %c0_9, %c0_10] : memref<4x64x64xbf16, #tpu.memory_space<vmem>>, vector<4x64x64xbf16>
    %c0_11 = arith.constant 0 : index
    %c0_12 = arith.constant 0 : index
    %c0_13 = arith.constant 0 : index
    %5 = vector.load %arg6[%c0_11, %c0_12, %c0_13] : memref<4x64x128xbf16, #tpu.memory_space<vmem>>, vector<4x64x128xbf16>
    %c0_14 = arith.constant 0 : index
    %c0_15 = arith.constant 0 : index
    %c0_16 = arith.constant 0 : index
    %6 = vector.load %arg7[%c0_14, %c0_15, %c0_16] : memref<4x128x64xbf16, #tpu.memory_space<vmem>>, vector<4x128x64xbf16>
    %c0_17 = arith.constant 0 : index
    %c0_18 = arith.constant 0 : index
    %c0_19 = arith.constant 0 : index
    %7 = vector.load %arg8[%c0_17, %c0_18, %c0_19] : memref<4x1x192xf32, #tpu.memory_space<vmem>>, vector<4x1x192xf32>
    %c0_20 = arith.constant 0 : index
    %c0_21 = arith.constant 0 : index
    %c0_22 = arith.constant 0 : index
    %8 = vector.load %arg9[%c0_20, %c0_21, %c0_22] : memref<4x1x128xf32, #tpu.memory_space<vmem>>, vector<4x1x128xf32>
    %c0_23 = arith.constant 0 : index
    %c0_24 = arith.constant 0 : index
    %c0_25 = arith.constant 0 : index
    %9 = vector.load %arg10[%c0_23, %c0_24, %c0_25] : memref<4x8x64xf32, #tpu.memory_space<vmem>>, vector<4x8x64xf32>
    %c0_26 = arith.constant 0 : index
    %c0_27 = arith.constant 0 : index
    %10 = vector.load %arg11[%c0_26, %c0_27] : memref<64x128xbf16, #tpu.memory_space<vmem>>, vector<64x128xbf16>
    %c0_28 = arith.constant 0 : index
    %c0_29 = arith.constant 0 : index
    %11 = vector.load %arg12[%c0_28, %c0_29] : memref<1x128xf32, #tpu.memory_space<vmem>>, vector<1x128xf32>
    %12 = arith.truncf %0 : vector<16x8xf32> to vector<16x8xbf16>
    %cst = arith.constant dense<0.000000e+00> : vector<16x64xf32>
    %13 = tpu.matmul %12, %2, %cst {dimension_numbers = #tpu.dot_dimension_numbers<[1], [0], [0], [1], [0, 0, 1, 1], [], []>} : vector<16x8xbf16>, vector<8x64xbf16>, vector<16x64xf32> -> vector<16x64xf32>
    %14 = arith.addf %13, %1 : vector<16x64xf32>
    %15 = vector.extract_strided_slice %9 {offsets = [0, 0, 0], sizes = [1, 8, 64], strides = [1, 1, 1]} : vector<4x8x64xf32> to vector<1x8x64xf32>
    %16 = vector.shape_cast %15 : vector<1x8x64xf32> to vector<8x64xf32>
    %17 = vector.extract_strided_slice %16 {offsets = [0, 0], sizes = [1, 64], strides = [1, 1]} : vector<8x64xf32> to vector<1x64xf32>
    %18 = vector.extract_strided_slice %16 {offsets = [1, 0], sizes = [1, 64], strides = [1, 1]} : vector<8x64xf32> to vector<1x64xf32>
    %19 = vector.extract_strided_slice %16 {offsets = [2, 0], sizes = [1, 64], strides = [1, 1]} : vector<8x64xf32> to vector<1x64xf32>
    %20 = vector.extract_strided_slice %16 {offsets = [3, 0], sizes = [1, 64], strides = [1, 1]} : vector<8x64xf32> to vector<1x64xf32>
    %21 = vector.extract_strided_slice %16 {offsets = [4, 0], sizes = [1, 64], strides = [1, 1]} : vector<8x64xf32> to vector<1x64xf32>
    %22 = vector.extract_strided_slice %16 {offsets = [5, 0], sizes = [1, 64], strides = [1, 1]} : vector<8x64xf32> to vector<1x64xf32>
    %23 = arith.truncf %14 : vector<16x64xf32> to vector<16x64xbf16>
    %24 = vector.extract_strided_slice %3 {offsets = [0, 0, 0], sizes = [1, 64, 192], strides = [1, 1, 1]} : vector<4x64x192xbf16> to vector<1x64x192xbf16>
    %25 = vector.shape_cast %24 : vector<1x64x192xbf16> to vector<64x192xbf16>
    %cst_30 = arith.constant dense<0.000000e+00> : vector<16x192xf32>
    %26 = tpu.matmul %23, %25, %cst_30 {dimension_numbers = #tpu.dot_dimension_numbers<[1], [0], [0], [1], [0, 0, 1, 1], [], []>} : vector<16x64xbf16>, vector<64x192xbf16>, vector<16x192xf32> -> vector<16x192xf32>
    %27 = vector.extract_strided_slice %7 {offsets = [0, 0, 0], sizes = [1, 1, 192], strides = [1, 1, 1]} : vector<4x1x192xf32> to vector<1x1x192xf32>
    %28 = vector.shape_cast %27 : vector<1x1x192xf32> to vector<1x192xf32>
    %29 = vector.broadcast %28 : vector<1x192xf32> to vector<16x192xf32>
    %30 = arith.addf %26, %29 : vector<16x192xf32>
    %31 = vector.shape_cast %30 : vector<16x192xf32> to vector<2x8x192xf32>
    %32 = vector.extract_strided_slice %31 {offsets = [0, 0, 0], sizes = [2, 8, 16], strides = [1, 1, 1]} : vector<2x8x192xf32> to vector<2x8x16xf32>
    %33 = arith.truncf %32 : vector<2x8x16xf32> to vector<2x8x16xbf16>
    %34 = vector.extract_strided_slice %31 {offsets = [0, 0, 64], sizes = [2, 8, 16], strides = [1, 1, 1]} : vector<2x8x192xf32> to vector<2x8x16xf32>
    %35 = arith.truncf %34 : vector<2x8x16xf32> to vector<2x8x16xbf16>
    %36 = vector.extract_strided_slice %31 {offsets = [0, 0, 128], sizes = [2, 8, 16], strides = [1, 1, 1]} : vector<2x8x192xf32> to vector<2x8x16xf32>
    %37 = arith.truncf %36 : vector<2x8x16xf32> to vector<2x8x16xbf16>
    "tpu.trace_start"() <{level = 10 : i32, message = "bqd,bkd->bqk"}> : () -> ()
    %cst_31 = arith.constant dense<0.000000e+00> : vector<2x8x8xf32>
    %38 = tpu.matmul %33, %35, %cst_31 {dimension_numbers = #tpu.dot_dimension_numbers<[2], [2], [1], [1], [0, 0, 0, 1, 1, 1], [0], [0]>} : vector<2x8x16xbf16>, vector<2x8x16xbf16>, vector<2x8x8xf32> -> vector<2x8x8xf32>
    "tpu.trace_stop"() : () -> ()
    %cst_32 = arith.constant dense<0xFF800000> : vector<2x8xf32>
    %39 = vector.multi_reduction <maximumf>, %38, %cst_32 [2] : vector<2x8x8xf32> to vector<2x8xf32>
    %40 = vector.shape_cast %39 : vector<2x8xf32> to vector<2x8x1xf32>
    %41 = vector.broadcast %40 : vector<2x8x1xf32> to vector<2x8x8xf32>
    %42 = arith.subf %38, %41 : vector<2x8x8xf32>
    %43 = math.exp %42 : vector<2x8x8xf32>
    %cst_33 = arith.constant dense<0.000000e+00> : vector<2x8xf32>
    %44 = vector.multi_reduction <add>, %43, %cst_33 [2] : vector<2x8x8xf32> to vector<2x8xf32>
    %45 = vector.shape_cast %44 : vector<2x8xf32> to vector<2x8x1xf32>
    %46 = tpu.reciprocal %45 {approx = true} : vector<2x8x1xf32> -> vector<2x8x1xf32>
    %47 = vector.broadcast %46 : vector<2x8x1xf32> to vector<2x8x8xf32>
    %48 = arith.mulf %43, %47 : vector<2x8x8xf32>
    %49 = arith.truncf %48 : vector<2x8x8xf32> to vector<2x8x8xbf16>
    "tpu.trace_start"() <{level = 10 : i32, message = "bqk,bkd->bqd"}> : () -> ()
    %cst_34 = arith.constant dense<0.000000e+00> : vector<2x8x16xf32>
    %50 = tpu.matmul %49, %37, %cst_34 {dimension_numbers = #tpu.dot_dimension_numbers<[2], [1], [1], [2], [0, 0, 0, 1, 1, 2], [0], [0]>} : vector<2x8x8xbf16>, vector<2x8x16xbf16>, vector<2x8x16xf32> -> vector<2x8x16xf32>
    "tpu.trace_stop"() : () -> ()
    %51 = vector.extract_strided_slice %31 {offsets = [0, 0, 16], sizes = [2, 8, 16], strides = [1, 1, 1]} : vector<2x8x192xf32> to vector<2x8x16xf32>
    %52 = arith.truncf %51 : vector<2x8x16xf32> to vector<2x8x16xbf16>
    %53 = vector.extract_strided_slice %31 {offsets = [0, 0, 80], sizes = [2, 8, 16], strides = [1, 1, 1]} : vector<2x8x192xf32> to vector<2x8x16xf32>
    %54 = arith.truncf %53 : vector<2x8x16xf32> to vector<2x8x16xbf16>
    %55 = vector.extract_strided_slice %31 {offsets = [0, 0, 144], sizes = [2, 8, 16], strides = [1, 1, 1]} : vector<2x8x192xf32> to vector<2x8x16xf32>
    %56 = arith.truncf %55 : vector<2x8x16xf32> to vector<2x8x16xbf16>
    "tpu.trace_start"() <{level = 10 : i32, message = "bqd,bkd->bqk"}> : () -> ()
    %cst_35 = arith.constant dense<0.000000e+00> : vector<2x8x8xf32>
    %57 = tpu.matmul %52, %54, %cst_35 {dimension_numbers = #tpu.dot_dimension_numbers<[2], [2], [1], [1], [0, 0, 0, 1, 1, 1], [0], [0]>} : vector<2x8x16xbf16>, vector<2x8x16xbf16>, vector<2x8x8xf32> -> vector<2x8x8xf32>
    "tpu.trace_stop"() : () -> ()
    %cst_36 = arith.constant dense<0xFF800000> : vector<2x8xf32>
    %58 = vector.multi_reduction <maximumf>, %57, %cst_36 [2] : vector<2x8x8xf32> to vector<2x8xf32>
    %59 = vector.shape_cast %58 : vector<2x8xf32> to vector<2x8x1xf32>
    %60 = vector.broadcast %59 : vector<2x8x1xf32> to vector<2x8x8xf32>
    %61 = arith.subf %57, %60 : vector<2x8x8xf32>
    %62 = math.exp %61 : vector<2x8x8xf32>
    %cst_37 = arith.constant dense<0.000000e+00> : vector<2x8xf32>
    %63 = vector.multi_reduction <add>, %62, %cst_37 [2] : vector<2x8x8xf32> to vector<2x8xf32>
    %64 = vector.shape_cast %63 : vector<2x8xf32> to vector<2x8x1xf32>
    %65 = tpu.reciprocal %64 {approx = true} : vector<2x8x1xf32> -> vector<2x8x1xf32>
    %66 = vector.broadcast %65 : vector<2x8x1xf32> to vector<2x8x8xf32>
    %67 = arith.mulf %62, %66 : vector<2x8x8xf32>
    %68 = arith.truncf %67 : vector<2x8x8xf32> to vector<2x8x8xbf16>
    "tpu.trace_start"() <{level = 10 : i32, message = "bqk,bkd->bqd"}> : () -> ()
    %cst_38 = arith.constant dense<0.000000e+00> : vector<2x8x16xf32>
    %69 = tpu.matmul %68, %56, %cst_38 {dimension_numbers = #tpu.dot_dimension_numbers<[2], [1], [1], [2], [0, 0, 0, 1, 1, 2], [0], [0]>} : vector<2x8x8xbf16>, vector<2x8x16xbf16>, vector<2x8x16xf32> -> vector<2x8x16xf32>
    "tpu.trace_stop"() : () -> ()
    %70 = vector.extract_strided_slice %31 {offsets = [0, 0, 32], sizes = [2, 8, 16], strides = [1, 1, 1]} : vector<2x8x192xf32> to vector<2x8x16xf32>
    %71 = arith.truncf %70 : vector<2x8x16xf32> to vector<2x8x16xbf16>
    %72 = vector.extract_strided_slice %31 {offsets = [0, 0, 96], sizes = [2, 8, 16], strides = [1, 1, 1]} : vector<2x8x192xf32> to vector<2x8x16xf32>
    %73 = arith.truncf %72 : vector<2x8x16xf32> to vector<2x8x16xbf16>
    %74 = vector.extract_strided_slice %31 {offsets = [0, 0, 160], sizes = [2, 8, 16], strides = [1, 1, 1]} : vector<2x8x192xf32> to vector<2x8x16xf32>
    %75 = arith.truncf %74 : vector<2x8x16xf32> to vector<2x8x16xbf16>
    "tpu.trace_start"() <{level = 10 : i32, message = "bqd,bkd->bqk"}> : () -> ()
    %cst_39 = arith.constant dense<0.000000e+00> : vector<2x8x8xf32>
    %76 = tpu.matmul %71, %73, %cst_39 {dimension_numbers = #tpu.dot_dimension_numbers<[2], [2], [1], [1], [0, 0, 0, 1, 1, 1], [0], [0]>} : vector<2x8x16xbf16>, vector<2x8x16xbf16>, vector<2x8x8xf32> -> vector<2x8x8xf32>
    "tpu.trace_stop"() : () -> ()
    %cst_40 = arith.constant dense<0xFF800000> : vector<2x8xf32>
    %77 = vector.multi_reduction <maximumf>, %76, %cst_40 [2] : vector<2x8x8xf32> to vector<2x8xf32>
    %78 = vector.shape_cast %77 : vector<2x8xf32> to vector<2x8x1xf32>
    %79 = vector.broadcast %78 : vector<2x8x1xf32> to vector<2x8x8xf32>
    %80 = arith.subf %76, %79 : vector<2x8x8xf32>
    %81 = math.exp %80 : vector<2x8x8xf32>
    %cst_41 = arith.constant dense<0.000000e+00> : vector<2x8xf32>
    %82 = vector.multi_reduction <add>, %81, %cst_41 [2] : vector<2x8x8xf32> to vector<2x8xf32>
    %83 = vector.shape_cast %82 : vector<2x8xf32> to vector<2x8x1xf32>
    %84 = tpu.reciprocal %83 {approx = true} : vector<2x8x1xf32> -> vector<2x8x1xf32>
    %85 = vector.broadcast %84 : vector<2x8x1xf32> to vector<2x8x8xf32>
    %86 = arith.mulf %81, %85 : vector<2x8x8xf32>
    %87 = arith.truncf %86 : vector<2x8x8xf32> to vector<2x8x8xbf16>
    "tpu.trace_start"() <{level = 10 : i32, message = "bqk,bkd->bqd"}> : () -> ()
    %cst_42 = arith.constant dense<0.000000e+00> : vector<2x8x16xf32>
    %88 = tpu.matmul %87, %75, %cst_42 {dimension_numbers = #tpu.dot_dimension_numbers<[2], [1], [1], [2], [0, 0, 0, 1, 1, 2], [0], [0]>} : vector<2x8x8xbf16>, vector<2x8x16xbf16>, vector<2x8x16xf32> -> vector<2x8x16xf32>
    "tpu.trace_stop"() : () -> ()
    %89 = vector.extract_strided_slice %31 {offsets = [0, 0, 48], sizes = [2, 8, 16], strides = [1, 1, 1]} : vector<2x8x192xf32> to vector<2x8x16xf32>
    %90 = arith.truncf %89 : vector<2x8x16xf32> to vector<2x8x16xbf16>
    %91 = vector.extract_strided_slice %31 {offsets = [0, 0, 112], sizes = [2, 8, 16], strides = [1, 1, 1]} : vector<2x8x192xf32> to vector<2x8x16xf32>
    %92 = arith.truncf %91 : vector<2x8x16xf32> to vector<2x8x16xbf16>
    %93 = vector.extract_strided_slice %31 {offsets = [0, 0, 176], sizes = [2, 8, 16], strides = [1, 1, 1]} : vector<2x8x192xf32> to vector<2x8x16xf32>
    %94 = arith.truncf %93 : vector<2x8x16xf32> to vector<2x8x16xbf16>
    "tpu.trace_start"() <{level = 10 : i32, message = "bqd,bkd->bqk"}> : () -> ()
    %cst_43 = arith.constant dense<0.000000e+00> : vector<2x8x8xf32>
    %95 = tpu.matmul %90, %92, %cst_43 {dimension_numbers = #tpu.dot_dimension_numbers<[2], [2], [1], [1], [0, 0, 0, 1, 1, 1], [0], [0]>} : vector<2x8x16xbf16>, vector<2x8x16xbf16>, vector<2x8x8xf32> -> vector<2x8x8xf32>
    "tpu.trace_stop"() : () -> ()
    %cst_44 = arith.constant dense<0xFF800000> : vector<2x8xf32>
    %96 = vector.multi_reduction <maximumf>, %95, %cst_44 [2] : vector<2x8x8xf32> to vector<2x8xf32>
    %97 = vector.shape_cast %96 : vector<2x8xf32> to vector<2x8x1xf32>
    %98 = vector.broadcast %97 : vector<2x8x1xf32> to vector<2x8x8xf32>
    %99 = arith.subf %95, %98 : vector<2x8x8xf32>
    %100 = math.exp %99 : vector<2x8x8xf32>
    %cst_45 = arith.constant dense<0.000000e+00> : vector<2x8xf32>
    %101 = vector.multi_reduction <add>, %100, %cst_45 [2] : vector<2x8x8xf32> to vector<2x8xf32>
    %102 = vector.shape_cast %101 : vector<2x8xf32> to vector<2x8x1xf32>
    %103 = tpu.reciprocal %102 {approx = true} : vector<2x8x1xf32> -> vector<2x8x1xf32>
    %104 = vector.broadcast %103 : vector<2x8x1xf32> to vector<2x8x8xf32>
    %105 = arith.mulf %100, %104 : vector<2x8x8xf32>
    %106 = arith.truncf %105 : vector<2x8x8xf32> to vector<2x8x8xbf16>
    "tpu.trace_start"() <{level = 10 : i32, message = "bqk,bkd->bqd"}> : () -> ()
    %cst_46 = arith.constant dense<0.000000e+00> : vector<2x8x16xf32>
    %107 = tpu.matmul %106, %94, %cst_46 {dimension_numbers = #tpu.dot_dimension_numbers<[2], [1], [1], [2], [0, 0, 0, 1, 1, 2], [0], [0]>} : vector<2x8x8xbf16>, vector<2x8x16xbf16>, vector<2x8x16xf32> -> vector<2x8x16xf32>
    "tpu.trace_stop"() : () -> ()
    %108 = tpu.concatenate %50, %69, %88, %107 in 2 : vector<2x8x16xf32>, vector<2x8x16xf32>, vector<2x8x16xf32>, vector<2x8x16xf32> -> vector<2x8x64xf32>
    %109 = vector.shape_cast %108 : vector<2x8x64xf32> to vector<16x64xf32>
    %110 = arith.truncf %109 : vector<16x64xf32> to vector<16x64xbf16>
    %111 = vector.extract_strided_slice %4 {offsets = [0, 0, 0], sizes = [1, 64, 64], strides = [1, 1, 1]} : vector<4x64x64xbf16> to vector<1x64x64xbf16>
    %112 = vector.shape_cast %111 : vector<1x64x64xbf16> to vector<64x64xbf16>
    %cst_47 = arith.constant dense<0.000000e+00> : vector<16x64xf32>
    %113 = tpu.matmul %110, %112, %cst_47 {dimension_numbers = #tpu.dot_dimension_numbers<[1], [0], [0], [1], [0, 0, 1, 1], [], []>} : vector<16x64xbf16>, vector<64x64xbf16>, vector<16x64xf32> -> vector<16x64xf32>
    %114 = vector.broadcast %17 : vector<1x64xf32> to vector<16x64xf32>
    %115 = arith.addf %113, %114 : vector<16x64xf32>
    %116 = arith.addf %14, %115 : vector<16x64xf32>
    %cst_48 = arith.constant dense<0.000000e+00> : vector<16xf32>
    %117 = vector.multi_reduction <add>, %116, %cst_48 [1] : vector<16x64xf32> to vector<16xf32>
    %118 = vector.shape_cast %117 : vector<16xf32> to vector<16x1xf32>
    %cst_49 = arith.constant 6.400000e+01 : f32
    %119 = vector.broadcast %cst_49 : f32 to vector<16x1xf32>
    %120 = arith.divf %118, %119 : vector<16x1xf32>
    %121 = vector.broadcast %120 : vector<16x1xf32> to vector<16x64xf32>
    %122 = arith.subf %116, %121 : vector<16x64xf32>
    %123 = arith.mulf %122, %122 : vector<16x64xf32>
    %cst_50 = arith.constant dense<0.000000e+00> : vector<16xf32>
    %124 = vector.multi_reduction <add>, %123, %cst_50 [1] : vector<16x64xf32> to vector<16xf32>
    %125 = vector.shape_cast %124 : vector<16xf32> to vector<16x1xf32>
    %cst_51 = arith.constant 6.400000e+01 : f32
    %126 = vector.broadcast %cst_51 : f32 to vector<16x1xf32>
    %127 = arith.divf %125, %126 : vector<16x1xf32>
    %cst_52 = arith.constant 9.99999974E-6 : f32
    %128 = vector.broadcast %cst_52 : f32 to vector<16x1xf32>
    %129 = arith.addf %127, %128 : vector<16x1xf32>
    %130 = math.rsqrt %129 : vector<16x1xf32>
    %131 = vector.broadcast %130 : vector<16x1xf32> to vector<16x64xf32>
    %132 = arith.mulf %122, %131 : vector<16x64xf32>
    %133 = vector.broadcast %18 : vector<1x64xf32> to vector<16x64xf32>
    %134 = arith.mulf %132, %133 : vector<16x64xf32>
    %135 = vector.broadcast %19 : vector<1x64xf32> to vector<16x64xf32>
    %136 = arith.addf %134, %135 : vector<16x64xf32>
    %137 = arith.truncf %136 : vector<16x64xf32> to vector<16x64xbf16>
    %138 = vector.extract_strided_slice %5 {offsets = [0, 0, 0], sizes = [1, 64, 128], strides = [1, 1, 1]} : vector<4x64x128xbf16> to vector<1x64x128xbf16>
    %139 = vector.shape_cast %138 : vector<1x64x128xbf16> to vector<64x128xbf16>
    %cst_53 = arith.constant dense<0.000000e+00> : vector<16x128xf32>
    %140 = tpu.matmul %137, %139, %cst_53 {dimension_numbers = #tpu.dot_dimension_numbers<[1], [0], [0], [1], [0, 0, 1, 1], [], []>} : vector<16x64xbf16>, vector<64x128xbf16>, vector<16x128xf32> -> vector<16x128xf32>
    %141 = vector.extract_strided_slice %8 {offsets = [0, 0, 0], sizes = [1, 1, 128], strides = [1, 1, 1]} : vector<4x1x128xf32> to vector<1x1x128xf32>
    %142 = vector.shape_cast %141 : vector<1x1x128xf32> to vector<1x128xf32>
    %143 = vector.broadcast %142 : vector<1x128xf32> to vector<16x128xf32>
    %144 = arith.addf %140, %143 : vector<16x128xf32>
    %cst_54 = arith.constant 0.000000e+00 : f32
    %145 = vector.broadcast %cst_54 : f32 to vector<16x128xf32>
    %146 = arith.maximumf %144, %145 : vector<16x128xf32>
    %147 = arith.truncf %146 : vector<16x128xf32> to vector<16x128xbf16>
    %148 = vector.extract_strided_slice %6 {offsets = [0, 0, 0], sizes = [1, 128, 64], strides = [1, 1, 1]} : vector<4x128x64xbf16> to vector<1x128x64xbf16>
    %149 = vector.shape_cast %148 : vector<1x128x64xbf16> to vector<128x64xbf16>
    %cst_55 = arith.constant dense<0.000000e+00> : vector<16x64xf32>
    %150 = tpu.matmul %147, %149, %cst_55 {dimension_numbers = #tpu.dot_dimension_numbers<[1], [0], [0], [1], [0, 0, 1, 1], [], []>} : vector<16x128xbf16>, vector<128x64xbf16>, vector<16x64xf32> -> vector<16x64xf32>
    %151 = vector.broadcast %20 : vector<1x64xf32> to vector<16x64xf32>
    %152 = arith.addf %150, %151 : vector<16x64xf32>
    %153 = arith.addf %136, %152 : vector<16x64xf32>
    %cst_56 = arith.constant dense<0.000000e+00> : vector<16xf32>
    %154 = vector.multi_reduction <add>, %153, %cst_56 [1] : vector<16x64xf32> to vector<16xf32>
    %155 = vector.shape_cast %154 : vector<16xf32> to vector<16x1xf32>
    %cst_57 = arith.constant 6.400000e+01 : f32
    %156 = vector.broadcast %cst_57 : f32 to vector<16x1xf32>
    %157 = arith.divf %155, %156 : vector<16x1xf32>
    %158 = vector.broadcast %157 : vector<16x1xf32> to vector<16x64xf32>
    %159 = arith.subf %153, %158 : vector<16x64xf32>
    %160 = arith.mulf %159, %159 : vector<16x64xf32>
    %cst_58 = arith.constant dense<0.000000e+00> : vector<16xf32>
    %161 = vector.multi_reduction <add>, %160, %cst_58 [1] : vector<16x64xf32> to vector<16xf32>
    %162 = vector.shape_cast %161 : vector<16xf32> to vector<16x1xf32>
    %cst_59 = arith.constant 6.400000e+01 : f32
    %163 = vector.broadcast %cst_59 : f32 to vector<16x1xf32>
    %164 = arith.divf %162, %163 : vector<16x1xf32>
    %cst_60 = arith.constant 9.99999974E-6 : f32
    %165 = vector.broadcast %cst_60 : f32 to vector<16x1xf32>
    %166 = arith.addf %164, %165 : vector<16x1xf32>
    %167 = math.rsqrt %166 : vector<16x1xf32>
    %168 = vector.broadcast %167 : vector<16x1xf32> to vector<16x64xf32>
    %169 = arith.mulf %159, %168 : vector<16x64xf32>
    %170 = vector.broadcast %21 : vector<1x64xf32> to vector<16x64xf32>
    %171 = arith.mulf %169, %170 : vector<16x64xf32>
    %172 = vector.broadcast %22 : vector<1x64xf32> to vector<16x64xf32>
    %173 = arith.addf %171, %172 : vector<16x64xf32>
    %174 = vector.extract_strided_slice %9 {offsets = [1, 0, 0], sizes = [1, 8, 64], strides = [1, 1, 1]} : vector<4x8x64xf32> to vector<1x8x64xf32>
    %175 = vector.shape_cast %174 : vector<1x8x64xf32> to vector<8x64xf32>
    %176 = vector.extract_strided_slice %175 {offsets = [0, 0], sizes = [1, 64], strides = [1, 1]} : vector<8x64xf32> to vector<1x64xf32>
    %177 = vector.extract_strided_slice %175 {offsets = [1, 0], sizes = [1, 64], strides = [1, 1]} : vector<8x64xf32> to vector<1x64xf32>
    %178 = vector.extract_strided_slice %175 {offsets = [2, 0], sizes = [1, 64], strides = [1, 1]} : vector<8x64xf32> to vector<1x64xf32>
    %179 = vector.extract_strided_slice %175 {offsets = [3, 0], sizes = [1, 64], strides = [1, 1]} : vector<8x64xf32> to vector<1x64xf32>
    %180 = vector.extract_strided_slice %175 {offsets = [4, 0], sizes = [1, 64], strides = [1, 1]} : vector<8x64xf32> to vector<1x64xf32>
    %181 = vector.extract_strided_slice %175 {offsets = [5, 0], sizes = [1, 64], strides = [1, 1]} : vector<8x64xf32> to vector<1x64xf32>
    %182 = arith.truncf %173 : vector<16x64xf32> to vector<16x64xbf16>
    %183 = vector.extract_strided_slice %3 {offsets = [1, 0, 0], sizes = [1, 64, 192], strides = [1, 1, 1]} : vector<4x64x192xbf16> to vector<1x64x192xbf16>
    %184 = vector.shape_cast %183 : vector<1x64x192xbf16> to vector<64x192xbf16>
    %cst_61 = arith.constant dense<0.000000e+00> : vector<16x192xf32>
    %185 = tpu.matmul %182, %184, %cst_61 {dimension_numbers = #tpu.dot_dimension_numbers<[1], [0], [0], [1], [0, 0, 1, 1], [], []>} : vector<16x64xbf16>, vector<64x192xbf16>, vector<16x192xf32> -> vector<16x192xf32>
    %186 = vector.extract_strided_slice %7 {offsets = [1, 0, 0], sizes = [1, 1, 192], strides = [1, 1, 1]} : vector<4x1x192xf32> to vector<1x1x192xf32>
    %187 = vector.shape_cast %186 : vector<1x1x192xf32> to vector<1x192xf32>
    %188 = vector.broadcast %187 : vector<1x192xf32> to vector<16x192xf32>
    %189 = arith.addf %185, %188 : vector<16x192xf32>
    %190 = vector.shape_cast %189 : vector<16x192xf32> to vector<2x8x192xf32>
    %191 = vector.extract_strided_slice %190 {offsets = [0, 0, 0], sizes = [2, 8, 16], strides = [1, 1, 1]} : vector<2x8x192xf32> to vector<2x8x16xf32>
    %192 = arith.truncf %191 : vector<2x8x16xf32> to vector<2x8x16xbf16>
    %193 = vector.extract_strided_slice %190 {offsets = [0, 0, 64], sizes = [2, 8, 16], strides = [1, 1, 1]} : vector<2x8x192xf32> to vector<2x8x16xf32>
    %194 = arith.truncf %193 : vector<2x8x16xf32> to vector<2x8x16xbf16>
    %195 = vector.extract_strided_slice %190 {offsets = [0, 0, 128], sizes = [2, 8, 16], strides = [1, 1, 1]} : vector<2x8x192xf32> to vector<2x8x16xf32>
    %196 = arith.truncf %195 : vector<2x8x16xf32> to vector<2x8x16xbf16>
    "tpu.trace_start"() <{level = 10 : i32, message = "bqd,bkd->bqk"}> : () -> ()
    %cst_62 = arith.constant dense<0.000000e+00> : vector<2x8x8xf32>
    %197 = tpu.matmul %192, %194, %cst_62 {dimension_numbers = #tpu.dot_dimension_numbers<[2], [2], [1], [1], [0, 0, 0, 1, 1, 1], [0], [0]>} : vector<2x8x16xbf16>, vector<2x8x16xbf16>, vector<2x8x8xf32> -> vector<2x8x8xf32>
    "tpu.trace_stop"() : () -> ()
    %cst_63 = arith.constant dense<0xFF800000> : vector<2x8xf32>
    %198 = vector.multi_reduction <maximumf>, %197, %cst_63 [2] : vector<2x8x8xf32> to vector<2x8xf32>
    %199 = vector.shape_cast %198 : vector<2x8xf32> to vector<2x8x1xf32>
    %200 = vector.broadcast %199 : vector<2x8x1xf32> to vector<2x8x8xf32>
    %201 = arith.subf %197, %200 : vector<2x8x8xf32>
    %202 = math.exp %201 : vector<2x8x8xf32>
    %cst_64 = arith.constant dense<0.000000e+00> : vector<2x8xf32>
    %203 = vector.multi_reduction <add>, %202, %cst_64 [2] : vector<2x8x8xf32> to vector<2x8xf32>
    %204 = vector.shape_cast %203 : vector<2x8xf32> to vector<2x8x1xf32>
    %205 = tpu.reciprocal %204 {approx = true} : vector<2x8x1xf32> -> vector<2x8x1xf32>
    %206 = vector.broadcast %205 : vector<2x8x1xf32> to vector<2x8x8xf32>
    %207 = arith.mulf %202, %206 : vector<2x8x8xf32>
    %208 = arith.truncf %207 : vector<2x8x8xf32> to vector<2x8x8xbf16>
    "tpu.trace_start"() <{level = 10 : i32, message = "bqk,bkd->bqd"}> : () -> ()
    %cst_65 = arith.constant dense<0.000000e+00> : vector<2x8x16xf32>
    %209 = tpu.matmul %208, %196, %cst_65 {dimension_numbers = #tpu.dot_dimension_numbers<[2], [1], [1], [2], [0, 0, 0, 1, 1, 2], [0], [0]>} : vector<2x8x8xbf16>, vector<2x8x16xbf16>, vector<2x8x16xf32> -> vector<2x8x16xf32>
    "tpu.trace_stop"() : () -> ()
    %210 = vector.extract_strided_slice %190 {offsets = [0, 0, 16], sizes = [2, 8, 16], strides = [1, 1, 1]} : vector<2x8x192xf32> to vector<2x8x16xf32>
    %211 = arith.truncf %210 : vector<2x8x16xf32> to vector<2x8x16xbf16>
    %212 = vector.extract_strided_slice %190 {offsets = [0, 0, 80], sizes = [2, 8, 16], strides = [1, 1, 1]} : vector<2x8x192xf32> to vector<2x8x16xf32>
    %213 = arith.truncf %212 : vector<2x8x16xf32> to vector<2x8x16xbf16>
    %214 = vector.extract_strided_slice %190 {offsets = [0, 0, 144], sizes = [2, 8, 16], strides = [1, 1, 1]} : vector<2x8x192xf32> to vector<2x8x16xf32>
    %215 = arith.truncf %214 : vector<2x8x16xf32> to vector<2x8x16xbf16>
    "tpu.trace_start"() <{level = 10 : i32, message = "bqd,bkd->bqk"}> : () -> ()
    %cst_66 = arith.constant dense<0.000000e+00> : vector<2x8x8xf32>
    %216 = tpu.matmul %211, %213, %cst_66 {dimension_numbers = #tpu.dot_dimension_numbers<[2], [2], [1], [1], [0, 0, 0, 1, 1, 1], [0], [0]>} : vector<2x8x16xbf16>, vector<2x8x16xbf16>, vector<2x8x8xf32> -> vector<2x8x8xf32>
    "tpu.trace_stop"() : () -> ()
    %cst_67 = arith.constant dense<0xFF800000> : vector<2x8xf32>
    %217 = vector.multi_reduction <maximumf>, %216, %cst_67 [2] : vector<2x8x8xf32> to vector<2x8xf32>
    %218 = vector.shape_cast %217 : vector<2x8xf32> to vector<2x8x1xf32>
    %219 = vector.broadcast %218 : vector<2x8x1xf32> to vector<2x8x8xf32>
    %220 = arith.subf %216, %219 : vector<2x8x8xf32>
    %221 = math.exp %220 : vector<2x8x8xf32>
    %cst_68 = arith.constant dense<0.000000e+00> : vector<2x8xf32>
    %222 = vector.multi_reduction <add>, %221, %cst_68 [2] : vector<2x8x8xf32> to vector<2x8xf32>
    %223 = vector.shape_cast %222 : vector<2x8xf32> to vector<2x8x1xf32>
    %224 = tpu.reciprocal %223 {approx = true} : vector<2x8x1xf32> -> vector<2x8x1xf32>
    %225 = vector.broadcast %224 : vector<2x8x1xf32> to vector<2x8x8xf32>
    %226 = arith.mulf %221, %225 : vector<2x8x8xf32>
    %227 = arith.truncf %226 : vector<2x8x8xf32> to vector<2x8x8xbf16>
    "tpu.trace_start"() <{level = 10 : i32, message = "bqk,bkd->bqd"}> : () -> ()
    %cst_69 = arith.constant dense<0.000000e+00> : vector<2x8x16xf32>
    %228 = tpu.matmul %227, %215, %cst_69 {dimension_numbers = #tpu.dot_dimension_numbers<[2], [1], [1], [2], [0, 0, 0, 1, 1, 2], [0], [0]>} : vector<2x8x8xbf16>, vector<2x8x16xbf16>, vector<2x8x16xf32> -> vector<2x8x16xf32>
    "tpu.trace_stop"() : () -> ()
    %229 = vector.extract_strided_slice %190 {offsets = [0, 0, 32], sizes = [2, 8, 16], strides = [1, 1, 1]} : vector<2x8x192xf32> to vector<2x8x16xf32>
    %230 = arith.truncf %229 : vector<2x8x16xf32> to vector<2x8x16xbf16>
    %231 = vector.extract_strided_slice %190 {offsets = [0, 0, 96], sizes = [2, 8, 16], strides = [1, 1, 1]} : vector<2x8x192xf32> to vector<2x8x16xf32>
    %232 = arith.truncf %231 : vector<2x8x16xf32> to vector<2x8x16xbf16>
    %233 = vector.extract_strided_slice %190 {offsets = [0, 0, 160], sizes = [2, 8, 16], strides = [1, 1, 1]} : vector<2x8x192xf32> to vector<2x8x16xf32>
    %234 = arith.truncf %233 : vector<2x8x16xf32> to vector<2x8x16xbf16>
    "tpu.trace_start"() <{level = 10 : i32, message = "bqd,bkd->bqk"}> : () -> ()
    %cst_70 = arith.constant dense<0.000000e+00> : vector<2x8x8xf32>
    %235 = tpu.matmul %230, %232, %cst_70 {dimension_numbers = #tpu.dot_dimension_numbers<[2], [2], [1], [1], [0, 0, 0, 1, 1, 1], [0], [0]>} : vector<2x8x16xbf16>, vector<2x8x16xbf16>, vector<2x8x8xf32> -> vector<2x8x8xf32>
    "tpu.trace_stop"() : () -> ()
    %cst_71 = arith.constant dense<0xFF800000> : vector<2x8xf32>
    %236 = vector.multi_reduction <maximumf>, %235, %cst_71 [2] : vector<2x8x8xf32> to vector<2x8xf32>
    %237 = vector.shape_cast %236 : vector<2x8xf32> to vector<2x8x1xf32>
    %238 = vector.broadcast %237 : vector<2x8x1xf32> to vector<2x8x8xf32>
    %239 = arith.subf %235, %238 : vector<2x8x8xf32>
    %240 = math.exp %239 : vector<2x8x8xf32>
    %cst_72 = arith.constant dense<0.000000e+00> : vector<2x8xf32>
    %241 = vector.multi_reduction <add>, %240, %cst_72 [2] : vector<2x8x8xf32> to vector<2x8xf32>
    %242 = vector.shape_cast %241 : vector<2x8xf32> to vector<2x8x1xf32>
    %243 = tpu.reciprocal %242 {approx = true} : vector<2x8x1xf32> -> vector<2x8x1xf32>
    %244 = vector.broadcast %243 : vector<2x8x1xf32> to vector<2x8x8xf32>
    %245 = arith.mulf %240, %244 : vector<2x8x8xf32>
    %246 = arith.truncf %245 : vector<2x8x8xf32> to vector<2x8x8xbf16>
    "tpu.trace_start"() <{level = 10 : i32, message = "bqk,bkd->bqd"}> : () -> ()
    %cst_73 = arith.constant dense<0.000000e+00> : vector<2x8x16xf32>
    %247 = tpu.matmul %246, %234, %cst_73 {dimension_numbers = #tpu.dot_dimension_numbers<[2], [1], [1], [2], [0, 0, 0, 1, 1, 2], [0], [0]>} : vector<2x8x8xbf16>, vector<2x8x16xbf16>, vector<2x8x16xf32> -> vector<2x8x16xf32>
    "tpu.trace_stop"() : () -> ()
    %248 = vector.extract_strided_slice %190 {offsets = [0, 0, 48], sizes = [2, 8, 16], strides = [1, 1, 1]} : vector<2x8x192xf32> to vector<2x8x16xf32>
    %249 = arith.truncf %248 : vector<2x8x16xf32> to vector<2x8x16xbf16>
    %250 = vector.extract_strided_slice %190 {offsets = [0, 0, 112], sizes = [2, 8, 16], strides = [1, 1, 1]} : vector<2x8x192xf32> to vector<2x8x16xf32>
    %251 = arith.truncf %250 : vector<2x8x16xf32> to vector<2x8x16xbf16>
    %252 = vector.extract_strided_slice %190 {offsets = [0, 0, 176], sizes = [2, 8, 16], strides = [1, 1, 1]} : vector<2x8x192xf32> to vector<2x8x16xf32>
    %253 = arith.truncf %252 : vector<2x8x16xf32> to vector<2x8x16xbf16>
    "tpu.trace_start"() <{level = 10 : i32, message = "bqd,bkd->bqk"}> : () -> ()
    %cst_74 = arith.constant dense<0.000000e+00> : vector<2x8x8xf32>
    %254 = tpu.matmul %249, %251, %cst_74 {dimension_numbers = #tpu.dot_dimension_numbers<[2], [2], [1], [1], [0, 0, 0, 1, 1, 1], [0], [0]>} : vector<2x8x16xbf16>, vector<2x8x16xbf16>, vector<2x8x8xf32> -> vector<2x8x8xf32>
    "tpu.trace_stop"() : () -> ()
    %cst_75 = arith.constant dense<0xFF800000> : vector<2x8xf32>
    %255 = vector.multi_reduction <maximumf>, %254, %cst_75 [2] : vector<2x8x8xf32> to vector<2x8xf32>
    %256 = vector.shape_cast %255 : vector<2x8xf32> to vector<2x8x1xf32>
    %257 = vector.broadcast %256 : vector<2x8x1xf32> to vector<2x8x8xf32>
    %258 = arith.subf %254, %257 : vector<2x8x8xf32>
    %259 = math.exp %258 : vector<2x8x8xf32>
    %cst_76 = arith.constant dense<0.000000e+00> : vector<2x8xf32>
    %260 = vector.multi_reduction <add>, %259, %cst_76 [2] : vector<2x8x8xf32> to vector<2x8xf32>
    %261 = vector.shape_cast %260 : vector<2x8xf32> to vector<2x8x1xf32>
    %262 = tpu.reciprocal %261 {approx = true} : vector<2x8x1xf32> -> vector<2x8x1xf32>
    %263 = vector.broadcast %262 : vector<2x8x1xf32> to vector<2x8x8xf32>
    %264 = arith.mulf %259, %263 : vector<2x8x8xf32>
    %265 = arith.truncf %264 : vector<2x8x8xf32> to vector<2x8x8xbf16>
    "tpu.trace_start"() <{level = 10 : i32, message = "bqk,bkd->bqd"}> : () -> ()
    %cst_77 = arith.constant dense<0.000000e+00> : vector<2x8x16xf32>
    %266 = tpu.matmul %265, %253, %cst_77 {dimension_numbers = #tpu.dot_dimension_numbers<[2], [1], [1], [2], [0, 0, 0, 1, 1, 2], [0], [0]>} : vector<2x8x8xbf16>, vector<2x8x16xbf16>, vector<2x8x16xf32> -> vector<2x8x16xf32>
    "tpu.trace_stop"() : () -> ()
    %267 = tpu.concatenate %209, %228, %247, %266 in 2 : vector<2x8x16xf32>, vector<2x8x16xf32>, vector<2x8x16xf32>, vector<2x8x16xf32> -> vector<2x8x64xf32>
    %268 = vector.shape_cast %267 : vector<2x8x64xf32> to vector<16x64xf32>
    %269 = arith.truncf %268 : vector<16x64xf32> to vector<16x64xbf16>
    %270 = vector.extract_strided_slice %4 {offsets = [1, 0, 0], sizes = [1, 64, 64], strides = [1, 1, 1]} : vector<4x64x64xbf16> to vector<1x64x64xbf16>
    %271 = vector.shape_cast %270 : vector<1x64x64xbf16> to vector<64x64xbf16>
    %cst_78 = arith.constant dense<0.000000e+00> : vector<16x64xf32>
    %272 = tpu.matmul %269, %271, %cst_78 {dimension_numbers = #tpu.dot_dimension_numbers<[1], [0], [0], [1], [0, 0, 1, 1], [], []>} : vector<16x64xbf16>, vector<64x64xbf16>, vector<16x64xf32> -> vector<16x64xf32>
    %273 = vector.broadcast %176 : vector<1x64xf32> to vector<16x64xf32>
    %274 = arith.addf %272, %273 : vector<16x64xf32>
    %275 = arith.addf %173, %274 : vector<16x64xf32>
    %cst_79 = arith.constant dense<0.000000e+00> : vector<16xf32>
    %276 = vector.multi_reduction <add>, %275, %cst_79 [1] : vector<16x64xf32> to vector<16xf32>
    %277 = vector.shape_cast %276 : vector<16xf32> to vector<16x1xf32>
    %cst_80 = arith.constant 6.400000e+01 : f32
    %278 = vector.broadcast %cst_80 : f32 to vector<16x1xf32>
    %279 = arith.divf %277, %278 : vector<16x1xf32>
    %280 = vector.broadcast %279 : vector<16x1xf32> to vector<16x64xf32>
    %281 = arith.subf %275, %280 : vector<16x64xf32>
    %282 = arith.mulf %281, %281 : vector<16x64xf32>
    %cst_81 = arith.constant dense<0.000000e+00> : vector<16xf32>
    %283 = vector.multi_reduction <add>, %282, %cst_81 [1] : vector<16x64xf32> to vector<16xf32>
    %284 = vector.shape_cast %283 : vector<16xf32> to vector<16x1xf32>
    %cst_82 = arith.constant 6.400000e+01 : f32
    %285 = vector.broadcast %cst_82 : f32 to vector<16x1xf32>
    %286 = arith.divf %284, %285 : vector<16x1xf32>
    %cst_83 = arith.constant 9.99999974E-6 : f32
    %287 = vector.broadcast %cst_83 : f32 to vector<16x1xf32>
    %288 = arith.addf %286, %287 : vector<16x1xf32>
    %289 = math.rsqrt %288 : vector<16x1xf32>
    %290 = vector.broadcast %289 : vector<16x1xf32> to vector<16x64xf32>
    %291 = arith.mulf %281, %290 : vector<16x64xf32>
    %292 = vector.broadcast %177 : vector<1x64xf32> to vector<16x64xf32>
    %293 = arith.mulf %291, %292 : vector<16x64xf32>
    %294 = vector.broadcast %178 : vector<1x64xf32> to vector<16x64xf32>
    %295 = arith.addf %293, %294 : vector<16x64xf32>
    %296 = arith.truncf %295 : vector<16x64xf32> to vector<16x64xbf16>
    %297 = vector.extract_strided_slice %5 {offsets = [1, 0, 0], sizes = [1, 64, 128], strides = [1, 1, 1]} : vector<4x64x128xbf16> to vector<1x64x128xbf16>
    %298 = vector.shape_cast %297 : vector<1x64x128xbf16> to vector<64x128xbf16>
    %cst_84 = arith.constant dense<0.000000e+00> : vector<16x128xf32>
    %299 = tpu.matmul %296, %298, %cst_84 {dimension_numbers = #tpu.dot_dimension_numbers<[1], [0], [0], [1], [0, 0, 1, 1], [], []>} : vector<16x64xbf16>, vector<64x128xbf16>, vector<16x128xf32> -> vector<16x128xf32>
    %300 = vector.extract_strided_slice %8 {offsets = [1, 0, 0], sizes = [1, 1, 128], strides = [1, 1, 1]} : vector<4x1x128xf32> to vector<1x1x128xf32>
    %301 = vector.shape_cast %300 : vector<1x1x128xf32> to vector<1x128xf32>
    %302 = vector.broadcast %301 : vector<1x128xf32> to vector<16x128xf32>
    %303 = arith.addf %299, %302 : vector<16x128xf32>
    %cst_85 = arith.constant 0.000000e+00 : f32
    %304 = vector.broadcast %cst_85 : f32 to vector<16x128xf32>
    %305 = arith.maximumf %303, %304 : vector<16x128xf32>
    %306 = arith.truncf %305 : vector<16x128xf32> to vector<16x128xbf16>
    %307 = vector.extract_strided_slice %6 {offsets = [1, 0, 0], sizes = [1, 128, 64], strides = [1, 1, 1]} : vector<4x128x64xbf16> to vector<1x128x64xbf16>
    %308 = vector.shape_cast %307 : vector<1x128x64xbf16> to vector<128x64xbf16>
    %cst_86 = arith.constant dense<0.000000e+00> : vector<16x64xf32>
    %309 = tpu.matmul %306, %308, %cst_86 {dimension_numbers = #tpu.dot_dimension_numbers<[1], [0], [0], [1], [0, 0, 1, 1], [], []>} : vector<16x128xbf16>, vector<128x64xbf16>, vector<16x64xf32> -> vector<16x64xf32>
    %310 = vector.broadcast %179 : vector<1x64xf32> to vector<16x64xf32>
    %311 = arith.addf %309, %310 : vector<16x64xf32>
    %312 = arith.addf %295, %311 : vector<16x64xf32>
    %cst_87 = arith.constant dense<0.000000e+00> : vector<16xf32>
    %313 = vector.multi_reduction <add>, %312, %cst_87 [1] : vector<16x64xf32> to vector<16xf32>
    %314 = vector.shape_cast %313 : vector<16xf32> to vector<16x1xf32>
    %cst_88 = arith.constant 6.400000e+01 : f32
    %315 = vector.broadcast %cst_88 : f32 to vector<16x1xf32>
    %316 = arith.divf %314, %315 : vector<16x1xf32>
    %317 = vector.broadcast %316 : vector<16x1xf32> to vector<16x64xf32>
    %318 = arith.subf %312, %317 : vector<16x64xf32>
    %319 = arith.mulf %318, %318 : vector<16x64xf32>
    %cst_89 = arith.constant dense<0.000000e+00> : vector<16xf32>
    %320 = vector.multi_reduction <add>, %319, %cst_89 [1] : vector<16x64xf32> to vector<16xf32>
    %321 = vector.shape_cast %320 : vector<16xf32> to vector<16x1xf32>
    %cst_90 = arith.constant 6.400000e+01 : f32
    %322 = vector.broadcast %cst_90 : f32 to vector<16x1xf32>
    %323 = arith.divf %321, %322 : vector<16x1xf32>
    %cst_91 = arith.constant 9.99999974E-6 : f32
    %324 = vector.broadcast %cst_91 : f32 to vector<16x1xf32>
    %325 = arith.addf %323, %324 : vector<16x1xf32>
    %326 = math.rsqrt %325 : vector<16x1xf32>
    %327 = vector.broadcast %326 : vector<16x1xf32> to vector<16x64xf32>
    %328 = arith.mulf %318, %327 : vector<16x64xf32>
    %329 = vector.broadcast %180 : vector<1x64xf32> to vector<16x64xf32>
    %330 = arith.mulf %328, %329 : vector<16x64xf32>
    %331 = vector.broadcast %181 : vector<1x64xf32> to vector<16x64xf32>
    %332 = arith.addf %330, %331 : vector<16x64xf32>
    %333 = vector.extract_strided_slice %9 {offsets = [2, 0, 0], sizes = [1, 8, 64], strides = [1, 1, 1]} : vector<4x8x64xf32> to vector<1x8x64xf32>
    %334 = vector.shape_cast %333 : vector<1x8x64xf32> to vector<8x64xf32>
    %335 = vector.extract_strided_slice %334 {offsets = [0, 0], sizes = [1, 64], strides = [1, 1]} : vector<8x64xf32> to vector<1x64xf32>
    %336 = vector.extract_strided_slice %334 {offsets = [1, 0], sizes = [1, 64], strides = [1, 1]} : vector<8x64xf32> to vector<1x64xf32>
    %337 = vector.extract_strided_slice %334 {offsets = [2, 0], sizes = [1, 64], strides = [1, 1]} : vector<8x64xf32> to vector<1x64xf32>
    %338 = vector.extract_strided_slice %334 {offsets = [3, 0], sizes = [1, 64], strides = [1, 1]} : vector<8x64xf32> to vector<1x64xf32>
    %339 = vector.extract_strided_slice %334 {offsets = [4, 0], sizes = [1, 64], strides = [1, 1]} : vector<8x64xf32> to vector<1x64xf32>
    %340 = vector.extract_strided_slice %334 {offsets = [5, 0], sizes = [1, 64], strides = [1, 1]} : vector<8x64xf32> to vector<1x64xf32>
    %341 = arith.truncf %332 : vector<16x64xf32> to vector<16x64xbf16>
    %342 = vector.extract_strided_slice %3 {offsets = [2, 0, 0], sizes = [1, 64, 192], strides = [1, 1, 1]} : vector<4x64x192xbf16> to vector<1x64x192xbf16>
    %343 = vector.shape_cast %342 : vector<1x64x192xbf16> to vector<64x192xbf16>
    %cst_92 = arith.constant dense<0.000000e+00> : vector<16x192xf32>
    %344 = tpu.matmul %341, %343, %cst_92 {dimension_numbers = #tpu.dot_dimension_numbers<[1], [0], [0], [1], [0, 0, 1, 1], [], []>} : vector<16x64xbf16>, vector<64x192xbf16>, vector<16x192xf32> -> vector<16x192xf32>
    %345 = vector.extract_strided_slice %7 {offsets = [2, 0, 0], sizes = [1, 1, 192], strides = [1, 1, 1]} : vector<4x1x192xf32> to vector<1x1x192xf32>
    %346 = vector.shape_cast %345 : vector<1x1x192xf32> to vector<1x192xf32>
    %347 = vector.broadcast %346 : vector<1x192xf32> to vector<16x192xf32>
    %348 = arith.addf %344, %347 : vector<16x192xf32>
    %349 = vector.shape_cast %348 : vector<16x192xf32> to vector<2x8x192xf32>
    %350 = vector.extract_strided_slice %349 {offsets = [0, 0, 0], sizes = [2, 8, 16], strides = [1, 1, 1]} : vector<2x8x192xf32> to vector<2x8x16xf32>
    %351 = arith.truncf %350 : vector<2x8x16xf32> to vector<2x8x16xbf16>
    %352 = vector.extract_strided_slice %349 {offsets = [0, 0, 64], sizes = [2, 8, 16], strides = [1, 1, 1]} : vector<2x8x192xf32> to vector<2x8x16xf32>
    %353 = arith.truncf %352 : vector<2x8x16xf32> to vector<2x8x16xbf16>
    %354 = vector.extract_strided_slice %349 {offsets = [0, 0, 128], sizes = [2, 8, 16], strides = [1, 1, 1]} : vector<2x8x192xf32> to vector<2x8x16xf32>
    %355 = arith.truncf %354 : vector<2x8x16xf32> to vector<2x8x16xbf16>
    "tpu.trace_start"() <{level = 10 : i32, message = "bqd,bkd->bqk"}> : () -> ()
    %cst_93 = arith.constant dense<0.000000e+00> : vector<2x8x8xf32>
    %356 = tpu.matmul %351, %353, %cst_93 {dimension_numbers = #tpu.dot_dimension_numbers<[2], [2], [1], [1], [0, 0, 0, 1, 1, 1], [0], [0]>} : vector<2x8x16xbf16>, vector<2x8x16xbf16>, vector<2x8x8xf32> -> vector<2x8x8xf32>
    "tpu.trace_stop"() : () -> ()
    %cst_94 = arith.constant dense<0xFF800000> : vector<2x8xf32>
    %357 = vector.multi_reduction <maximumf>, %356, %cst_94 [2] : vector<2x8x8xf32> to vector<2x8xf32>
    %358 = vector.shape_cast %357 : vector<2x8xf32> to vector<2x8x1xf32>
    %359 = vector.broadcast %358 : vector<2x8x1xf32> to vector<2x8x8xf32>
    %360 = arith.subf %356, %359 : vector<2x8x8xf32>
    %361 = math.exp %360 : vector<2x8x8xf32>
    %cst_95 = arith.constant dense<0.000000e+00> : vector<2x8xf32>
    %362 = vector.multi_reduction <add>, %361, %cst_95 [2] : vector<2x8x8xf32> to vector<2x8xf32>
    %363 = vector.shape_cast %362 : vector<2x8xf32> to vector<2x8x1xf32>
    %364 = tpu.reciprocal %363 {approx = true} : vector<2x8x1xf32> -> vector<2x8x1xf32>
    %365 = vector.broadcast %364 : vector<2x8x1xf32> to vector<2x8x8xf32>
    %366 = arith.mulf %361, %365 : vector<2x8x8xf32>
    %367 = arith.truncf %366 : vector<2x8x8xf32> to vector<2x8x8xbf16>
    "tpu.trace_start"() <{level = 10 : i32, message = "bqk,bkd->bqd"}> : () -> ()
    %cst_96 = arith.constant dense<0.000000e+00> : vector<2x8x16xf32>
    %368 = tpu.matmul %367, %355, %cst_96 {dimension_numbers = #tpu.dot_dimension_numbers<[2], [1], [1], [2], [0, 0, 0, 1, 1, 2], [0], [0]>} : vector<2x8x8xbf16>, vector<2x8x16xbf16>, vector<2x8x16xf32> -> vector<2x8x16xf32>
    "tpu.trace_stop"() : () -> ()
    %369 = vector.extract_strided_slice %349 {offsets = [0, 0, 16], sizes = [2, 8, 16], strides = [1, 1, 1]} : vector<2x8x192xf32> to vector<2x8x16xf32>
    %370 = arith.truncf %369 : vector<2x8x16xf32> to vector<2x8x16xbf16>
    %371 = vector.extract_strided_slice %349 {offsets = [0, 0, 80], sizes = [2, 8, 16], strides = [1, 1, 1]} : vector<2x8x192xf32> to vector<2x8x16xf32>
    %372 = arith.truncf %371 : vector<2x8x16xf32> to vector<2x8x16xbf16>
    %373 = vector.extract_strided_slice %349 {offsets = [0, 0, 144], sizes = [2, 8, 16], strides = [1, 1, 1]} : vector<2x8x192xf32> to vector<2x8x16xf32>
    %374 = arith.truncf %373 : vector<2x8x16xf32> to vector<2x8x16xbf16>
    "tpu.trace_start"() <{level = 10 : i32, message = "bqd,bkd->bqk"}> : () -> ()
    %cst_97 = arith.constant dense<0.000000e+00> : vector<2x8x8xf32>
    %375 = tpu.matmul %370, %372, %cst_97 {dimension_numbers = #tpu.dot_dimension_numbers<[2], [2], [1], [1], [0, 0, 0, 1, 1, 1], [0], [0]>} : vector<2x8x16xbf16>, vector<2x8x16xbf16>, vector<2x8x8xf32> -> vector<2x8x8xf32>
    "tpu.trace_stop"() : () -> ()
    %cst_98 = arith.constant dense<0xFF800000> : vector<2x8xf32>
    %376 = vector.multi_reduction <maximumf>, %375, %cst_98 [2] : vector<2x8x8xf32> to vector<2x8xf32>
    %377 = vector.shape_cast %376 : vector<2x8xf32> to vector<2x8x1xf32>
    %378 = vector.broadcast %377 : vector<2x8x1xf32> to vector<2x8x8xf32>
    %379 = arith.subf %375, %378 : vector<2x8x8xf32>
    %380 = math.exp %379 : vector<2x8x8xf32>
    %cst_99 = arith.constant dense<0.000000e+00> : vector<2x8xf32>
    %381 = vector.multi_reduction <add>, %380, %cst_99 [2] : vector<2x8x8xf32> to vector<2x8xf32>
    %382 = vector.shape_cast %381 : vector<2x8xf32> to vector<2x8x1xf32>
    %383 = tpu.reciprocal %382 {approx = true} : vector<2x8x1xf32> -> vector<2x8x1xf32>
    %384 = vector.broadcast %383 : vector<2x8x1xf32> to vector<2x8x8xf32>
    %385 = arith.mulf %380, %384 : vector<2x8x8xf32>
    %386 = arith.truncf %385 : vector<2x8x8xf32> to vector<2x8x8xbf16>
    "tpu.trace_start"() <{level = 10 : i32, message = "bqk,bkd->bqd"}> : () -> ()
    %cst_100 = arith.constant dense<0.000000e+00> : vector<2x8x16xf32>
    %387 = tpu.matmul %386, %374, %cst_100 {dimension_numbers = #tpu.dot_dimension_numbers<[2], [1], [1], [2], [0, 0, 0, 1, 1, 2], [0], [0]>} : vector<2x8x8xbf16>, vector<2x8x16xbf16>, vector<2x8x16xf32> -> vector<2x8x16xf32>
    "tpu.trace_stop"() : () -> ()
    %388 = vector.extract_strided_slice %349 {offsets = [0, 0, 32], sizes = [2, 8, 16], strides = [1, 1, 1]} : vector<2x8x192xf32> to vector<2x8x16xf32>
    %389 = arith.truncf %388 : vector<2x8x16xf32> to vector<2x8x16xbf16>
    %390 = vector.extract_strided_slice %349 {offsets = [0, 0, 96], sizes = [2, 8, 16], strides = [1, 1, 1]} : vector<2x8x192xf32> to vector<2x8x16xf32>
    %391 = arith.truncf %390 : vector<2x8x16xf32> to vector<2x8x16xbf16>
    %392 = vector.extract_strided_slice %349 {offsets = [0, 0, 160], sizes = [2, 8, 16], strides = [1, 1, 1]} : vector<2x8x192xf32> to vector<2x8x16xf32>
    %393 = arith.truncf %392 : vector<2x8x16xf32> to vector<2x8x16xbf16>
    "tpu.trace_start"() <{level = 10 : i32, message = "bqd,bkd->bqk"}> : () -> ()
    %cst_101 = arith.constant dense<0.000000e+00> : vector<2x8x8xf32>
    %394 = tpu.matmul %389, %391, %cst_101 {dimension_numbers = #tpu.dot_dimension_numbers<[2], [2], [1], [1], [0, 0, 0, 1, 1, 1], [0], [0]>} : vector<2x8x16xbf16>, vector<2x8x16xbf16>, vector<2x8x8xf32> -> vector<2x8x8xf32>
    "tpu.trace_stop"() : () -> ()
    %cst_102 = arith.constant dense<0xFF800000> : vector<2x8xf32>
    %395 = vector.multi_reduction <maximumf>, %394, %cst_102 [2] : vector<2x8x8xf32> to vector<2x8xf32>
    %396 = vector.shape_cast %395 : vector<2x8xf32> to vector<2x8x1xf32>
    %397 = vector.broadcast %396 : vector<2x8x1xf32> to vector<2x8x8xf32>
    %398 = arith.subf %394, %397 : vector<2x8x8xf32>
    %399 = math.exp %398 : vector<2x8x8xf32>
    %cst_103 = arith.constant dense<0.000000e+00> : vector<2x8xf32>
    %400 = vector.multi_reduction <add>, %399, %cst_103 [2] : vector<2x8x8xf32> to vector<2x8xf32>
    %401 = vector.shape_cast %400 : vector<2x8xf32> to vector<2x8x1xf32>
    %402 = tpu.reciprocal %401 {approx = true} : vector<2x8x1xf32> -> vector<2x8x1xf32>
    %403 = vector.broadcast %402 : vector<2x8x1xf32> to vector<2x8x8xf32>
    %404 = arith.mulf %399, %403 : vector<2x8x8xf32>
    %405 = arith.truncf %404 : vector<2x8x8xf32> to vector<2x8x8xbf16>
    "tpu.trace_start"() <{level = 10 : i32, message = "bqk,bkd->bqd"}> : () -> ()
    %cst_104 = arith.constant dense<0.000000e+00> : vector<2x8x16xf32>
    %406 = tpu.matmul %405, %393, %cst_104 {dimension_numbers = #tpu.dot_dimension_numbers<[2], [1], [1], [2], [0, 0, 0, 1, 1, 2], [0], [0]>} : vector<2x8x8xbf16>, vector<2x8x16xbf16>, vector<2x8x16xf32> -> vector<2x8x16xf32>
    "tpu.trace_stop"() : () -> ()
    %407 = vector.extract_strided_slice %349 {offsets = [0, 0, 48], sizes = [2, 8, 16], strides = [1, 1, 1]} : vector<2x8x192xf32> to vector<2x8x16xf32>
    %408 = arith.truncf %407 : vector<2x8x16xf32> to vector<2x8x16xbf16>
    %409 = vector.extract_strided_slice %349 {offsets = [0, 0, 112], sizes = [2, 8, 16], strides = [1, 1, 1]} : vector<2x8x192xf32> to vector<2x8x16xf32>
    %410 = arith.truncf %409 : vector<2x8x16xf32> to vector<2x8x16xbf16>
    %411 = vector.extract_strided_slice %349 {offsets = [0, 0, 176], sizes = [2, 8, 16], strides = [1, 1, 1]} : vector<2x8x192xf32> to vector<2x8x16xf32>
    %412 = arith.truncf %411 : vector<2x8x16xf32> to vector<2x8x16xbf16>
    "tpu.trace_start"() <{level = 10 : i32, message = "bqd,bkd->bqk"}> : () -> ()
    %cst_105 = arith.constant dense<0.000000e+00> : vector<2x8x8xf32>
    %413 = tpu.matmul %408, %410, %cst_105 {dimension_numbers = #tpu.dot_dimension_numbers<[2], [2], [1], [1], [0, 0, 0, 1, 1, 1], [0], [0]>} : vector<2x8x16xbf16>, vector<2x8x16xbf16>, vector<2x8x8xf32> -> vector<2x8x8xf32>
    "tpu.trace_stop"() : () -> ()
    %cst_106 = arith.constant dense<0xFF800000> : vector<2x8xf32>
    %414 = vector.multi_reduction <maximumf>, %413, %cst_106 [2] : vector<2x8x8xf32> to vector<2x8xf32>
    %415 = vector.shape_cast %414 : vector<2x8xf32> to vector<2x8x1xf32>
    %416 = vector.broadcast %415 : vector<2x8x1xf32> to vector<2x8x8xf32>
    %417 = arith.subf %413, %416 : vector<2x8x8xf32>
    %418 = math.exp %417 : vector<2x8x8xf32>
    %cst_107 = arith.constant dense<0.000000e+00> : vector<2x8xf32>
    %419 = vector.multi_reduction <add>, %418, %cst_107 [2] : vector<2x8x8xf32> to vector<2x8xf32>
    %420 = vector.shape_cast %419 : vector<2x8xf32> to vector<2x8x1xf32>
    %421 = tpu.reciprocal %420 {approx = true} : vector<2x8x1xf32> -> vector<2x8x1xf32>
    %422 = vector.broadcast %421 : vector<2x8x1xf32> to vector<2x8x8xf32>
    %423 = arith.mulf %418, %422 : vector<2x8x8xf32>
    %424 = arith.truncf %423 : vector<2x8x8xf32> to vector<2x8x8xbf16>
    "tpu.trace_start"() <{level = 10 : i32, message = "bqk,bkd->bqd"}> : () -> ()
    %cst_108 = arith.constant dense<0.000000e+00> : vector<2x8x16xf32>
    %425 = tpu.matmul %424, %412, %cst_108 {dimension_numbers = #tpu.dot_dimension_numbers<[2], [1], [1], [2], [0, 0, 0, 1, 1, 2], [0], [0]>} : vector<2x8x8xbf16>, vector<2x8x16xbf16>, vector<2x8x16xf32> -> vector<2x8x16xf32>
    "tpu.trace_stop"() : () -> ()
    %426 = tpu.concatenate %368, %387, %406, %425 in 2 : vector<2x8x16xf32>, vector<2x8x16xf32>, vector<2x8x16xf32>, vector<2x8x16xf32> -> vector<2x8x64xf32>
    %427 = vector.shape_cast %426 : vector<2x8x64xf32> to vector<16x64xf32>
    %428 = arith.truncf %427 : vector<16x64xf32> to vector<16x64xbf16>
    %429 = vector.extract_strided_slice %4 {offsets = [2, 0, 0], sizes = [1, 64, 64], strides = [1, 1, 1]} : vector<4x64x64xbf16> to vector<1x64x64xbf16>
    %430 = vector.shape_cast %429 : vector<1x64x64xbf16> to vector<64x64xbf16>
    %cst_109 = arith.constant dense<0.000000e+00> : vector<16x64xf32>
    %431 = tpu.matmul %428, %430, %cst_109 {dimension_numbers = #tpu.dot_dimension_numbers<[1], [0], [0], [1], [0, 0, 1, 1], [], []>} : vector<16x64xbf16>, vector<64x64xbf16>, vector<16x64xf32> -> vector<16x64xf32>
    %432 = vector.broadcast %335 : vector<1x64xf32> to vector<16x64xf32>
    %433 = arith.addf %431, %432 : vector<16x64xf32>
    %434 = arith.addf %332, %433 : vector<16x64xf32>
    %cst_110 = arith.constant dense<0.000000e+00> : vector<16xf32>
    %435 = vector.multi_reduction <add>, %434, %cst_110 [1] : vector<16x64xf32> to vector<16xf32>
    %436 = vector.shape_cast %435 : vector<16xf32> to vector<16x1xf32>
    %cst_111 = arith.constant 6.400000e+01 : f32
    %437 = vector.broadcast %cst_111 : f32 to vector<16x1xf32>
    %438 = arith.divf %436, %437 : vector<16x1xf32>
    %439 = vector.broadcast %438 : vector<16x1xf32> to vector<16x64xf32>
    %440 = arith.subf %434, %439 : vector<16x64xf32>
    %441 = arith.mulf %440, %440 : vector<16x64xf32>
    %cst_112 = arith.constant dense<0.000000e+00> : vector<16xf32>
    %442 = vector.multi_reduction <add>, %441, %cst_112 [1] : vector<16x64xf32> to vector<16xf32>
    %443 = vector.shape_cast %442 : vector<16xf32> to vector<16x1xf32>
    %cst_113 = arith.constant 6.400000e+01 : f32
    %444 = vector.broadcast %cst_113 : f32 to vector<16x1xf32>
    %445 = arith.divf %443, %444 : vector<16x1xf32>
    %cst_114 = arith.constant 9.99999974E-6 : f32
    %446 = vector.broadcast %cst_114 : f32 to vector<16x1xf32>
    %447 = arith.addf %445, %446 : vector<16x1xf32>
    %448 = math.rsqrt %447 : vector<16x1xf32>
    %449 = vector.broadcast %448 : vector<16x1xf32> to vector<16x64xf32>
    %450 = arith.mulf %440, %449 : vector<16x64xf32>
    %451 = vector.broadcast %336 : vector<1x64xf32> to vector<16x64xf32>
    %452 = arith.mulf %450, %451 : vector<16x64xf32>
    %453 = vector.broadcast %337 : vector<1x64xf32> to vector<16x64xf32>
    %454 = arith.addf %452, %453 : vector<16x64xf32>
    %455 = arith.truncf %454 : vector<16x64xf32> to vector<16x64xbf16>
    %456 = vector.extract_strided_slice %5 {offsets = [2, 0, 0], sizes = [1, 64, 128], strides = [1, 1, 1]} : vector<4x64x128xbf16> to vector<1x64x128xbf16>
    %457 = vector.shape_cast %456 : vector<1x64x128xbf16> to vector<64x128xbf16>
    %cst_115 = arith.constant dense<0.000000e+00> : vector<16x128xf32>
    %458 = tpu.matmul %455, %457, %cst_115 {dimension_numbers = #tpu.dot_dimension_numbers<[1], [0], [0], [1], [0, 0, 1, 1], [], []>} : vector<16x64xbf16>, vector<64x128xbf16>, vector<16x128xf32> -> vector<16x128xf32>
    %459 = vector.extract_strided_slice %8 {offsets = [2, 0, 0], sizes = [1, 1, 128], strides = [1, 1, 1]} : vector<4x1x128xf32> to vector<1x1x128xf32>
    %460 = vector.shape_cast %459 : vector<1x1x128xf32> to vector<1x128xf32>
    %461 = vector.broadcast %460 : vector<1x128xf32> to vector<16x128xf32>
    %462 = arith.addf %458, %461 : vector<16x128xf32>
    %cst_116 = arith.constant 0.000000e+00 : f32
    %463 = vector.broadcast %cst_116 : f32 to vector<16x128xf32>
    %464 = arith.maximumf %462, %463 : vector<16x128xf32>
    %465 = arith.truncf %464 : vector<16x128xf32> to vector<16x128xbf16>
    %466 = vector.extract_strided_slice %6 {offsets = [2, 0, 0], sizes = [1, 128, 64], strides = [1, 1, 1]} : vector<4x128x64xbf16> to vector<1x128x64xbf16>
    %467 = vector.shape_cast %466 : vector<1x128x64xbf16> to vector<128x64xbf16>
    %cst_117 = arith.constant dense<0.000000e+00> : vector<16x64xf32>
    %468 = tpu.matmul %465, %467, %cst_117 {dimension_numbers = #tpu.dot_dimension_numbers<[1], [0], [0], [1], [0, 0, 1, 1], [], []>} : vector<16x128xbf16>, vector<128x64xbf16>, vector<16x64xf32> -> vector<16x64xf32>
    %469 = vector.broadcast %338 : vector<1x64xf32> to vector<16x64xf32>
    %470 = arith.addf %468, %469 : vector<16x64xf32>
    %471 = arith.addf %454, %470 : vector<16x64xf32>
    %cst_118 = arith.constant dense<0.000000e+00> : vector<16xf32>
    %472 = vector.multi_reduction <add>, %471, %cst_118 [1] : vector<16x64xf32> to vector<16xf32>
    %473 = vector.shape_cast %472 : vector<16xf32> to vector<16x1xf32>
    %cst_119 = arith.constant 6.400000e+01 : f32
    %474 = vector.broadcast %cst_119 : f32 to vector<16x1xf32>
    %475 = arith.divf %473, %474 : vector<16x1xf32>
    %476 = vector.broadcast %475 : vector<16x1xf32> to vector<16x64xf32>
    %477 = arith.subf %471, %476 : vector<16x64xf32>
    %478 = arith.mulf %477, %477 : vector<16x64xf32>
    %cst_120 = arith.constant dense<0.000000e+00> : vector<16xf32>
    %479 = vector.multi_reduction <add>, %478, %cst_120 [1] : vector<16x64xf32> to vector<16xf32>
    %480 = vector.shape_cast %479 : vector<16xf32> to vector<16x1xf32>
    %cst_121 = arith.constant 6.400000e+01 : f32
    %481 = vector.broadcast %cst_121 : f32 to vector<16x1xf32>
    %482 = arith.divf %480, %481 : vector<16x1xf32>
    %cst_122 = arith.constant 9.99999974E-6 : f32
    %483 = vector.broadcast %cst_122 : f32 to vector<16x1xf32>
    %484 = arith.addf %482, %483 : vector<16x1xf32>
    %485 = math.rsqrt %484 : vector<16x1xf32>
    %486 = vector.broadcast %485 : vector<16x1xf32> to vector<16x64xf32>
    %487 = arith.mulf %477, %486 : vector<16x64xf32>
    %488 = vector.broadcast %339 : vector<1x64xf32> to vector<16x64xf32>
    %489 = arith.mulf %487, %488 : vector<16x64xf32>
    %490 = vector.broadcast %340 : vector<1x64xf32> to vector<16x64xf32>
    %491 = arith.addf %489, %490 : vector<16x64xf32>
    %492 = vector.extract_strided_slice %9 {offsets = [3, 0, 0], sizes = [1, 8, 64], strides = [1, 1, 1]} : vector<4x8x64xf32> to vector<1x8x64xf32>
    %493 = vector.shape_cast %492 : vector<1x8x64xf32> to vector<8x64xf32>
    %494 = vector.extract_strided_slice %493 {offsets = [0, 0], sizes = [1, 64], strides = [1, 1]} : vector<8x64xf32> to vector<1x64xf32>
    %495 = vector.extract_strided_slice %493 {offsets = [1, 0], sizes = [1, 64], strides = [1, 1]} : vector<8x64xf32> to vector<1x64xf32>
    %496 = vector.extract_strided_slice %493 {offsets = [2, 0], sizes = [1, 64], strides = [1, 1]} : vector<8x64xf32> to vector<1x64xf32>
    %497 = vector.extract_strided_slice %493 {offsets = [3, 0], sizes = [1, 64], strides = [1, 1]} : vector<8x64xf32> to vector<1x64xf32>
    %498 = vector.extract_strided_slice %493 {offsets = [4, 0], sizes = [1, 64], strides = [1, 1]} : vector<8x64xf32> to vector<1x64xf32>
    %499 = vector.extract_strided_slice %493 {offsets = [5, 0], sizes = [1, 64], strides = [1, 1]} : vector<8x64xf32> to vector<1x64xf32>
    %500 = arith.truncf %491 : vector<16x64xf32> to vector<16x64xbf16>
    %501 = vector.extract_strided_slice %3 {offsets = [3, 0, 0], sizes = [1, 64, 192], strides = [1, 1, 1]} : vector<4x64x192xbf16> to vector<1x64x192xbf16>
    %502 = vector.shape_cast %501 : vector<1x64x192xbf16> to vector<64x192xbf16>
    %cst_123 = arith.constant dense<0.000000e+00> : vector<16x192xf32>
    %503 = tpu.matmul %500, %502, %cst_123 {dimension_numbers = #tpu.dot_dimension_numbers<[1], [0], [0], [1], [0, 0, 1, 1], [], []>} : vector<16x64xbf16>, vector<64x192xbf16>, vector<16x192xf32> -> vector<16x192xf32>
    %504 = vector.extract_strided_slice %7 {offsets = [3, 0, 0], sizes = [1, 1, 192], strides = [1, 1, 1]} : vector<4x1x192xf32> to vector<1x1x192xf32>
    %505 = vector.shape_cast %504 : vector<1x1x192xf32> to vector<1x192xf32>
    %506 = vector.broadcast %505 : vector<1x192xf32> to vector<16x192xf32>
    %507 = arith.addf %503, %506 : vector<16x192xf32>
    %508 = vector.shape_cast %507 : vector<16x192xf32> to vector<2x8x192xf32>
    %509 = vector.extract_strided_slice %508 {offsets = [0, 0, 0], sizes = [2, 8, 16], strides = [1, 1, 1]} : vector<2x8x192xf32> to vector<2x8x16xf32>
    %510 = arith.truncf %509 : vector<2x8x16xf32> to vector<2x8x16xbf16>
    %511 = vector.extract_strided_slice %508 {offsets = [0, 0, 64], sizes = [2, 8, 16], strides = [1, 1, 1]} : vector<2x8x192xf32> to vector<2x8x16xf32>
    %512 = arith.truncf %511 : vector<2x8x16xf32> to vector<2x8x16xbf16>
    %513 = vector.extract_strided_slice %508 {offsets = [0, 0, 128], sizes = [2, 8, 16], strides = [1, 1, 1]} : vector<2x8x192xf32> to vector<2x8x16xf32>
    %514 = arith.truncf %513 : vector<2x8x16xf32> to vector<2x8x16xbf16>
    "tpu.trace_start"() <{level = 10 : i32, message = "bqd,bkd->bqk"}> : () -> ()
    %cst_124 = arith.constant dense<0.000000e+00> : vector<2x8x8xf32>
    %515 = tpu.matmul %510, %512, %cst_124 {dimension_numbers = #tpu.dot_dimension_numbers<[2], [2], [1], [1], [0, 0, 0, 1, 1, 1], [0], [0]>} : vector<2x8x16xbf16>, vector<2x8x16xbf16>, vector<2x8x8xf32> -> vector<2x8x8xf32>
    "tpu.trace_stop"() : () -> ()
    %cst_125 = arith.constant dense<0xFF800000> : vector<2x8xf32>
    %516 = vector.multi_reduction <maximumf>, %515, %cst_125 [2] : vector<2x8x8xf32> to vector<2x8xf32>
    %517 = vector.shape_cast %516 : vector<2x8xf32> to vector<2x8x1xf32>
    %518 = vector.broadcast %517 : vector<2x8x1xf32> to vector<2x8x8xf32>
    %519 = arith.subf %515, %518 : vector<2x8x8xf32>
    %520 = math.exp %519 : vector<2x8x8xf32>
    %cst_126 = arith.constant dense<0.000000e+00> : vector<2x8xf32>
    %521 = vector.multi_reduction <add>, %520, %cst_126 [2] : vector<2x8x8xf32> to vector<2x8xf32>
    %522 = vector.shape_cast %521 : vector<2x8xf32> to vector<2x8x1xf32>
    %523 = tpu.reciprocal %522 {approx = true} : vector<2x8x1xf32> -> vector<2x8x1xf32>
    %524 = vector.broadcast %523 : vector<2x8x1xf32> to vector<2x8x8xf32>
    %525 = arith.mulf %520, %524 : vector<2x8x8xf32>
    %526 = arith.truncf %525 : vector<2x8x8xf32> to vector<2x8x8xbf16>
    "tpu.trace_start"() <{level = 10 : i32, message = "bqk,bkd->bqd"}> : () -> ()
    %cst_127 = arith.constant dense<0.000000e+00> : vector<2x8x16xf32>
    %527 = tpu.matmul %526, %514, %cst_127 {dimension_numbers = #tpu.dot_dimension_numbers<[2], [1], [1], [2], [0, 0, 0, 1, 1, 2], [0], [0]>} : vector<2x8x8xbf16>, vector<2x8x16xbf16>, vector<2x8x16xf32> -> vector<2x8x16xf32>
    "tpu.trace_stop"() : () -> ()
    %528 = vector.extract_strided_slice %508 {offsets = [0, 0, 16], sizes = [2, 8, 16], strides = [1, 1, 1]} : vector<2x8x192xf32> to vector<2x8x16xf32>
    %529 = arith.truncf %528 : vector<2x8x16xf32> to vector<2x8x16xbf16>
    %530 = vector.extract_strided_slice %508 {offsets = [0, 0, 80], sizes = [2, 8, 16], strides = [1, 1, 1]} : vector<2x8x192xf32> to vector<2x8x16xf32>
    %531 = arith.truncf %530 : vector<2x8x16xf32> to vector<2x8x16xbf16>
    %532 = vector.extract_strided_slice %508 {offsets = [0, 0, 144], sizes = [2, 8, 16], strides = [1, 1, 1]} : vector<2x8x192xf32> to vector<2x8x16xf32>
    %533 = arith.truncf %532 : vector<2x8x16xf32> to vector<2x8x16xbf16>
    "tpu.trace_start"() <{level = 10 : i32, message = "bqd,bkd->bqk"}> : () -> ()
    %cst_128 = arith.constant dense<0.000000e+00> : vector<2x8x8xf32>
    %534 = tpu.matmul %529, %531, %cst_128 {dimension_numbers = #tpu.dot_dimension_numbers<[2], [2], [1], [1], [0, 0, 0, 1, 1, 1], [0], [0]>} : vector<2x8x16xbf16>, vector<2x8x16xbf16>, vector<2x8x8xf32> -> vector<2x8x8xf32>
    "tpu.trace_stop"() : () -> ()
    %cst_129 = arith.constant dense<0xFF800000> : vector<2x8xf32>
    %535 = vector.multi_reduction <maximumf>, %534, %cst_129 [2] : vector<2x8x8xf32> to vector<2x8xf32>
    %536 = vector.shape_cast %535 : vector<2x8xf32> to vector<2x8x1xf32>
    %537 = vector.broadcast %536 : vector<2x8x1xf32> to vector<2x8x8xf32>
    %538 = arith.subf %534, %537 : vector<2x8x8xf32>
    %539 = math.exp %538 : vector<2x8x8xf32>
    %cst_130 = arith.constant dense<0.000000e+00> : vector<2x8xf32>
    %540 = vector.multi_reduction <add>, %539, %cst_130 [2] : vector<2x8x8xf32> to vector<2x8xf32>
    %541 = vector.shape_cast %540 : vector<2x8xf32> to vector<2x8x1xf32>
    %542 = tpu.reciprocal %541 {approx = true} : vector<2x8x1xf32> -> vector<2x8x1xf32>
    %543 = vector.broadcast %542 : vector<2x8x1xf32> to vector<2x8x8xf32>
    %544 = arith.mulf %539, %543 : vector<2x8x8xf32>
    %545 = arith.truncf %544 : vector<2x8x8xf32> to vector<2x8x8xbf16>
    "tpu.trace_start"() <{level = 10 : i32, message = "bqk,bkd->bqd"}> : () -> ()
    %cst_131 = arith.constant dense<0.000000e+00> : vector<2x8x16xf32>
    %546 = tpu.matmul %545, %533, %cst_131 {dimension_numbers = #tpu.dot_dimension_numbers<[2], [1], [1], [2], [0, 0, 0, 1, 1, 2], [0], [0]>} : vector<2x8x8xbf16>, vector<2x8x16xbf16>, vector<2x8x16xf32> -> vector<2x8x16xf32>
    "tpu.trace_stop"() : () -> ()
    %547 = vector.extract_strided_slice %508 {offsets = [0, 0, 32], sizes = [2, 8, 16], strides = [1, 1, 1]} : vector<2x8x192xf32> to vector<2x8x16xf32>
    %548 = arith.truncf %547 : vector<2x8x16xf32> to vector<2x8x16xbf16>
    %549 = vector.extract_strided_slice %508 {offsets = [0, 0, 96], sizes = [2, 8, 16], strides = [1, 1, 1]} : vector<2x8x192xf32> to vector<2x8x16xf32>
    %550 = arith.truncf %549 : vector<2x8x16xf32> to vector<2x8x16xbf16>
    %551 = vector.extract_strided_slice %508 {offsets = [0, 0, 160], sizes = [2, 8, 16], strides = [1, 1, 1]} : vector<2x8x192xf32> to vector<2x8x16xf32>
    %552 = arith.truncf %551 : vector<2x8x16xf32> to vector<2x8x16xbf16>
    "tpu.trace_start"() <{level = 10 : i32, message = "bqd,bkd->bqk"}> : () -> ()
    %cst_132 = arith.constant dense<0.000000e+00> : vector<2x8x8xf32>
    %553 = tpu.matmul %548, %550, %cst_132 {dimension_numbers = #tpu.dot_dimension_numbers<[2], [2], [1], [1], [0, 0, 0, 1, 1, 1], [0], [0]>} : vector<2x8x16xbf16>, vector<2x8x16xbf16>, vector<2x8x8xf32> -> vector<2x8x8xf32>
    "tpu.trace_stop"() : () -> ()
    %cst_133 = arith.constant dense<0xFF800000> : vector<2x8xf32>
    %554 = vector.multi_reduction <maximumf>, %553, %cst_133 [2] : vector<2x8x8xf32> to vector<2x8xf32>
    %555 = vector.shape_cast %554 : vector<2x8xf32> to vector<2x8x1xf32>
    %556 = vector.broadcast %555 : vector<2x8x1xf32> to vector<2x8x8xf32>
    %557 = arith.subf %553, %556 : vector<2x8x8xf32>
    %558 = math.exp %557 : vector<2x8x8xf32>
    %cst_134 = arith.constant dense<0.000000e+00> : vector<2x8xf32>
    %559 = vector.multi_reduction <add>, %558, %cst_134 [2] : vector<2x8x8xf32> to vector<2x8xf32>
    %560 = vector.shape_cast %559 : vector<2x8xf32> to vector<2x8x1xf32>
    %561 = tpu.reciprocal %560 {approx = true} : vector<2x8x1xf32> -> vector<2x8x1xf32>
    %562 = vector.broadcast %561 : vector<2x8x1xf32> to vector<2x8x8xf32>
    %563 = arith.mulf %558, %562 : vector<2x8x8xf32>
    %564 = arith.truncf %563 : vector<2x8x8xf32> to vector<2x8x8xbf16>
    "tpu.trace_start"() <{level = 10 : i32, message = "bqk,bkd->bqd"}> : () -> ()
    %cst_135 = arith.constant dense<0.000000e+00> : vector<2x8x16xf32>
    %565 = tpu.matmul %564, %552, %cst_135 {dimension_numbers = #tpu.dot_dimension_numbers<[2], [1], [1], [2], [0, 0, 0, 1, 1, 2], [0], [0]>} : vector<2x8x8xbf16>, vector<2x8x16xbf16>, vector<2x8x16xf32> -> vector<2x8x16xf32>
    "tpu.trace_stop"() : () -> ()
    %566 = vector.extract_strided_slice %508 {offsets = [0, 0, 48], sizes = [2, 8, 16], strides = [1, 1, 1]} : vector<2x8x192xf32> to vector<2x8x16xf32>
    %567 = arith.truncf %566 : vector<2x8x16xf32> to vector<2x8x16xbf16>
    %568 = vector.extract_strided_slice %508 {offsets = [0, 0, 112], sizes = [2, 8, 16], strides = [1, 1, 1]} : vector<2x8x192xf32> to vector<2x8x16xf32>
    %569 = arith.truncf %568 : vector<2x8x16xf32> to vector<2x8x16xbf16>
    %570 = vector.extract_strided_slice %508 {offsets = [0, 0, 176], sizes = [2, 8, 16], strides = [1, 1, 1]} : vector<2x8x192xf32> to vector<2x8x16xf32>
    %571 = arith.truncf %570 : vector<2x8x16xf32> to vector<2x8x16xbf16>
    "tpu.trace_start"() <{level = 10 : i32, message = "bqd,bkd->bqk"}> : () -> ()
    %cst_136 = arith.constant dense<0.000000e+00> : vector<2x8x8xf32>
    %572 = tpu.matmul %567, %569, %cst_136 {dimension_numbers = #tpu.dot_dimension_numbers<[2], [2], [1], [1], [0, 0, 0, 1, 1, 1], [0], [0]>} : vector<2x8x16xbf16>, vector<2x8x16xbf16>, vector<2x8x8xf32> -> vector<2x8x8xf32>
    "tpu.trace_stop"() : () -> ()
    %cst_137 = arith.constant dense<0xFF800000> : vector<2x8xf32>
    %573 = vector.multi_reduction <maximumf>, %572, %cst_137 [2] : vector<2x8x8xf32> to vector<2x8xf32>
    %574 = vector.shape_cast %573 : vector<2x8xf32> to vector<2x8x1xf32>
    %575 = vector.broadcast %574 : vector<2x8x1xf32> to vector<2x8x8xf32>
    %576 = arith.subf %572, %575 : vector<2x8x8xf32>
    %577 = math.exp %576 : vector<2x8x8xf32>
    %cst_138 = arith.constant dense<0.000000e+00> : vector<2x8xf32>
    %578 = vector.multi_reduction <add>, %577, %cst_138 [2] : vector<2x8x8xf32> to vector<2x8xf32>
    %579 = vector.shape_cast %578 : vector<2x8xf32> to vector<2x8x1xf32>
    %580 = tpu.reciprocal %579 {approx = true} : vector<2x8x1xf32> -> vector<2x8x1xf32>
    %581 = vector.broadcast %580 : vector<2x8x1xf32> to vector<2x8x8xf32>
    %582 = arith.mulf %577, %581 : vector<2x8x8xf32>
    %583 = arith.truncf %582 : vector<2x8x8xf32> to vector<2x8x8xbf16>
    "tpu.trace_start"() <{level = 10 : i32, message = "bqk,bkd->bqd"}> : () -> ()
    %cst_139 = arith.constant dense<0.000000e+00> : vector<2x8x16xf32>
    %584 = tpu.matmul %583, %571, %cst_139 {dimension_numbers = #tpu.dot_dimension_numbers<[2], [1], [1], [2], [0, 0, 0, 1, 1, 2], [0], [0]>} : vector<2x8x8xbf16>, vector<2x8x16xbf16>, vector<2x8x16xf32> -> vector<2x8x16xf32>
    "tpu.trace_stop"() : () -> ()
    %585 = tpu.concatenate %527, %546, %565, %584 in 2 : vector<2x8x16xf32>, vector<2x8x16xf32>, vector<2x8x16xf32>, vector<2x8x16xf32> -> vector<2x8x64xf32>
    %586 = vector.shape_cast %585 : vector<2x8x64xf32> to vector<16x64xf32>
    %587 = arith.truncf %586 : vector<16x64xf32> to vector<16x64xbf16>
    %588 = vector.extract_strided_slice %4 {offsets = [3, 0, 0], sizes = [1, 64, 64], strides = [1, 1, 1]} : vector<4x64x64xbf16> to vector<1x64x64xbf16>
    %589 = vector.shape_cast %588 : vector<1x64x64xbf16> to vector<64x64xbf16>
    %cst_140 = arith.constant dense<0.000000e+00> : vector<16x64xf32>
    %590 = tpu.matmul %587, %589, %cst_140 {dimension_numbers = #tpu.dot_dimension_numbers<[1], [0], [0], [1], [0, 0, 1, 1], [], []>} : vector<16x64xbf16>, vector<64x64xbf16>, vector<16x64xf32> -> vector<16x64xf32>
    %591 = vector.broadcast %494 : vector<1x64xf32> to vector<16x64xf32>
    %592 = arith.addf %590, %591 : vector<16x64xf32>
    %593 = arith.addf %491, %592 : vector<16x64xf32>
    %cst_141 = arith.constant dense<0.000000e+00> : vector<16xf32>
    %594 = vector.multi_reduction <add>, %593, %cst_141 [1] : vector<16x64xf32> to vector<16xf32>
    %595 = vector.shape_cast %594 : vector<16xf32> to vector<16x1xf32>
    %cst_142 = arith.constant 6.400000e+01 : f32
    %596 = vector.broadcast %cst_142 : f32 to vector<16x1xf32>
    %597 = arith.divf %595, %596 : vector<16x1xf32>
    %598 = vector.broadcast %597 : vector<16x1xf32> to vector<16x64xf32>
    %599 = arith.subf %593, %598 : vector<16x64xf32>
    %600 = arith.mulf %599, %599 : vector<16x64xf32>
    %cst_143 = arith.constant dense<0.000000e+00> : vector<16xf32>
    %601 = vector.multi_reduction <add>, %600, %cst_143 [1] : vector<16x64xf32> to vector<16xf32>
    %602 = vector.shape_cast %601 : vector<16xf32> to vector<16x1xf32>
    %cst_144 = arith.constant 6.400000e+01 : f32
    %603 = vector.broadcast %cst_144 : f32 to vector<16x1xf32>
    %604 = arith.divf %602, %603 : vector<16x1xf32>
    %cst_145 = arith.constant 9.99999974E-6 : f32
    %605 = vector.broadcast %cst_145 : f32 to vector<16x1xf32>
    %606 = arith.addf %604, %605 : vector<16x1xf32>
    %607 = math.rsqrt %606 : vector<16x1xf32>
    %608 = vector.broadcast %607 : vector<16x1xf32> to vector<16x64xf32>
    %609 = arith.mulf %599, %608 : vector<16x64xf32>
    %610 = vector.broadcast %495 : vector<1x64xf32> to vector<16x64xf32>
    %611 = arith.mulf %609, %610 : vector<16x64xf32>
    %612 = vector.broadcast %496 : vector<1x64xf32> to vector<16x64xf32>
    %613 = arith.addf %611, %612 : vector<16x64xf32>
    %614 = arith.truncf %613 : vector<16x64xf32> to vector<16x64xbf16>
    %615 = vector.extract_strided_slice %5 {offsets = [3, 0, 0], sizes = [1, 64, 128], strides = [1, 1, 1]} : vector<4x64x128xbf16> to vector<1x64x128xbf16>
    %616 = vector.shape_cast %615 : vector<1x64x128xbf16> to vector<64x128xbf16>
    %cst_146 = arith.constant dense<0.000000e+00> : vector<16x128xf32>
    %617 = tpu.matmul %614, %616, %cst_146 {dimension_numbers = #tpu.dot_dimension_numbers<[1], [0], [0], [1], [0, 0, 1, 1], [], []>} : vector<16x64xbf16>, vector<64x128xbf16>, vector<16x128xf32> -> vector<16x128xf32>
    %618 = vector.extract_strided_slice %8 {offsets = [3, 0, 0], sizes = [1, 1, 128], strides = [1, 1, 1]} : vector<4x1x128xf32> to vector<1x1x128xf32>
    %619 = vector.shape_cast %618 : vector<1x1x128xf32> to vector<1x128xf32>
    %620 = vector.broadcast %619 : vector<1x128xf32> to vector<16x128xf32>
    %621 = arith.addf %617, %620 : vector<16x128xf32>
    %cst_147 = arith.constant 0.000000e+00 : f32
    %622 = vector.broadcast %cst_147 : f32 to vector<16x128xf32>
    %623 = arith.maximumf %621, %622 : vector<16x128xf32>
    %624 = arith.truncf %623 : vector<16x128xf32> to vector<16x128xbf16>
    %625 = vector.extract_strided_slice %6 {offsets = [3, 0, 0], sizes = [1, 128, 64], strides = [1, 1, 1]} : vector<4x128x64xbf16> to vector<1x128x64xbf16>
    %626 = vector.shape_cast %625 : vector<1x128x64xbf16> to vector<128x64xbf16>
    %cst_148 = arith.constant dense<0.000000e+00> : vector<16x64xf32>
    %627 = tpu.matmul %624, %626, %cst_148 {dimension_numbers = #tpu.dot_dimension_numbers<[1], [0], [0], [1], [0, 0, 1, 1], [], []>} : vector<16x128xbf16>, vector<128x64xbf16>, vector<16x64xf32> -> vector<16x64xf32>
    %628 = vector.broadcast %497 : vector<1x64xf32> to vector<16x64xf32>
    %629 = arith.addf %627, %628 : vector<16x64xf32>
    %630 = arith.addf %613, %629 : vector<16x64xf32>
    %cst_149 = arith.constant dense<0.000000e+00> : vector<16xf32>
    %631 = vector.multi_reduction <add>, %630, %cst_149 [1] : vector<16x64xf32> to vector<16xf32>
    %632 = vector.shape_cast %631 : vector<16xf32> to vector<16x1xf32>
    %cst_150 = arith.constant 6.400000e+01 : f32
    %633 = vector.broadcast %cst_150 : f32 to vector<16x1xf32>
    %634 = arith.divf %632, %633 : vector<16x1xf32>
    %635 = vector.broadcast %634 : vector<16x1xf32> to vector<16x64xf32>
    %636 = arith.subf %630, %635 : vector<16x64xf32>
    %637 = arith.mulf %636, %636 : vector<16x64xf32>
    %cst_151 = arith.constant dense<0.000000e+00> : vector<16xf32>
    %638 = vector.multi_reduction <add>, %637, %cst_151 [1] : vector<16x64xf32> to vector<16xf32>
    %639 = vector.shape_cast %638 : vector<16xf32> to vector<16x1xf32>
    %cst_152 = arith.constant 6.400000e+01 : f32
    %640 = vector.broadcast %cst_152 : f32 to vector<16x1xf32>
    %641 = arith.divf %639, %640 : vector<16x1xf32>
    %cst_153 = arith.constant 9.99999974E-6 : f32
    %642 = vector.broadcast %cst_153 : f32 to vector<16x1xf32>
    %643 = arith.addf %641, %642 : vector<16x1xf32>
    %644 = math.rsqrt %643 : vector<16x1xf32>
    %645 = vector.broadcast %644 : vector<16x1xf32> to vector<16x64xf32>
    %646 = arith.mulf %636, %645 : vector<16x64xf32>
    %647 = vector.broadcast %498 : vector<1x64xf32> to vector<16x64xf32>
    %648 = arith.mulf %646, %647 : vector<16x64xf32>
    %649 = vector.broadcast %499 : vector<1x64xf32> to vector<16x64xf32>
    %650 = arith.addf %648, %649 : vector<16x64xf32>
    %651 = arith.truncf %650 : vector<16x64xf32> to vector<16x64xbf16>
    %cst_154 = arith.constant dense<0.000000e+00> : vector<16x128xf32>
    %652 = tpu.matmul %651, %10, %cst_154 {dimension_numbers = #tpu.dot_dimension_numbers<[1], [0], [0], [1], [0, 0, 1, 1], [], []>} : vector<16x64xbf16>, vector<64x128xbf16>, vector<16x128xf32> -> vector<16x128xf32>
    %653 = vector.broadcast %11 : vector<1x128xf32> to vector<16x128xf32>
    %654 = arith.addf %652, %653 : vector<16x128xf32>
    %c0_155 = arith.constant 0 : index
    %c0_156 = arith.constant 0 : index
    %655 = vector.load %arg13[%c0_155, %c0_156] : memref<16x128xf32, #tpu.memory_space<vmem>>, vector<16x128xf32>
    tpu.vector_store %arg13[%c0_155, %c0_156], %654 {strides = array<i32>} : memref<16x128xf32, #tpu.memory_space<vmem>>, vector<16x128xf32>,
    return
  }
  func.func @transform_0(%arg0: i32) -> (i32, i32) {
    %c0_i32 = arith.constant 0 : i32
    %c0_i32_0 = arith.constant 0 : i32
    return %arg0, %c0_i32 : i32, i32
  }
  func.func @transform_1(%arg0: i32) -> (i32, i32) {
    %c0_i32 = arith.constant 0 : i32
    %c0_i32_0 = arith.constant 0 : i32
    %c0_i32_1 = arith.constant 0 : i32
    return %c0_i32, %c0_i32_0 : i32, i32
  }
  func.func @transform_2(%arg0: i32) -> (i32, i32) {
    %c0_i32 = arith.constant 0 : i32
    %c0_i32_0 = arith.constant 0 : i32
    %c0_i32_1 = arith.constant 0 : i32
    return %c0_i32, %c0_i32_0 : i32, i32
  }
  func.func @transform_3(%arg0: i32) -> (i32, i32, i32) {
    %c0_i32 = arith.constant 0 : i32
    %c0_i32_0 = arith.constant 0 : i32
    %c0_i32_1 = arith.constant 0 : i32
    %c0_i32_2 = arith.constant 0 : i32
    return %c0_i32, %c0_i32_0, %c0_i32_1 : i32, i32, i32
  }
  func.func @transform_4(%arg0: i32) -> (i32, i32, i32) {
    %c0_i32 = arith.constant 0 : i32
    %c0_i32_0 = arith.constant 0 : i32
    %c0_i32_1 = arith.constant 0 : i32
    %c0_i32_2 = arith.constant 0 : i32
    return %c0_i32, %c0_i32_0, %c0_i32_1 : i32, i32, i32
  }
  func.func @transform_5(%arg0: i32) -> (i32, i32, i32) {
    %c0_i32 = arith.constant 0 : i32
    %c0_i32_0 = arith.constant 0 : i32
    %c0_i32_1 = arith.constant 0 : i32
    %c0_i32_2 = arith.constant 0 : i32
    return %c0_i32, %c0_i32_0, %c0_i32_1 : i32, i32, i32
  }
  func.func @transform_6(%arg0: i32) -> (i32, i32, i32) {
    %c0_i32 = arith.constant 0 : i32
    %c0_i32_0 = arith.constant 0 : i32
    %c0_i32_1 = arith.constant 0 : i32
    %c0_i32_2 = arith.constant 0 : i32
    return %c0_i32, %c0_i32_0, %c0_i32_1 : i32, i32, i32
  }
  func.func @transform_7(%arg0: i32) -> (i32, i32, i32) {
    %c0_i32 = arith.constant 0 : i32
    %c0_i32_0 = arith.constant 0 : i32
    %c0_i32_1 = arith.constant 0 : i32
    %c0_i32_2 = arith.constant 0 : i32
    return %c0_i32, %c0_i32_0, %c0_i32_1 : i32, i32, i32
  }
  func.func @transform_8(%arg0: i32) -> (i32, i32, i32) {
    %c0_i32 = arith.constant 0 : i32
    %c0_i32_0 = arith.constant 0 : i32
    %c0_i32_1 = arith.constant 0 : i32
    %c0_i32_2 = arith.constant 0 : i32
    return %c0_i32, %c0_i32_0, %c0_i32_1 : i32, i32, i32
  }
  func.func @transform_9(%arg0: i32) -> (i32, i32, i32) {
    %c0_i32 = arith.constant 0 : i32
    %c0_i32_0 = arith.constant 0 : i32
    %c0_i32_1 = arith.constant 0 : i32
    %c0_i32_2 = arith.constant 0 : i32
    return %c0_i32, %c0_i32_0, %c0_i32_1 : i32, i32, i32
  }
  func.func @transform_10(%arg0: i32) -> (i32, i32) {
    %c0_i32 = arith.constant 0 : i32
    %c0_i32_0 = arith.constant 0 : i32
    %c0_i32_1 = arith.constant 0 : i32
    return %c0_i32, %c0_i32_0 : i32, i32
  }
  func.func @transform_11(%arg0: i32) -> (i32, i32) {
    %c0_i32 = arith.constant 0 : i32
    %c0_i32_0 = arith.constant 0 : i32
    %c0_i32_1 = arith.constant 0 : i32
    return %c0_i32, %c0_i32_0 : i32, i32
  }
  func.func @transform_12(%arg0: i32) -> (i32, i32) {
    %c0_i32 = arith.constant 0 : i32
    %c0_i32_0 = arith.constant 0 : i32
    return %arg0, %c0_i32 : i32, i32
  }
}

</mosaic_0001>

<bundles_post_ra>
// kernel: tpu_custom_call.1
= control target key start
LH: loop header
LB: loop body
LE: loop exit
PB: predicated region body
PF: predicated region fallthrough
CT: control target
= control target key end

     0   :  { %17 = vsyncpa [#allocation3], 0  ;;  %s8606_s0 = inlined_call_operand.vmem [shape: f32[16,8], index: 0, kind: input, shape index: {}]   ;;  %s8607_s1 = inlined_call_operand.hbm [shape: f32[16,64], index: 1, kind: input, shape index: {}]   ;;  %s8608_s2 = inlined_call_operand.hbm [shape: bf16[8,64], index: 2, kind: input, shape index: {}]   ;;  %s8609_s3 = inlined_call_operand.vmem [shape: bf16[4,64,192], index: 3, kind: input, shape index: {}]   ;;  %s8610_s4 = inlined_call_operand.vmem [shape: bf16[4,64,64], index: 4, kind: input, shape index: {}]   ;;  %s8611_s5 = inlined_call_operand.hbm [shape: bf16[4,64,128], index: 5, kind: input, shape index: {}]   ;;  %s8612_s6 = inlined_call_operand.vmem [shape: bf16[4,128,64], index: 6, kind: input, shape index: {}]   ;;  %s8613_s7 = inlined_call_operand.vmem [shape: f32[4,1,192], index: 7, kind: input, shape index: {}]   ;;  %s8614_s8 = inlined_call_operand.vmem [shape: f32[4,1,128], index: 8, kind: input, shape index: {}]   ;;  %s8615_s9 = inlined_call_operand.vmem [shape: f32[4,8,64], index: 9, kind: input, shape index: {}]   ;;  %s8616_s10 = inlined_call_operand.hbm [shape: bf16[64,128], index: 10, kind: input, shape index: {}]   ;;  %s8617_s11 = inlined_call_operand.vmem [shape: f32[1,128], index: 11, kind: input, shape index: {}]   ;;  %s8618_s12 = inlined_call_operand.hbm [shape: f32[16,128], index: 12, kind: output, shape index: {}]  }
   0x1   :  { %18 = vsyncpa [#allocation6], 0 }
   0x2   :  { %19 = vsyncpa [#allocation9], 0 }
   0x3   :  { %20 = vsyncpa [#allocation4], 0  ;;  %s7205_s21 = smov [#allocation5]   ;;  %s7206_s23 = smov [#allocation2]  }
   0x4   :  { %s41_s22 = sshll.u32 %s7205_s21, 4  ;;  %s28_s24 = sshll.u32 %s7206_s23, 4  ;;  %s42_s22 = int_to_ptr.vmem [resolvable:$true] %s41_s22  ;;  %s7288_s24 = int_to_ptr.vmem [resolvable:$true] %s28_s24 }
   0x5   :  { %s7087_s27 = scalar_lea.hbm %s8608_s2, 64 }
   0x6   :  { %p7088_p0 = scmp.ne.s32.totalorder %s8608_s2, %s7087_s27  ;;  %p7091_p1 = scmp.lt.u32.totalorder %s7087_s27, %s8608_s2 }
   0x8   :  { %p7093_p2 = pnand %p7091_p1, %p7088_p0 }
   0xa   :  { %7096 = shalt.err (!%p7093_p2)
}
   0xb   :  { %s7097_s14 = scalar_lea.vmem %s42_s22, 64  ;;  %p7102_p4 = scmp.lt.s32.totalorder %s42_s22, %s42_s22 }
   0xc   :  { %p7098_p3 = scmp.ne.s32.totalorder %s42_s22, %s7097_s14  ;;  %p7103_p5 = scmp.lt.s32.totalorder %s7097_s14, %s7097_s14 }
   0xe   :  { %p7104_p6 = por %p7103_p5, %p7102_p4 }
  0x10   :  { %p7105_p7 = pnand %p7104_p6, %p7098_p3 }
  0x12   :  { %7108 = shalt.err (!%p7105_p7)
}
  0x13   :  { %44 = dma.hbm_to_vmem [thread:$0]  %s8608_s2, 64, %s42_s22, [#allocation6]  }
  0x14   :  { %s7109_s19 = scalar_lea.hbm %s8607_s1, 256 }
  0x15   :  { %p7110_p8 = scmp.ne.s32.totalorder %s8607_s1, %s7109_s19  ;;  %p7113_p9 = scmp.lt.u32.totalorder %s7109_s19, %s8607_s1 }
  0x17   :  { %p7115_p10 = pnand %p7113_p9, %p7110_p8 }
  0x19   :  { %7118 = shalt.err (!%p7115_p10)
}
  0x1a   :  { %s7119_s26 = scalar_lea.vmem %s7288_s24, 256  ;;  %p7124_p12 = scmp.lt.s32.totalorder %s7288_s24, %s7288_s24 }
  0x1b   :  { %p7120_p11 = scmp.ne.s32.totalorder %s7288_s24, %s7119_s26  ;;  %p7125_p13 = scmp.lt.s32.totalorder %s7119_s26, %s7119_s26 }
  0x1d   :  { %p7126_p0 = por %p7125_p13, %p7124_p12 }
  0x1f   :  { %p7127_p1 = pnand %p7126_p0, %p7120_p11 }
  0x21   :  { %7130 = shalt.err (!%p7127_p1)
}
  0x22   :  { %s7207_s2 = smov 128   ;;  %s7208_s22 = smov 8  }
  0x23   :  { %34 = dma.hbm_to_vmem [thread:$0]  %s8607_s1, 256, %s7288_s24, [#allocation3], %s7207_s2, %s7207_s2, %s7208_s22  }
  0x24   :  { %s7209_s29 = smov [#allocation7]   ;;  %s7131_s15 = scalar_lea.hbm %s8611_s5, 2048 }
  0x25   :  { %s54_s30 = sshll.u32 %s7209_s29, 4  ;;  %p7132_p2 = scmp.ne.s32.totalorder %s8611_s5, %s7131_s15  ;;  %s55_s30 = int_to_ptr.vmem [resolvable:$true] %s54_s30 }
  0x26   :  { %p7135_p3 = scmp.lt.u32.totalorder %s7131_s15, %s8611_s5 }
  0x28   :  { %p7137_p4 = pnand %p7135_p3, %p7132_p2 }
  0x2a   :  { %7140 = shalt.err (!%p7137_p4)
}
  0x2b   :  { %s7141_s20 = scalar_lea.vmem %s55_s30, 2048  ;;  %p7146_p6 = scmp.lt.s32.totalorder %s55_s30, %s55_s30 }
  0x2c   :  { %p7142_p5 = scmp.ne.s32.totalorder %s55_s30, %s7141_s20  ;;  %p7147_p7 = scmp.lt.s32.totalorder %s7141_s20, %s7141_s20 }
  0x2e   :  { %p7148_p8 = por %p7147_p7, %p7146_p6 }
  0x30   :  { %p7149_p9 = pnand %p7148_p8, %p7142_p5 }
  0x32   :  { %7152 = shalt.err (!%p7149_p9)
}
  0x33   :  { %s7210_s1 = smov 64   ;;  %s7211_s24 = smov 4  }
  0x34   :  { %60 = dma.hbm_to_vmem [thread:$0]  %s8611_s5, 2048, %s55_s30, [#allocation6], %s7210_s1, %s7210_s1, %s7211_s24  }
  0x35   :  { %s7212_s25 = smov [#allocation8]   ;;  %s7153_s29 = scalar_lea.hbm %s8616_s10, 512 }
  0x36   :  { %s74_s26 = sshll.u32 %s7212_s25, 4  ;;  %p7154_p10 = scmp.ne.s32.totalorder %s8616_s10, %s7153_s29  ;;  %s75_s26 = int_to_ptr.vmem [resolvable:$true] %s74_s26 }
  0x37   :  { %p7157_p11 = scmp.lt.u32.totalorder %s7153_s29, %s8616_s10 }
  0x39   :  { %p7159_p12 = pnand %p7157_p11, %p7154_p10 }
  0x3b   :  { %7162 = shalt.err (!%p7159_p12)
}
  0x3c   :  { %s7163_s17 = scalar_lea.vmem %s75_s26, 512  ;;  %p7168_p0 = scmp.lt.s32.totalorder %s75_s26, %s75_s26 }
  0x3d   :  { %p7164_p13 = scmp.ne.s32.totalorder %s75_s26, %s7163_s17  ;;  %p7169_p1 = scmp.lt.s32.totalorder %s7163_s17, %s7163_s17 }
  0x3f   :  { %p7170_p2 = por %p7169_p1, %p7168_p0 }
  0x41   :  { %p7171_p3 = pnand %p7170_p2, %p7164_p13 }
  0x43   :  { %7174 = shalt.err (!%p7171_p3)
}
  0x44   :  { %80 = dma.hbm_to_vmem [thread:$0]  %s8616_s10, 512, %s75_s26, [#allocation9], %s7210_s1, %s7210_s1, %s7211_s24  }
  0x45   :  { %7197 = dma.done.wait [#allocation3], 256  }
  0x46   :  { %7198 = vsyncadd [#allocation3], 4294967040 }
  0x47   :  { %7199 = dma.done.wait [#allocation6], 2112  }
  0x48   :  { %7200 = vsyncadd [#allocation6], 4294965184 }
  0x49   :  { %7201 = dma.done.wait [#allocation9], 512  }
  0x4a   :  { %7202 = vsyncadd [#allocation9], 4294966784  ;;  %v7213_v0 = vmov 0.0   ;;  %vm7214_vm0 = vmmov 0   ;;  %vm287_vm1 = vcmask 1043456   ;;  %v96_v2 = vld [vmem:[%s8606_s0] sm:$0xff]  ;;  %v334_v24 = vlaneseq }
  0x4b   :  { %6155 = vmatprep.subr.bf16.mxu0 %v7213_v0  ;;  %6157 = vmatprep.mubr.msk.bf16.mxu0 %vm7214_vm0, %v7213_v0  ;;  %v100_v1 = vld [vmem:[#allocation5] sm:$0xf]  ;;  %v6811_v6 = vld [vmem:[%s8609_s3 + $0x4] ss:$8 sps:$4 sm:$0xff]   ;;  %vm283_vm2 = vcmask 64512   ;;  %v7215_v14 = vmov 0  }
  0x4c   :  { %v97_v3 = vld [vmem:[%s8606_s0 + $0x8] sm:$0xff]  ;;  %v289_v4 = vsel %vm287_vm1, %v100_v1, 0  ;;  %388 = vmatprep.subr.bf16.mxu1 %v6811_v6  ;;  %v6814_v8 = vld [vmem:[%s8609_s3 + $0x14] ss:$8 sps:$4 sm:$0xff]   ;;  %v6816_v9 = vld [vmem:[%s8609_s3 + $0x10] ss:$8 sps:$4 sm:$0xff]   ;;  %420 = vmatprep.mubr.bf16.mxu1 %v7215_v14 }
  0x4d   :  { %v282_v5 = vpack.c.bf16 %v97_v3, %v96_v2  ;;  %6156 = vmatpush3.bf16.msra.mxu0 %v289_v4  ;;  %v6813_v7 = vld [vmem:[%s8609_s3] ss:$8 sps:$4 sm:$0xff]   ;;  %v6817_v10 = vld [vmem:[%s8609_s3 + $0x24] ss:$8 sps:$4 sm:$0xff]   ;;  %v6820_v12 = vld [vmem:[%s8609_s3 + $0x34] ss:$8 sps:$4 sm:$0xff]  }
  0x4e   :  { %6161 = vmatprep.subr.bf16.mxu0 %v7213_v0  ;;  %389 = vmatpush1.bf16.msra.mxu1 %v6813_v7  ;;  %v6819_v11 = vld [vmem:[%s8609_s3 + $0x20] ss:$8 sps:$4 sm:$0xff]   ;;  %v6822_v13 = vld [vmem:[%s8609_s3 + $0x30] ss:$8 sps:$4 sm:$0xff]   ;;  %vm384_vm3 = vcmask 523264   ;;  %v7399_v25 = vshrl.u32 %v334_v24, 7 }
  0x4f   :  { %390 = vmatprep.subr.bf16.mxu1 %v6814_v8  ;;  %v98_v15 = vld [vmem:[#allocation2] sm:$0xff]  ;;  %v99_v17 = vld [vmem:[#allocation2 + $0x8] sm:$0xff]  ;;  %vm438_vm4 = vcmask 130048   ;;  %s7216_s10 = smov 48   ;;  %s7217_s20 = smov 112   ;;  %vm1338_vm5 = vcmask 261120  }
  0x50   :  { %6158 = vmatmul.mubr.msk.bf16.vlgmr.msra.gmra.mrb[0].mxu0 %vm283_vm2, %v282_v5  ;;  %v7402_v26 = vsub.s32 0, %v7399_v25  ;;  %v261_v27 = vld [vmem:[%s8613_s7] sm:$0x3]  ;;  %v7409_v29 = vsub.s32 1, %v7399_v25  ;;  %s7218_s24 = smov 32   ;;  %s7219_s21 = smov 96  }
  0x51   :  { %6163 = vmatprep.mubr.msk.bf16.mxu0 %vm7214_vm0, %v7213_v0  ;;  %s7220_s23 = smov 16   ;;  %s7221_s25 = smov 80   ;;  %vm1341_vm6 = vcmask 392192  }
  0x52   :  { %391 = vmatpush1.bf16.msra.mxu1 %v6816_v9  ;;  %v337_v28 = vrot.slane %v261_v27, %v7402_v26  ;;  %v341_v33 = vrot.slane %v261_v27, %v7409_v29 }
  0x53   :  { %392 = vmatprep.subr.bf16.mxu1 %v6817_v10 }
  0x56   :  { %393 = vmatpush1.bf16.msra.mxu1 %v6819_v11 }
  0x57   :  { %394 = vmatprep.subr.bf16.mxu1 %v6820_v12 }
  0x5a   :  { %395 = vmatpush1.bf16.msra.mxu1 %v6822_v13 }
  0x5b   :  { %6185 = vmatprep.subr.bf16.mxu1 %v7213_v0 }
 0x123   :  { %v325_v16 = vpop.f32.mrb[0].mxu0 }
 0x124   :  { %v6159_v18 = vpop.f32.mrb[1].mxu0  ;;  %v7390_v20 = vadd.f32 %v325_v16, %v98_v15 }
 0x125   :  { %v328_v19 = vpop.f32.mrb[2].mxu0 }
 0x126   :  { %v7392_v21 = vadd.f32 %v328_v19, %v99_v17  ;;  %v6160_v22 = vpop.f32.mrb[3].mxu0 }
 0x128   :  { %v332_v23 = vpack.c.bf16 %v7392_v21, %v7390_v20 }
 0x12a   :  { %5770 = vmatmul.mubr.msk.bf16.vlgmr.msra.gmra.mrb[0].mxu1 %vm384_vm3, %v332_v23 }
 0x12b   :  { %6187 = vmatprep.mubr.msk.bf16.mxu1 %vm7214_vm0, %v7213_v0 }
 0x1fd   :  { %v422_v30 = vpop.f32.mrb[0].mxu1 }
 0x1fe   :  { %v423_v31 = vadd.f32 %v422_v30, %v337_v28  ;;  %v424_v32 = vpop.f32.mrb[1].mxu1 }
 0x1ff   :  { %v426_v34 = vpop.f32.mrb[2].mxu1  ;;  %v425_v43 = vadd.f32 %v424_v32, %v341_v33 }
 0x200   :  { %v7412_v35 = vpack.c.bf16 %v423_v31, %v423_v31  ;;  %v427_v36 = vadd.f32 %v426_v34, %v337_v28  ;;  %v428_v37 = vpop.f32.mrb[3].mxu1 }
 0x201   :  { %v7414_v38 = vadd.f32 %v428_v37, %v341_v33  ;;  %v7430_v45 = vpack.c.bf16 %v425_v43, %v425_v43 }
 0x202   :  { %436 = vrot.lane.b32.xlu0 %v7412_v35, %s7210_s1  ;;  %v7418_v39 = vpack.c.bf16 %v427_v36, %v427_v36 }
 0x203   :  { %v562_v46 = vsel %vm287_vm1, %v7430_v45, 0  ;;  %v7455_v10 = vpack.c.bf16 %v7414_v38, %v7414_v38 }
 0x205   :  { %v608_v15 = vsel %vm287_vm1, %v7455_v10, 0 }
 0x206   :  { %486 = vrot.lane.b32.xlu0 %v7418_v39, %s7210_s1 }
 0x274   :  { %v437_v40 = vpop.permute.xlu0 %436 }
 0x275   :  { %v443_v41 = vsel %vm438_vm4, %v437_v40, 0 }
 0x276   :  { %6162 = vmatpush3.bf16.xpose.msra.mxu0 %v443_v41 }
 0x277   :  { %6167 = vmatprep.subr.bf16.mxu0 %v7213_v0 }
 0x278   :  { %v487_v42 = vpop.permute.xlu0 %486 }
 0x279   :  { %v492_v44 = vsel %vm438_vm4, %v487_v42, 0 }
 0x27d   :  { %6164 = vmatmul.mubr.msk.bf16.vlgmr.msra.gmra.mrb[4].mxu0 %vm438_vm4, %v7412_v35 }
 0x27e   :  { %6168 = vmatpush3.bf16.xpose.msra.mxu0 %v492_v44  ;;  %6169 = vmatprep.mubr.msk.bf16.mxu0 %vm7214_vm0, %v7213_v0 }
 0x27f   :  { %6173 = vmatprep.subr.bf16.mxu0 %v7213_v0 }
 0x285   :  { %6170 = vmatmul.mubr.msk.bf16.vlgmr.msra.gmra.mrb[8].mxu0 %vm438_vm4, %v7418_v39 }
 0x286   :  { %6174 = vmatpush3.bf16.msra.mxu0 %v562_v46  ;;  %6175 = vmatprep.mubr.msk.bf16.mxu0 %vm7214_vm0, %v7213_v0 }
 0x287   :  { %6179 = vmatprep.subr.bf16.mxu0 %v7213_v0 }
 0x350   :  { %v479_v47 = vpop.f32.mrb[4].mxu0 }
 0x351   :  { %v6165_v48 = vpop.f32.mrb[5].mxu0  ;;  %v534_v49 = vsel %vm283_vm2, %v479_v47, -inf }
 0x352   :  { %535 = vmax.xlane.f32.xlu1 %v534_v49  ;;  %v482_v50 = vpop.f32.mrb[6].mxu0 }
 0x353   :  { %v6166_v51 = vpop.f32.mrb[7].mxu0 }
 0x358   :  { %v528_v52 = vpop.f32.mrb[8].mxu0 }
 0x359   :  { %v6171_v53 = vpop.f32.mrb[9].mxu0  ;;  %v537_v54 = vsel %vm283_vm2, %v528_v52, -inf }
 0x35a   :  { %538 = vmax.xlane.f32.xlu1 %v537_v54  ;;  %v531_v55 = vpop.f32.mrb[10].mxu0 }
 0x35b   :  { %v6172_v56 = vpop.f32.mrb[11].mxu0 }
 0x36b   :  { %652 = vrot.lane.b32.xlu1 %v7412_v35, %s7216_s10 }
 0x36f   :  { %702 = vrot.lane.b32.xlu1 %v7418_v39, %s7216_s10 }
 0x3df   :  { %v536_v57 = vpop.xlane.xlu1 %535 }
 0x3e0   :  { %v540_v58 = vsub.f32 %v479_v47, %v536_v57 }
 0x3e2   :  { %v542_v59 = vmul.f32 1.442695, %v540_v58 }
 0x3e4   :  { %6927 = vpow2.f32 %v542_v59 }
 0x3e7   :  { %v539_v60 = vpop.xlane.xlu1 %538 }
 0x3e8   :  { %v541_v61 = vsub.f32 %v528_v52, %v539_v60 }
 0x3ea   :  { %v544_v62 = vmul.f32 1.442695, %v541_v61 }
 0x3eb   :  { %v653_v63 = vpop.permute.xlu1 %652 }
 0x3ec   :  { %6929 = vpow2.f32 %v544_v62  ;;  %v658_v1 = vsel %vm438_vm4, %v653_v63, 0 }
 0x3ed   :  { %6186 = vmatpush3.bf16.xpose.msra.mxu1 %v658_v1 }
 0x3ee   :  { %v6928_v2 = vpop.eup %6927  ;;  %6197 = vmatprep.subr.bf16.mxu1 %v7213_v0 }
 0x3ef   :  { %v546_v3 = vsel %vm283_vm2, %v6928_v2, 0.0  ;;  %v703_v7 = vpop.permute.xlu1 %702 }
 0x3f0   :  { %547 = vadd.xlane.f32.xlu0 %v546_v3  ;;  %v708_v19 = vsel %vm438_vm4, %v703_v7, 0 }
 0x3f6   :  { %v6930_v4 = vpop.eup %6929 }
 0x3f7   :  { %v549_v5 = vsel %vm283_vm2, %v6930_v4, 0.0 }
 0x3f8   :  { %550 = vadd.xlane.f32.xlu1 %v549_v5 }
 0x409   :  { %650 = vrot.lane.b32.xlu1 %v7412_v35, %s7217_s20 }
 0x40d   :  { %700 = vrot.lane.b32.xlu1 %v7418_v39, %s7217_s20 }
 0x47d   :  { %v548_v6 = vpop.xlane.xlu0 %547 }
 0x47e   :  { %6931 = vrcp.f32 %v548_v6 }
 0x485   :  { %v551_v8 = vpop.xlane.xlu1 %550 }
 0x486   :  { %6933 = vrcp.f32 %v551_v8 }
 0x488   :  { %v6932_v9 = vpop.eup %6931 }
 0x489   :  { %v651_v11 = vpop.permute.xlu1 %650  ;;  %v554_v12 = vmul.f32 %v6932_v9, %v6928_v2 }
 0x48a   :  { %6188 = vmatmul.mubr.msk.bf16.vlgmr.msra.gmra.mrb[4].mxu1 %vm438_vm4, %v651_v11 }
 0x48b   :  { %v556_v13 = vpack.c.bf16 %v554_v12, %v554_v12  ;;  %6199 = vmatprep.mubr.msk.bf16.mxu1 %vm7214_vm0, %v7213_v0 }
 0x48d   :  { %6176 = vmatmul.mubr.msk.bf16.vlgmr.msra.gmra.mrb[12].mxu0 %vm283_vm2, %v556_v13  ;;  %v701_v22 = vpop.permute.xlu1 %700 }
 0x48e   :  { %6180 = vmatpush3.bf16.msra.mxu0 %v608_v15  ;;  %6181 = vmatprep.mubr.msk.bf16.mxu0 %vm7214_vm0, %v7213_v0 }
 0x48f   :  { %6191 = vmatprep.subr.bf16.mxu0 %v7213_v0 }
 0x490   :  { %v6934_v16 = vpop.eup %6933 }
 0x491   :  { %v555_v17 = vmul.f32 %v6934_v16, %v6930_v4 }
 0x493   :  { %v557_v18 = vpack.c.bf16 %v555_v17, %v555_v17 }
 0x495   :  { %6182 = vmatmul.mubr.msk.bf16.vlgmr.msra.gmra.mrb[16].mxu0 %vm283_vm2, %v557_v18 }
 0x496   :  { %6193 = vmatprep.mubr.msk.bf16.mxu0 %vm7214_vm0, %v7213_v0 }
 0x497   :  { %6192 = vmatpush3.bf16.xpose.msra.mxu0 %v708_v19 }
 0x498   :  { %6203 = vmatprep.subr.bf16.mxu0 %v7213_v0 }
 0x49e   :  { %6194 = vmatmul.mubr.msk.bf16.vlgmr.msra.gmra.mrb[20].mxu0 %vm438_vm4, %v701_v22 }
 0x49f   :  { %6205 = vmatprep.mubr.msk.bf16.mxu0 %vm7214_vm0, %v7213_v0 }
 0x55d   :  { %v694_v23 = vpop.f32.mrb[4].mxu1 }
 0x55e   :  { %v6189_v24 = vpop.f32.mrb[5].mxu1  ;;  %v750_v27 = vsel %vm283_vm2, %v694_v23, -inf }
 0x55f   :  { %751 = vmax.xlane.f32.xlu0 %v750_v27  ;;  %v697_v28 = vpop.f32.mrb[6].mxu1 }
 0x560   :  { %v7475_v30 = vpop.f32.mrb[12].mxu0  ;;  %v6190_v31 = vpop.f32.mrb[7].mxu1 }
 0x561   :  { %v6177_v32 = vpop.f32.mrb[13].mxu0 }
 0x562   :  { %v601_v33 = vpop.f32.mrb[14].mxu0 }
 0x563   :  { %v6178_v34 = vpop.f32.mrb[15].mxu0 }
 0x568   :  { %v7477_v36 = vpop.f32.mrb[16].mxu0 }
 0x569   :  { %v6183_v37 = vpop.f32.mrb[17].mxu0 }
 0x56a   :  { %v647_v38 = vpop.f32.mrb[18].mxu0 }
 0x56b   :  { %v6184_v40 = vpop.f32.mrb[19].mxu0 }
 0x571   :  { %v744_v41 = vpop.f32.mrb[20].mxu0 }
 0x572   :  { %v6195_v42 = vpop.f32.mrb[21].mxu0  ;;  %v753_v43 = vsel %vm283_vm2, %v744_v41, -inf }
 0x573   :  { %754 = vmax.xlane.f32.xlu1 %v753_v43  ;;  %v747_v44 = vpop.f32.mrb[22].mxu0 }
 0x574   :  { %v6196_v46 = vpop.f32.mrb[23].mxu0 }
 0x584   :  { %924 = vrot.lane.b32.xlu1 %v7418_v39, %s7218_s24 }
 0x5ec   :  { %v752_v47 = vpop.xlane.xlu0 %751 }
 0x5ed   :  { %v756_v48 = vsub.f32 %v694_v23, %v752_v47 }
 0x5ef   :  { %v758_v49 = vmul.f32 1.442695, %v756_v48 }
 0x5f1   :  { %6935 = vpow2.f32 %v758_v49 }
 0x5fb   :  { %v6936_v50 = vpop.eup %6935 }
 0x5fc   :  { %v762_v51 = vsel %vm283_vm2, %v6936_v50, 0.0 }
 0x5fd   :  { %763 = vadd.xlane.f32.xlu0 %v762_v51 }
 0x600   :  { %v755_v52 = vpop.xlane.xlu1 %754 }
 0x601   :  { %v757_v53 = vsub.f32 %v744_v41, %v755_v52 }
 0x603   :  { %v760_v54 = vmul.f32 1.442695, %v757_v53 }
 0x604   :  { %v925_v8 = vpop.permute.xlu1 %924 }
 0x605   :  { %6937 = vpow2.f32 %v760_v54  ;;  %v930_v11 = vsel %vm438_vm4, %v925_v8, 0 }
 0x60f   :  { %v6938_v55 = vpop.eup %6937 }
 0x610   :  { %v765_v56 = vsel %vm283_vm2, %v6938_v55, 0.0 }
 0x613   :  { %775 = vrot.lane.b32.xlu0 %v7430_v45, %s7217_s20 }
 0x617   :  { %824 = vrot.lane.b32.xlu0 %v7455_v10, %s7217_s20 }
 0x636   :  { %766 = vadd.xlane.f32.xlu0 %v765_v56 }
 0x64c   :  { %874 = vrot.lane.b32.xlu0 %v7412_v35, %s7218_s24 }
 0x650   :  { %872 = vrot.lane.b32.xlu0 %v7412_v35, %s7219_s21 }
 0x654   :  { %922 = vrot.lane.b32.xlu0 %v7418_v39, %s7219_s21 }
 0x68a   :  { %v764_v57 = vpop.xlane.xlu0 %763 }
 0x68b   :  { %6939 = vrcp.f32 %v764_v57 }
 0x68e   :  { %v776_v58 = vpop.permute.xlu0 %775 }
 0x68f   :  { %v781_v59 = vsel %vm287_vm1, %v776_v58, 0 }
 0x690   :  { %6198 = vmatpush3.bf16.msra.mxu1 %v781_v59 }
 0x691   :  { %6209 = vmatprep.subr.bf16.mxu1 %v7213_v0 }
 0x692   :  { %v825_v60 = vpop.permute.xlu0 %824 }
 0x693   :  { %v830_v61 = vsel %vm287_vm1, %v825_v60, 0 }
 0x694   :  { %6204 = vmatpush3.bf16.msra.mxu0 %v830_v61 }
 0x695   :  { %v6940_v62 = vpop.eup %6939  ;;  %6215 = vmatprep.subr.bf16.mxu0 %v7213_v0 }
 0x696   :  { %v770_v63 = vmul.f32 %v6940_v62, %v6936_v50 }
 0x698   :  { %v772_v1 = vpack.c.bf16 %v770_v63, %v770_v63 }
 0x69a   :  { %6200 = vmatmul.mubr.msk.bf16.vlgmr.msra.gmra.mrb[8].mxu1 %vm283_vm2, %v772_v1 }
 0x69b   :  { %6211 = vmatprep.mubr.msk.bf16.mxu1 %vm7214_vm0, %v7213_v0 }
 0x6c3   :  { %v767_v2 = vpop.xlane.xlu0 %766 }
 0x6c4   :  { %6941 = vrcp.f32 %v767_v2 }
 0x6c7   :  { %v875_v3 = vpop.permute.xlu0 %874 }
 0x6c8   :  { %v880_v4 = vsel %vm438_vm4, %v875_v3, 0 }
 0x6c9   :  { %6210 = vmatpush3.bf16.xpose.msra.mxu1 %v880_v4 }
 0x6ca   :  { %6221 = vmatprep.subr.bf16.mxu1 %v7213_v0 }
 0x6cb   :  { %v873_v6 = vpop.permute.xlu0 %872 }
 0x6ce   :  { %v6942_v5 = vpop.eup %6941 }
 0x6cf   :  { %v771_v7 = vmul.f32 %v6942_v5, %v6938_v55  ;;  %v923_v12 = vpop.permute.xlu0 %922 }
 0x6d0   :  { %6212 = vmatmul.mubr.msk.bf16.vlgmr.msra.gmra.mrb[12].mxu1 %vm438_vm4, %v873_v6 }
 0x6d1   :  { %v773_v9 = vpack.c.bf16 %v771_v7, %v771_v7  ;;  %6223 = vmatprep.mubr.msk.bf16.mxu1 %vm7214_vm0, %v7213_v0 }
 0x6d3   :  { %6206 = vmatmul.mubr.msk.bf16.vlgmr.msra.gmra.mrb[24].mxu0 %vm283_vm2, %v773_v9 }
 0x6d4   :  { %6216 = vmatpush3.bf16.xpose.msra.mxu0 %v930_v11  ;;  %6217 = vmatprep.mubr.msk.bf16.mxu0 %vm7214_vm0, %v7213_v0 }
 0x6d5   :  { %6227 = vmatprep.subr.bf16.mxu0 %v7213_v0 }
 0x6db   :  { %6218 = vmatmul.mubr.msk.bf16.vlgmr.msra.gmra.mrb[28].mxu0 %vm438_vm4, %v923_v12 }
 0x6dc   :  { %6229 = vmatprep.mubr.msk.bf16.mxu0 %vm7214_vm0, %v7213_v0 }
 0x76d   :  { %v7514_v13 = vpop.f32.mrb[8].mxu1 }
 0x76e   :  { %v6201_v15 = vpop.f32.mrb[9].mxu1 }
 0x76f   :  { %v820_v16 = vpop.f32.mrb[10].mxu1 }
 0x770   :  { %v6202_v17 = vpop.f32.mrb[11].mxu1 }
 0x7a3   :  { %v916_v18 = vpop.f32.mrb[12].mxu1 }
 0x7a4   :  { %v6213_v19 = vpop.f32.mrb[13].mxu1  ;;  %v972_v22 = vsel %vm283_vm2, %v916_v18, -inf }
 0x7a5   :  { %973 = vmax.xlane.f32.xlu0 %v972_v22  ;;  %v919_v23 = vpop.f32.mrb[14].mxu1 }
 0x7a6   :  { %v7517_v24 = vpop.f32.mrb[24].mxu0  ;;  %v6214_v27 = vpop.f32.mrb[15].mxu1 }
 0x7a7   :  { %v6751_v28 = vpack.i.bf16 %v7517_v24, %v7514_v13  ;;  %v6207_v31 = vpop.f32.mrb[25].mxu0 }
 0x7a8   :  { %v869_v32 = vpop.f32.mrb[26].mxu0 }
 0x7a9   :  { %v6208_v33 = vpop.f32.mrb[27].mxu0 }
 0x7ae   :  { %v966_v34 = vpop.f32.mrb[28].mxu0 }
 0x7af   :  { %v6219_v37 = vpop.f32.mrb[29].mxu0  ;;  %v975_v38 = vsel %vm283_vm2, %v966_v34, -inf }
 0x7b0   :  { %976 = vmax.xlane.f32.xlu1 %v975_v38  ;;  %v969_v40 = vpop.f32.mrb[30].mxu0 }
 0x7b1   :  { %v6220_v41 = vpop.f32.mrb[31].mxu0 }
 0x7c1   :  { %1044 = vrot.lane.b32.xlu1 %v7455_v10, %s7219_s21 }
 0x7c5   :  { %1094 = vrot.lane.b32.xlu1 %v7412_v35, %s7220_s23 }
 0x7c9   :  { %1092 = vrot.lane.b32.xlu1 %v7412_v35, %s7221_s25 }
 0x832   :  { %v974_v42 = vpop.xlane.xlu0 %973 }
 0x833   :  { %v978_v43 = vsub.f32 %v916_v18, %v974_v42 }
 0x835   :  { %v980_v44 = vmul.f32 1.442695, %v978_v43 }
 0x837   :  { %6943 = vpow2.f32 %v980_v44 }
 0x83d   :  { %v977_v46 = vpop.xlane.xlu1 %976 }
 0x83e   :  { %v979_v51 = vsub.f32 %v966_v34, %v977_v46 }
 0x840   :  { %v982_v35 = vmul.f32 1.442695, %v979_v51 }
 0x841   :  { %v6944_v47 = vpop.eup %6943  ;;  %v1045_v48 = vpop.permute.xlu1 %1044 }
 0x842   :  { %v1050_v49 = vsel %vm287_vm1, %v1045_v48, 0  ;;  %v984_v50 = vsel %vm283_vm2, %v6944_v47, 0.0  ;;  %6945 = vpow2.f32 %v982_v35 }
 0x843   :  { %985 = vadd.xlane.f32.xlu0 %v984_v50  ;;  %6228 = vmatpush3.bf16.msra.mxu0 %v1050_v49 }
 0x844   :  { %6239 = vmatprep.subr.bf16.mxu0 %v7213_v0 }
 0x845   :  { %v1095_v59 = vpop.permute.xlu1 %1094 }
 0x846   :  { %v1100_v61 = vsel %vm438_vm4, %v1095_v59, 0 }
 0x84c   :  { %v6946_v52 = vpop.eup %6945 }
 0x84d   :  { %v987_v53 = vsel %vm283_vm2, %v6946_v52, 0.0 }
 0x859   :  { %996 = vrot.lane.b32.xlu0 %v7430_v45, %s7219_s21 }
 0x878   :  { %988 = vadd.xlane.f32.xlu0 %v987_v53 }
 0x88e   :  { %1144 = vrot.lane.b32.xlu0 %v7418_v39, %s7220_s23 }
 0x892   :  { %1142 = vrot.lane.b32.xlu0 %v7418_v39, %s7221_s25  ;;  %v1093_v39 = vpop.permute.xlu1 %1092 }
 0x8d0   :  { %v986_v54 = vpop.xlane.xlu0 %985 }
 0x8d1   :  { %6947 = vrcp.f32 %v986_v54 }
 0x8d4   :  { %v997_v55 = vpop.permute.xlu0 %996 }
 0x8d5   :  { %v1002_v56 = vsel %vm287_vm1, %v997_v55, 0 }
 0x8d6   :  { %6222 = vmatpush3.bf16.msra.mxu1 %v1002_v56  ;;  %v6823_v56 = vld [vmem:[%s8610_s4] sm:$0xff]  }
 0x8d7   :  { %6233 = vmatprep.subr.bf16.mxu1 %v7213_v0 }
 0x8db   :  { %v6948_v57 = vpop.eup %6947 }
 0x8dc   :  { %v992_v58 = vmul.f32 %v6948_v57, %v6944_v47  ;;  %v6824_v57 = vld [vmem:[%s8610_s4 + $0x8] sm:$0xff]  }
 0x8de   :  { %v994_v60 = vpack.c.bf16 %v992_v58, %v992_v58  ;;  %v6825_v58 = vld [vmem:[%s8610_s4 + $0x10] sm:$0xff]  }
 0x8e0   :  { %6224 = vmatmul.mubr.msk.bf16.vlgmr.msra.gmra.mrb[16].mxu1 %vm283_vm2, %v994_v60 }
 0x8e1   :  { %6234 = vmatpush3.bf16.xpose.msra.mxu1 %v1100_v61  ;;  %6235 = vmatprep.mubr.msk.bf16.mxu1 %vm7214_vm0, %v7213_v0 }
 0x8e2   :  { %6245 = vmatprep.subr.bf16.mxu1 %v7213_v0 }
 0x8e8   :  { %6236 = vmatmul.mubr.msk.bf16.vlgmr.msra.gmra.mrb[20].mxu1 %vm438_vm4, %v1093_v39 }
 0x8e9   :  { %6247 = vmatprep.mubr.msk.bf16.mxu1 %vm7214_vm0, %v7213_v0 }
 0x905   :  { %v989_v62 = vpop.xlane.xlu0 %988 }
 0x906   :  { %6949 = vrcp.f32 %v989_v62  ;;  %v6826_v62 = vld [vmem:[%s8610_s4 + $0x18] sm:$0xff]  }
 0x909   :  { %v1145_v2 = vpop.permute.xlu0 %1144 }
 0x90a   :  { %v1150_v4 = vsel %vm438_vm4, %v1145_v2, 0 }
 0x90d   :  { %v1143_v5 = vpop.permute.xlu0 %1142 }
 0x910   :  { %v6950_v63 = vpop.eup %6949 }
 0x911   :  { %v993_v1 = vmul.f32 %v6950_v63, %v6946_v52 }
 0x913   :  { %v995_v3 = vpack.c.bf16 %v993_v1, %v993_v1 }
 0x915   :  { %6230 = vmatmul.mubr.msk.bf16.vlgmr.msra.gmra.mrb[32].mxu0 %vm283_vm2, %v995_v3 }
 0x916   :  { %6240 = vmatpush3.bf16.xpose.msra.mxu0 %v1150_v4  ;;  %6241 = vmatprep.mubr.msk.bf16.mxu0 %vm7214_vm0, %v7213_v0 }
 0x917   :  { %6251 = vmatprep.subr.bf16.mxu0 %v7213_v0 }
 0x91d   :  { %6242 = vmatmul.mubr.msk.bf16.vlgmr.msra.gmra.mrb[36].mxu0 %vm438_vm4, %v1143_v5 }
 0x91e   :  { %6253 = vmatprep.mubr.msk.bf16.mxu0 %vm7214_vm0, %v7213_v0 }
 0x9b3   :  { %v1038_v6 = vpop.f32.mrb[16].mxu1 }
 0x9b4   :  { %v6225_v7 = vpop.f32.mrb[17].mxu1 }
 0x9b5   :  { %v1041_v8 = vpop.f32.mrb[18].mxu1 }
 0x9b6   :  { %v6226_v9 = vpop.f32.mrb[19].mxu1 }
 0x9bb   :  { %v1136_v11 = vpop.f32.mrb[20].mxu1 }
 0x9bc   :  { %v6237_v12 = vpop.f32.mrb[21].mxu1  ;;  %v1192_v15 = vsel %vm283_vm2, %v1136_v11, -inf }
 0x9bd   :  { %1193 = vmax.xlane.f32.xlu1 %v1192_v15  ;;  %v1139_v16 = vpop.f32.mrb[22].mxu1 }
 0x9be   :  { %v6238_v17 = vpop.f32.mrb[23].mxu1 }
 0x9e8   :  { %v1086_v18 = vpop.f32.mrb[32].mxu0 }
 0x9e9   :  { %v6756_v19 = vpack.i.bf16 %v1086_v18, %v1038_v6  ;;  %v6231_v22 = vpop.f32.mrb[33].mxu0 }
 0x9ea   :  { %v1089_v23 = vpop.f32.mrb[34].mxu0 }
 0x9eb   :  { %v6232_v27 = vpop.f32.mrb[35].mxu0 }
 0x9f0   :  { %v1186_v31 = vpop.f32.mrb[36].mxu0 }
 0x9f1   :  { %v6243_v32 = vpop.f32.mrb[37].mxu0  ;;  %v1195_v33 = vsel %vm283_vm2, %v1186_v31, -inf }
 0x9f2   :  { %1196 = vmax.xlane.f32.xlu0 %v1195_v33  ;;  %v1189_v34 = vpop.f32.mrb[38].mxu0 }
 0x9f3   :  { %v6244_v37 = vpop.f32.mrb[39].mxu0 }
 0xa4a   :  { %v1194_v38 = vpop.xlane.xlu1 %1193 }
 0xa4b   :  { %v1198_v40 = vsub.f32 %v1136_v11, %v1194_v38 }
 0xa4d   :  { %v1200_v41 = vmul.f32 1.442695, %v1198_v40 }
 0xa4f   :  { %6951 = vpow2.f32 %v1200_v41 }
 0xa59   :  { %v6952_v42 = vpop.eup %6951 }
 0xa5a   :  { %v1204_v43 = vsel %vm283_vm2, %v6952_v42, 0.0 }
 0xa5b   :  { %1205 = vadd.xlane.f32.xlu0 %v1204_v43 }
 0xa71   :  { %1216 = vrot.lane.b32.xlu0 %v7430_v45, %s7221_s25 }
 0xa75   :  { %6757 = vrot.lane.b32.xlu0 %v6756_v19, %s7218_s24 }
 0xa7f   :  { %v1197_v44 = vpop.xlane.xlu0 %1196 }
 0xa80   :  { %v1199_v46 = vsub.f32 %v1186_v31, %v1197_v44 }
 0xa82   :  { %v1202_v47 = vmul.f32 1.442695, %v1199_v46 }
 0xa84   :  { %6953 = vpow2.f32 %v1202_v47 }
 0xa8e   :  { %v6954_v48 = vpop.eup %6953 }
 0xa8f   :  { %v1207_v49 = vsel %vm283_vm2, %v6954_v48, 0.0 }
 0xa90   :  { %1208 = vadd.xlane.f32.xlu1 %v1207_v49 }
 0xaa1   :  { %1264 = vrot.lane.b32.xlu1 %v7455_v10, %s7221_s25 }
 0xaa5   :  { %6752 = vrot.lane.b32.xlu1 %v6751_v28, %s7220_s23 }
 0xae8   :  { %v1206_v50 = vpop.xlane.xlu0 %1205 }
 0xae9   :  { %6955 = vrcp.f32 %v1206_v50 }
 0xaec   :  { %v1217_v45 = vpop.permute.xlu0 %1216 }
 0xaed   :  { %v1222_v51 = vsel %vm287_vm1, %v1217_v45, 0 }
 0xaee   :  { %6246 = vmatpush3.bf16.msra.mxu1 %v1222_v51 }
 0xaef   :  { %6257 = vmatprep.subr.bf16.mxu1 %v7213_v0 }
 0xaf0   :  { %v6758_v8 = vpop.permute.xlu0 %6757 }
 0xaf1   :  { %v6760_v12 = vunpack.i.h.bf16 %v6758_v8  ;;  %v6759_v15 = vunpack.i.l.bf16 %v6758_v8 }
 0xaf3   :  { %v6956_v35 = vpop.eup %6955 }
 0xaf4   :  { %v1212_v52 = vmul.f32 %v6956_v35, %v6952_v42 }
 0xaf6   :  { %v1214_v53 = vpack.c.bf16 %v1212_v52, %v1212_v52 }
 0xaf8   :  { %6248 = vmatmul.mubr.msk.bf16.vlgmr.msra.gmra.mrb[24].mxu1 %vm283_vm2, %v1214_v53  ;;  %v6827_v53 = vld [vmem:[#allocation7] sm:$0xff]  }
 0xaf9   :  { %6265 = vmatprep.mubr.msk.bf16.mxu1 %vm7214_vm0, %v7213_v0  ;;  %6258 = vmatpush3.bf16.msra.mxu1 %v6823_v56  ;;  %v6835_v56 = vld [vmem:[%s8612_s6 + $0x20] sm:$0xff]  }
 0xafa   :  { %6259 = vmatprep.subr.bf16.mxu1 %v7213_v0 }
 0xafd   :  { %6260 = vmatpush3.bf16.msra.mxu1 %v6824_v57  ;;  %v6836_v57 = vld [vmem:[%s8612_s6 + $0x28] sm:$0xff]  }
 0xafe   :  { %6261 = vmatprep.subr.bf16.mxu1 %v7213_v0 }
 0xb01   :  { %6262 = vmatpush3.bf16.msra.mxu1 %v6825_v58 }
 0xb02   :  { %6263 = vmatprep.subr.bf16.mxu1 %v7213_v0 }
 0xb05   :  { %6264 = vmatpush3.bf16.msra.mxu1 %v6826_v62 }
 0xb06   :  { %6281 = vmatprep.subr.bf16.mxu1 %v7213_v0 }
 0xb1d   :  { %v1209_v10 = vpop.xlane.xlu1 %1208 }
 0xb1e   :  { %6957 = vrcp.f32 %v1209_v10  ;;  %v6829_v10 = vld [vmem:[#allocation7 + $0x10] sm:$0xff]  }
 0xb21   :  { %v1265_v13 = vpop.permute.xlu1 %1264 }
 0xb22   :  { %v1270_v24 = vsel %vm287_vm1, %v1265_v13, 0  ;;  %v6830_v13 = vld [vmem:[#allocation7 + $0x18] sm:$0xff]  }
 0xb23   :  { %6252 = vmatpush3.bf16.msra.mxu0 %v1270_v24  ;;  %v6831_v24 = vld [vmem:[%s8612_s6] sm:$0xff]  }
 0xb24   :  { %6269 = vmatprep.subr.bf16.mxu0 %v7213_v0 }
 0xb25   :  { %v6753_v5 = vpop.permute.xlu1 %6752 }
 0xb26   :  { %v6755_v6 = vunpack.i.h.bf16 %v6753_v5  ;;  %v6754_v7 = vunpack.i.l.bf16 %v6753_v5 }
 0xb28   :  { %v6958_v28 = vpop.eup %6957  ;;  %v1337_v9 = vsel %vm438_vm4, %v7477_v36, %v6755_v6  ;;  %v1336_v11 = vsel %vm438_vm4, %v7475_v30, %v6754_v7  ;;  %v7610_v30 = vld [vmem:[%s8615_s9] sm:$0xff] }
 0xb29   :  { %v1213_v54 = vmul.f32 %v6958_v28, %v6954_v48  ;;  %v1339_v19 = vsel %vm1338_vm5, %v1336_v11, %v6759_v15  ;;  %v1340_v22 = vsel %vm1338_vm5, %v1337_v9, %v6760_v12  ;;  %v1348_v36 = vrot.slane %v7610_v30, %v7402_v26  ;;  %v6832_v28 = vld [vmem:[%s8612_s6 + $0x8] sm:$0xff]   ;;  %v6837_v15 = vld [vmem:[%s8612_s6 + $0x30] sm:$0xff]  }
 0xb2b   :  { %v1215_v55 = vpack.c.bf16 %v1213_v54, %v1213_v54  ;;  %v6833_v54 = vld [vmem:[%s8612_s6 + $0x10] sm:$0xff]  }
 0xb2d   :  { %6254 = vmatmul.mubr.msk.bf16.vlgmr.msra.gmra.mrb[40].mxu0 %vm283_vm2, %v1215_v55  ;;  %v6834_v55 = vld [vmem:[%s8612_s6 + $0x18] sm:$0xff]  }
 0xb2e   :  { %6277 = vmatprep.mubr.msk.bf16.mxu0 %vm7214_vm0, %v7213_v0  ;;  %6270 = vmatpush3.bf16.msra.mxu0 %v6827_v53 }
 0xb2f   :  { %6271 = vmatprep.subr.bf16.mxu0 %v7213_v0 }
 0xbcb   :  { %v1258_v59 = vpop.f32.mrb[24].mxu1 }
 0xbcc   :  { %v6249_v60 = vpop.f32.mrb[25].mxu1 }
 0xbcd   :  { %v1261_v61 = vpop.f32.mrb[26].mxu1 }
 0xbce   :  { %v6250_v39 = vpop.f32.mrb[27].mxu1 }
 0xc00   :  { %v1306_v63 = vpop.f32.mrb[40].mxu0 }
 0xc01   :  { %v6761_v1 = vpack.i.bf16 %v1306_v63, %v1258_v59  ;;  %v6255_v2 = vpop.f32.mrb[41].mxu0 }
 0xc02   :  { %v1309_v3 = vpop.f32.mrb[42].mxu0 }
 0xc03   :  { %6762 = vrot.lane.b32.xlu1 %v6761_v1, %s7216_s10  ;;  %v6256_v4 = vpop.f32.mrb[43].mxu0  ;;  %v1449_v1 = vrot.slane %v7610_v30, %v7409_v29  ;;  %v7650_v3 = vsub.s32 2, %v7399_v25 }
 0xc05   :  { %v1455_v7 = vrot.slane %v7610_v30, %v7650_v3 }
 0xc75   :  { %v6763_v16 = vpop.permute.xlu1 %6762 }
 0xc76   :  { %v6765_v17 = vunpack.i.h.bf16 %v6763_v16  ;;  %v6764_v18 = vunpack.i.l.bf16 %v6763_v16  ;;  %v6838_v16 = vld [vmem:[%s8612_s6 + $0x38] sm:$0xff]  }
 0xc78   :  { %v1343_v23 = vsel %vm1341_vm6, %v1340_v22, %v6765_v17  ;;  %v1342_v27 = vsel %vm1341_vm6, %v1339_v19, %v6764_v18  ;;  %v5792_v17 = vld [vmem:[%s8614_s8] ss:$0 sm:$0xff] }
 0xc79   :  { %v1344_v31 = vpack.c.bf16 %v1343_v23, %v1342_v27 }
 0xc7b   :  { %6266 = vmatmul.mubr.msk.bf16.vlgmr.msra.gmra.mrb[28].mxu1 %vm384_vm3, %v1344_v31 }
 0xc7c   :  { %6297 = vmatprep.mubr.msk.bf16.mxu1 %vm7214_vm0, %v7213_v0  ;;  %6282 = vmatpush3.bf16.msra.mxu1 %v6831_v24  ;;  %v6841_v24 = vld [vmem:[%s8609_s3 + $0x44] ss:$8 sps:$4 sm:$0xff]  }
 0xc7d   :  { %6283 = vmatprep.subr.bf16.mxu1 %v7213_v0 }
 0xc80   :  { %6284 = vmatpush3.bf16.msra.mxu1 %v6832_v28  ;;  %v6839_v28 = vld [vmem:[%s8609_s3 + $0x40] ss:$8 sps:$4 sm:$0xff]  }
 0xc81   :  { %6285 = vmatprep.subr.bf16.mxu1 %v7213_v0 }
 0xc84   :  { %6286 = vmatpush3.bf16.msra.mxu1 %v6833_v54  ;;  %v6844_v54 = vld [vmem:[%s8609_s3 + $0x54] ss:$8 sps:$4 sm:$0xff]  }
 0xc85   :  { %6287 = vmatprep.subr.bf16.mxu1 %v7213_v0 }
 0xc88   :  { %6288 = vmatpush3.bf16.msra.mxu1 %v6834_v55  ;;  %v6842_v55 = vld [vmem:[%s8609_s3 + $0x50] ss:$8 sps:$4 sm:$0xff]  }
 0xc89   :  { %6289 = vmatprep.subr.bf16.mxu1 %v7213_v0 }
 0xc8c   :  { %6290 = vmatpush3.bf16.msra.mxu1 %v6835_v56  ;;  %v6847_v56 = vld [vmem:[%s8609_s3 + $0x64] ss:$8 sps:$4 sm:$0xff]  }
 0xc8d   :  { %6291 = vmatprep.subr.bf16.mxu1 %v7213_v0 }
 0xc90   :  { %6292 = vmatpush3.bf16.msra.mxu1 %v6836_v57  ;;  %v6845_v57 = vld [vmem:[%s8609_s3 + $0x60] ss:$8 sps:$4 sm:$0xff]  }
 0xc91   :  { %6293 = vmatprep.subr.bf16.mxu1 %v7213_v0 }
 0xc94   :  { %6294 = vmatpush3.bf16.msra.mxu1 %v6837_v15 }
 0xc95   :  { %6295 = vmatprep.subr.bf16.mxu1 %v7213_v0 }
 0xc98   :  { %6296 = vmatpush3.bf16.msra.mxu1 %v6838_v16 }
 0xc99   :  { %6313 = vmatprep.subr.bf16.mxu1 %v7213_v0 }
 0xd4e   :  { %v1410_v32 = vpop.f32.mrb[28].mxu1 }
 0xd4f   :  { %v1411_v33 = vadd.f32 %v1410_v32, %v1348_v36  ;;  %v6267_v34 = vpop.f32.mrb[29].mxu1 }
 0xd50   :  { %v1413_v37 = vpop.f32.mrb[30].mxu1  ;;  %v7670_v34 = vsub.s32 3, %v7399_v25 }
 0xd51   :  { %v1414_v38 = vadd.f32 %v1413_v37, %v1348_v36  ;;  %v6268_v40 = vpop.f32.mrb[31].mxu1  ;;  %v1417_v41 = vadd.f32 %v1411_v33, %v7390_v20 }
 0xd52   :  { %v1539_v37 = vrot.slane %v7610_v30, %v7670_v34 }
 0xd53   :  { %v1419_v42 = vsel %vm384_vm3, %v1417_v41, 0.0  ;;  %v1418_v43 = vadd.f32 %v1414_v38, %v7392_v21  ;;  %v6828_v21 = vld [vmem:[#allocation7 + $0x8] sm:$0xff]  }
 0xd54   :  { %1420 = vadd.xlane.f32.xlu0 %v1419_v42  ;;  %6272 = vmatpush3.bf16.msra.mxu0 %v6828_v21 }
 0xd55   :  { %v1422_v44 = vsel %vm384_vm3, %v1418_v43, 0.0  ;;  %6273 = vmatprep.subr.bf16.mxu0 %v7213_v0 }
 0xd56   :  { %1423 = vadd.xlane.f32.xlu1 %v1422_v44 }
 0xd58   :  { %6274 = vmatpush3.bf16.msra.mxu0 %v6829_v10 }
 0xd59   :  { %6275 = vmatprep.subr.bf16.mxu0 %v7213_v0 }
 0xd5c   :  { %6276 = vmatpush3.bf16.msra.mxu0 %v6830_v13 }
 0xd5d   :  { %1724 = vmatprep.subr.bf16.mxu0 %v6841_v24 }
 0xde1   :  { %v1421_v46 = vpop.xlane.xlu0 %1420 }
 0xde2   :  { %v1426_v47 = vmul.f32 0.015625, %v1421_v46 }
 0xde3   :  { %v1424_v48 = vpop.xlane.xlu1 %1423 }
 0xde4   :  { %v1428_v49 = vsub.f32 %v1417_v41, %v1426_v47  ;;  %v1427_v50 = vmul.f32 0.015625, %v1424_v48 }
 0xde6   :  { %v1429_v45 = vsub.f32 %v1418_v43, %v1427_v50  ;;  %v1430_v51 = vmul.f32 %v1428_v49, %v1428_v49 }
 0xde8   :  { %v1432_v35 = vsel %vm384_vm3, %v1430_v51, 0.0  ;;  %v1431_v52 = vmul.f32 %v1429_v45, %v1429_v45 }
 0xde9   :  { %1433 = vadd.xlane.f32.xlu0 %v1432_v35 }
 0xdea   :  { %v1435_v20 = vsel %vm384_vm3, %v1431_v52, 0.0 }
 0xded   :  { %1436 = vadd.xlane.f32.xlu0 %v1435_v20 }
 0xe76   :  { %v1434_v58 = vpop.xlane.xlu0 %1433 }
 0xe77   :  { %v1438_v59 = vmul.f32 0.015625, %v1434_v58  ;;  %v6848_v58 = vld [vmem:[%s8609_s3 + $0x70] ss:$8 sps:$4 sm:$0xff]  }
 0xe79   :  { %v1440_v60 = vadd.f32 1e-05, %v1438_v59  ;;  %v6850_v59 = vld [vmem:[%s8609_s3 + $0x74] ss:$8 sps:$4 sm:$0xff]  }
 0xe7a   :  { %v1437_v61 = vpop.xlane.xlu0 %1436 }
 0xe7b   :  { %6959 = vrsqrt.f32 %v1440_v60  ;;  %v1439_v39 = vmul.f32 0.015625, %v1437_v61 }
 0xe7d   :  { %v1441_v62 = vadd.f32 1e-05, %v1439_v39 }
 0xe7f   :  { %6961 = vrsqrt.f32 %v1441_v62 }
 0xe85   :  { %v6960_v63 = vpop.eup %6959 }
 0xe86   :  { %v1444_v2 = vmul.f32 %v6960_v63, %v1428_v49 }
 0xe88   :  { %v1450_v5 = vmul.f32 %v1449_v1, %v1444_v2  ;;  %v7704_v2 = vsub.s32 4, %v7399_v25 }
 0xe89   :  { %v6962_v4 = vpop.eup %6961 }
 0xe8a   :  { %v1445_v6 = vmul.f32 %v6962_v4, %v1429_v45  ;;  %v1456_v9 = vadd.f32 %v1455_v7, %v1450_v5  ;;  %v1660_v4 = vrot.slane %v7610_v30, %v7704_v2  ;;  %v7709_v5 = vsub.s32 5, %v7399_v25  ;;  %v262_v25 = vld [vmem:[%s8613_s7 + $0x2] sm:$0x3] }
 0xe8c   :  { %v1451_v8 = vmul.f32 %v1449_v1, %v1445_v6 }
 0xe8e   :  { %v1457_v11 = vadd.f32 %v1455_v7, %v1451_v8 }
 0xe90   :  { %v1458_v12 = vpack.c.bf16 %v1457_v11, %v1456_v9 }
 0xe92   :  { %6278 = vmatmul.mubr.msk.bf16.vlgmr.msra.gmra.mrb[44].mxu0 %vm384_vm3, %v1458_v12  ;;  %v1666_v12 = vrot.slane %v7610_v30, %v7709_v5  ;;  %v1678_v30 = vrot.slane %v262_v25, %v7409_v29 }
 0xe93   :  { %1756 = vmatprep.mubr.bf16.mxu0 %v7215_v14  ;;  %1725 = vmatpush1.bf16.msra.mxu0 %v6839_v28 }
 0xe94   :  { %1726 = vmatprep.subr.bf16.mxu0 %v6844_v54 }
 0xe97   :  { %1727 = vmatpush1.bf16.msra.mxu0 %v6842_v55 }
 0xe98   :  { %1728 = vmatprep.subr.bf16.mxu0 %v6847_v56 }
 0xe9b   :  { %1729 = vmatpush1.bf16.msra.mxu0 %v6845_v57 }
 0xe9c   :  { %1730 = vmatprep.subr.bf16.mxu0 %v6850_v59 }
 0xe9f   :  { %1731 = vmatpush1.bf16.msra.mxu0 %v6848_v58 }
 0xea0   :  { %6301 = vmatprep.subr.bf16.mxu0 %v7213_v0 }
 0xf65   :  { %v1526_v18 = vpop.f32.mrb[44].mxu0 }
 0xf66   :  { %v1527_v19 = vadd.f32 %v5792_v17, %v1526_v18  ;;  %v6279_v22 = vpop.f32.mrb[45].mxu0 }
 0xf67   :  { %v1529_v23 = vpop.f32.mrb[46].mxu0 }
 0xf68   :  { %v1530_v27 = vadd.f32 %v5792_v17, %v1529_v23  ;;  %v6280_v31 = vpop.f32.mrb[47].mxu0  ;;  %v1533_v36 = vmax.f32 %v1527_v19, 0.0  ;;  %v1674_v19 = vrot.slane %v262_v25, %v7402_v26 }
 0xf6a   :  { %v1534_v32 = vmax.f32 %v1530_v27, 0.0 }
 0xf6c   :  { %v1535_v33 = vpack.c.bf16 %v1534_v32, %v1533_v36 }
 0xf6e   :  { %6298 = vmatmul.mubr.bf16.vlgmr.msra.gmra.mrb[32].mxu1 %v1535_v33 }
 0xf6f   :  { %6315 = vmatprep.mubr.msk.bf16.mxu1 %vm7214_vm0, %v7213_v0 }
0x1041   :  { %v1622_v38 = vpop.f32.mrb[32].mxu1 }
0x1042   :  { %v1623_v40 = vadd.f32 %v1622_v38, %v1539_v37  ;;  %v6299_v41 = vpop.f32.mrb[33].mxu1 }
0x1043   :  { %v1625_v42 = vpop.f32.mrb[34].mxu1 }
0x1044   :  { %v1626_v43 = vadd.f32 %v1625_v42, %v1539_v37  ;;  %v6300_v44 = vpop.f32.mrb[35].mxu1  ;;  %v1629_v46 = vadd.f32 %v1623_v40, %v1456_v9 }
0x1046   :  { %v1631_v47 = vsel %vm384_vm3, %v1629_v46, 0.0  ;;  %v1630_v48 = vadd.f32 %v1626_v43, %v1457_v11 }
0x1047   :  { %1632 = vadd.xlane.f32.xlu1 %v1631_v47 }
0x1048   :  { %v1634_v49 = vsel %vm384_vm3, %v1630_v48, 0.0 }
0x1049   :  { %1635 = vadd.xlane.f32.xlu0 %v1634_v49 }
0x10d4   :  { %v1633_v50 = vpop.xlane.xlu1 %1632 }
0x10d5   :  { %v1637_v45 = vmul.f32 0.015625, %v1633_v50 }
0x10d6   :  { %v1636_v51 = vpop.xlane.xlu0 %1635 }
0x10d7   :  { %v1639_v35 = vsub.f32 %v1629_v46, %v1637_v45  ;;  %v1638_v52 = vmul.f32 0.015625, %v1636_v51 }
0x10d9   :  { %v1640_v20 = vsub.f32 %v1630_v48, %v1638_v52  ;;  %v1641_v53 = vmul.f32 %v1639_v35, %v1639_v35 }
0x10db   :  { %v1643_v21 = vsel %vm384_vm3, %v1641_v53, 0.0  ;;  %v1642_v10 = vmul.f32 %v1640_v20, %v1640_v20 }
0x10dc   :  { %1644 = vadd.xlane.f32.xlu1 %v1643_v21 }
0x10dd   :  { %v1646_v13 = vsel %vm384_vm3, %v1642_v10, 0.0 }
0x10de   :  { %1647 = vadd.xlane.f32.xlu0 %v1646_v13 }
0x1169   :  { %v1645_v60 = vpop.xlane.xlu1 %1644 }
0x116a   :  { %v1649_v61 = vmul.f32 0.015625, %v1645_v60 }
0x116b   :  { %v1648_v39 = vpop.xlane.xlu0 %1647 }
0x116c   :  { %v1651_v62 = vadd.f32 1e-05, %v1649_v61  ;;  %v1650_v63 = vmul.f32 0.015625, %v1648_v39 }
0x116e   :  { %6963 = vrsqrt.f32 %v1651_v62  ;;  %v1652_v1 = vadd.f32 1e-05, %v1650_v63 }
0x1170   :  { %6965 = vrsqrt.f32 %v1652_v1 }
0x1178   :  { %v6964_v6 = vpop.eup %6963 }
0x1179   :  { %v1655_v7 = vmul.f32 %v6964_v6, %v1639_v35 }
0x117a   :  { %v6966_v8 = vpop.eup %6965 }
0x117b   :  { %v1661_v9 = vmul.f32 %v1660_v4, %v1655_v7  ;;  %v1656_v11 = vmul.f32 %v6966_v8, %v1640_v20 }
0x117d   :  { %v1662_v15 = vmul.f32 %v1660_v4, %v1656_v11  ;;  %v7713_v16 = vadd.f32 %v1666_v12, %v1661_v9 }
0x117f   :  { %v7715_v17 = vadd.f32 %v1666_v12, %v1662_v15 }
0x1181   :  { %v1669_v18 = vpack.c.bf16 %v7715_v17, %v7713_v16 }
0x1183   :  { %5814 = vmatmul.mubr.msk.bf16.vlgmr.msra.gmra.mrb[48].mxu0 %vm384_vm3, %v1669_v18 }
0x1184   :  { %6303 = vmatprep.mubr.msk.bf16.mxu0 %vm7214_vm0, %v7213_v0 }
0x1256   :  { %v1758_v22 = vpop.f32.mrb[48].mxu0 }
0x1257   :  { %v1759_v23 = vadd.f32 %v1758_v22, %v1674_v19  ;;  %v1760_v27 = vpop.f32.mrb[49].mxu0 }
0x1258   :  { %v1761_v31 = vadd.f32 %v1760_v27, %v1678_v30  ;;  %v1762_v36 = vpop.f32.mrb[50].mxu0 }
0x1259   :  { %v7727_v32 = vpack.c.bf16 %v1759_v23, %v1759_v23  ;;  %v1763_v33 = vadd.f32 %v1762_v36, %v1674_v19  ;;  %v1764_v37 = vpop.f32.mrb[51].mxu0 }
0x125a   :  { %v7729_v38 = vpack.c.bf16 %v1761_v31, %v1761_v31  ;;  %v1765_v40 = vadd.f32 %v1764_v37, %v1678_v30 }
0x125b   :  { %v7731_v41 = vpack.c.bf16 %v1763_v33, %v1763_v33  ;;  %1772 = vrot.lane.b32.xlu1 %v7727_v32, %s7210_s1 }
0x125c   :  { %v1897_v42 = vsel %vm287_vm1, %v7729_v38, 0  ;;  %v7748_v48 = vpack.c.bf16 %v1765_v40, %v1765_v40 }
0x125d   :  { %1821 = vrot.lane.b32.xlu0 %v7731_v41, %s7210_s1  ;;  %6314 = vmatpush3.bf16.msra.mxu1 %v1897_v42 }
0x125e   :  { %6325 = vmatprep.subr.bf16.mxu1 %v7213_v0  ;;  %v1943_v49 = vsel %vm287_vm1, %v7748_v48, 0 }
0x12cd   :  { %v1773_v43 = vpop.permute.xlu1 %1772 }
0x12ce   :  { %v1778_v44 = vsel %vm438_vm4, %v1773_v43, 0 }
0x12cf   :  { %6302 = vmatpush3.bf16.xpose.msra.mxu0 %v1778_v44  ;;  %v1822_v46 = vpop.permute.xlu0 %1821 }
0x12d0   :  { %6307 = vmatprep.subr.bf16.mxu0 %v7213_v0  ;;  %v1827_v47 = vsel %vm438_vm4, %v1822_v46, 0 }
0x12d6   :  { %6304 = vmatmul.mubr.msk.bf16.vlgmr.msra.gmra.mrb[52].mxu0 %vm438_vm4, %v7727_v32 }
0x12d7   :  { %6308 = vmatpush3.bf16.xpose.msra.mxu0 %v1827_v47  ;;  %6309 = vmatprep.mubr.msk.bf16.mxu0 %vm7214_vm0, %v7213_v0 }
0x12d8   :  { %6319 = vmatprep.subr.bf16.mxu0 %v7213_v0 }
0x12de   :  { %6310 = vmatmul.mubr.msk.bf16.vlgmr.msra.gmra.mrb[56].mxu0 %vm438_vm4, %v7731_v41 }
0x12df   :  { %6320 = vmatpush3.bf16.msra.mxu0 %v1943_v49  ;;  %6321 = vmatprep.mubr.msk.bf16.mxu0 %vm7214_vm0, %v7213_v0 }
0x12e0   :  { %6331 = vmatprep.subr.bf16.mxu0 %v7213_v0 }
0x13a9   :  { %v1814_v50 = vpop.f32.mrb[52].mxu0 }
0x13aa   :  { %v6305_v45 = vpop.f32.mrb[53].mxu0  ;;  %v1869_v51 = vsel %vm283_vm2, %v1814_v50, -inf }
0x13ab   :  { %1870 = vmax.xlane.f32.xlu1 %v1869_v51  ;;  %v1817_v35 = vpop.f32.mrb[54].mxu0 }
0x13ac   :  { %v6306_v52 = vpop.f32.mrb[55].mxu0 }
0x13b1   :  { %v1863_v20 = vpop.f32.mrb[56].mxu0 }
0x13b2   :  { %v6311_v53 = vpop.f32.mrb[57].mxu0  ;;  %v1872_v21 = vsel %vm283_vm2, %v1863_v20, -inf }
0x13b3   :  { %1873 = vmax.xlane.f32.xlu0 %v1872_v21  ;;  %v1866_v10 = vpop.f32.mrb[58].mxu0 }
0x13b4   :  { %v6312_v13 = vpop.f32.mrb[59].mxu0 }
0x13bc   :  { %1987 = vrot.lane.b32.xlu1 %v7727_v32, %s7216_s10 }
0x1438   :  { %v1871_v24 = vpop.xlane.xlu1 %1870 }
0x1439   :  { %v1875_v28 = vsub.f32 %v1814_v50, %v1871_v24 }
0x143b   :  { %v1877_v54 = vmul.f32 1.442695, %v1875_v28 }
0x143c   :  { %v1988_v39 = vpop.permute.xlu1 %1987 }
0x143d   :  { %6967 = vpow2.f32 %v1877_v54  ;;  %v1993_v7 = vsel %vm438_vm4, %v1988_v39, 0 }
0x1440   :  { %v1874_v55 = vpop.xlane.xlu0 %1873 }
0x1441   :  { %v1876_v56 = vsub.f32 %v1863_v20, %v1874_v55 }
0x1443   :  { %v1879_v57 = vmul.f32 1.442695, %v1876_v56 }
0x1445   :  { %6969 = vpow2.f32 %v1879_v57 }
0x1447   :  { %v6968_v58 = vpop.eup %6967 }
0x1448   :  { %v1881_v59 = vsel %vm283_vm2, %v6968_v58, 0.0 }
0x1449   :  { %1882 = vadd.xlane.f32.xlu1 %v1881_v59 }
0x144f   :  { %v6970_v60 = vpop.eup %6969 }
0x1450   :  { %v1884_v61 = vsel %vm283_vm2, %v6970_v60, 0.0 }
0x1451   :  { %1885 = vadd.xlane.f32.xlu0 %v1884_v61 }
0x145a   :  { %1985 = vrot.lane.b32.xlu1 %v7727_v32, %s7217_s20 }
0x145e   :  { %2035 = vrot.lane.b32.xlu1 %v7731_v41, %s7217_s20 }
0x1467   :  { %2037 = vrot.lane.b32.xlu0 %v7731_v41, %s7216_s10 }
0x14d6   :  { %v1883_v62 = vpop.xlane.xlu1 %1882 }
0x14d7   :  { %6971 = vrcp.f32 %v1883_v62 }
0x14da   :  { %v1986_v15 = vpop.permute.xlu1 %1985 }
0x14de   :  { %v1886_v63 = vpop.xlane.xlu0 %1885  ;;  %v2036_v25 = vpop.permute.xlu1 %2035 }
0x14df   :  { %6973 = vrcp.f32 %v1886_v63 }
0x14e1   :  { %v6972_v1 = vpop.eup %6971 }
0x14e2   :  { %v1889_v4 = vmul.f32 %v6972_v1, %v6968_v58  ;;  %v2038_v11 = vpop.permute.xlu0 %2037 }
0x14e3   :  { %v2043_v18 = vsel %vm438_vm4, %v2038_v11, 0 }
0x14e4   :  { %v1891_v6 = vpack.c.bf16 %v1889_v4, %v1889_v4 }
0x14e6   :  { %6316 = vmatmul.mubr.msk.bf16.vlgmr.msra.gmra.mrb[36].mxu1 %vm283_vm2, %v1891_v6 }
0x14e7   :  { %6326 = vmatpush3.bf16.xpose.msra.mxu1 %v1993_v7  ;;  %6327 = vmatprep.mubr.msk.bf16.mxu1 %vm7214_vm0, %v7213_v0 }
0x14e8   :  { %6337 = vmatprep.subr.bf16.mxu1 %v7213_v0 }
0x14e9   :  { %v6974_v8 = vpop.eup %6973 }
0x14ea   :  { %v1890_v9 = vmul.f32 %v6974_v8, %v6970_v60 }
0x14ec   :  { %v1892_v12 = vpack.c.bf16 %v1890_v9, %v1890_v9 }
0x14ee   :  { %6322 = vmatmul.mubr.msk.bf16.vlgmr.msra.gmra.mrb[60].mxu0 %vm283_vm2, %v1892_v12  ;;  %6328 = vmatmul.mubr.msk.bf16.vlgmr.msra.gmra.mrb[40].mxu1 %vm438_vm4, %v1986_v15 }
0x14ef   :  { %6332 = vmatpush3.bf16.xpose.msra.mxu0 %v2043_v18  ;;  %6333 = vmatprep.mubr.msk.bf16.mxu0 %vm7214_vm0, %v7213_v0 }
0x14f0   :  { %6343 = vmatprep.subr.bf16.mxu0 %v7213_v0  ;;  %6339 = vmatprep.mubr.msk.bf16.mxu1 %vm7214_vm0, %v7213_v0 }
0x14f6   :  { %6334 = vmatmul.mubr.msk.bf16.vlgmr.msra.gmra.mrb[64].mxu0 %vm438_vm4, %v2036_v25 }
0x14f7   :  { %6345 = vmatprep.mubr.msk.bf16.mxu0 %vm7214_vm0, %v7213_v0 }
0x15b9   :  { %v7785_v19 = vpop.f32.mrb[36].mxu1 }
0x15ba   :  { %v6317_v30 = vpop.f32.mrb[37].mxu1 }
0x15bb   :  { %v1936_v22 = vpop.f32.mrb[38].mxu1 }
0x15bc   :  { %v6318_v23 = vpop.f32.mrb[39].mxu1 }
0x15c1   :  { %v7787_v27 = vpop.f32.mrb[60].mxu0  ;;  %v2029_v31 = vpop.f32.mrb[40].mxu1 }
0x15c2   :  { %v6323_v36 = vpop.f32.mrb[61].mxu0  ;;  %v6329_v33 = vpop.f32.mrb[41].mxu1  ;;  %v2085_v37 = vsel %vm283_vm2, %v2029_v31, -inf }
0x15c3   :  { %v2032_v40 = vpop.f32.mrb[42].mxu1  ;;  %2086 = vmax.xlane.f32.xlu0 %v2085_v37  ;;  %v1982_v42 = vpop.f32.mrb[62].mxu0 }
0x15c4   :  { %v6324_v43 = vpop.f32.mrb[63].mxu0  ;;  %v6330_v44 = vpop.f32.mrb[43].mxu1 }
0x15c9   :  { %v2079_v46 = vpop.f32.mrb[64].mxu0 }
0x15ca   :  { %v6335_v47 = vpop.f32.mrb[65].mxu0  ;;  %v2088_v49 = vsel %vm283_vm2, %v2079_v46, -inf }
0x15cb   :  { %2089 = vmax.xlane.f32.xlu1 %v2088_v49  ;;  %v2082_v50 = vpop.f32.mrb[66].mxu0 }
0x15cc   :  { %v6336_v45 = vpop.f32.mrb[67].mxu0 }
0x15dc   :  { %2110 = vrot.lane.b32.xlu1 %v7729_v38, %s7217_s20 }
0x15e0   :  { %2209 = vrot.lane.b32.xlu1 %v7727_v32, %s7218_s24 }
0x15e4   :  { %2259 = vrot.lane.b32.xlu1 %v7731_v41, %s7218_s24 }
0x15e8   :  { %2257 = vrot.lane.b32.xlu1 %v7731_v41, %s7219_s21 }
0x1650   :  { %v2087_v51 = vpop.xlane.xlu0 %2086 }
0x1651   :  { %v2091_v35 = vsub.f32 %v2029_v31, %v2087_v51 }
0x1653   :  { %v2093_v52 = vmul.f32 1.442695, %v2091_v35 }
0x1655   :  { %6975 = vpow2.f32 %v2093_v52 }
0x1658   :  { %v2090_v20 = vpop.xlane.xlu1 %2089 }
0x1659   :  { %v2092_v53 = vsub.f32 %v2079_v46, %v2090_v20 }
0x165b   :  { %v2095_v21 = vmul.f32 1.442695, %v2092_v53 }
0x165c   :  { %v2111_v10 = vpop.permute.xlu1 %2110 }
0x165d   :  { %6977 = vpow2.f32 %v2095_v21  ;;  %v2116_v13 = vsel %vm287_vm1, %v2111_v10, 0 }
0x165e   :  { %6338 = vmatpush3.bf16.msra.mxu1 %v2116_v13 }
0x165f   :  { %v6976_v24 = vpop.eup %6975  ;;  %6349 = vmatprep.subr.bf16.mxu1 %v7213_v0 }
0x1660   :  { %v2097_v28 = vsel %vm283_vm2, %v6976_v24, 0.0  ;;  %v2210_v61 = vpop.permute.xlu1 %2209 }
0x1661   :  { %2098 = vadd.xlane.f32.xlu0 %v2097_v28  ;;  %v2215_v63 = vsel %vm438_vm4, %v2210_v61, 0 }
0x1664   :  { %v2260_v6 = vpop.permute.xlu1 %2259 }
0x1665   :  { %v2265_v9 = vsel %vm438_vm4, %v2260_v6, 0 }
0x1667   :  { %v6978_v54 = vpop.eup %6977 }
0x1668   :  { %v2100_v55 = vsel %vm283_vm2, %v6978_v54, 0.0  ;;  %v2258_v11 = vpop.permute.xlu1 %2257 }
0x1669   :  { %2101 = vadd.xlane.f32.xlu0 %v2100_v55 }
0x167f   :  { %2159 = vrot.lane.b32.xlu0 %v7748_v48, %s7217_s20 }
0x1683   :  { %2207 = vrot.lane.b32.xlu0 %v7727_v32, %s7219_s21 }
0x16ee   :  { %v2099_v56 = vpop.xlane.xlu0 %2098 }
0x16ef   :  { %6979 = vrcp.f32 %v2099_v56 }
0x16f6   :  { %v2102_v57 = vpop.xlane.xlu0 %2101 }
0x16f7   :  { %6981 = vrcp.f32 %v2102_v57 }
0x16f9   :  { %v6980_v58 = vpop.eup %6979 }
0x16fa   :  { %v2160_v59 = vpop.permute.xlu0 %2159  ;;  %v2105_v60 = vmul.f32 %v6980_v58, %v6976_v24 }
0x16fb   :  { %v2165_v39 = vsel %vm287_vm1, %v2160_v59, 0 }
0x16fc   :  { %6344 = vmatpush3.bf16.msra.mxu0 %v2165_v39  ;;  %v2107_v62 = vpack.c.bf16 %v2105_v60, %v2105_v60 }
0x16fd   :  { %6355 = vmatprep.subr.bf16.mxu0 %v7213_v0 }
0x16fe   :  { %6340 = vmatmul.mubr.msk.bf16.vlgmr.msra.gmra.mrb[44].mxu1 %vm283_vm2, %v2107_v62  ;;  %v2208_v8 = vpop.permute.xlu0 %2207 }
0x16ff   :  { %6350 = vmatpush3.bf16.xpose.msra.mxu1 %v2215_v63  ;;  %6351 = vmatprep.mubr.msk.bf16.mxu1 %vm7214_vm0, %v7213_v0 }
0x1700   :  { %6361 = vmatprep.subr.bf16.mxu1 %v7213_v0 }
0x1701   :  { %v6982_v1 = vpop.eup %6981 }
0x1702   :  { %v2106_v4 = vmul.f32 %v6982_v1, %v6978_v54 }
0x1704   :  { %v2108_v7 = vpack.c.bf16 %v2106_v4, %v2106_v4 }
0x1706   :  { %6346 = vmatmul.mubr.msk.bf16.vlgmr.msra.gmra.mrb[68].mxu0 %vm283_vm2, %v2108_v7  ;;  %6352 = vmatmul.mubr.msk.bf16.vlgmr.msra.gmra.mrb[48].mxu1 %vm438_vm4, %v2208_v8 }
0x1707   :  { %6356 = vmatpush3.bf16.xpose.msra.mxu0 %v2265_v9  ;;  %6357 = vmatprep.mubr.msk.bf16.mxu0 %vm7214_vm0, %v7213_v0 }
0x1708   :  { %6367 = vmatprep.subr.bf16.mxu0 %v7213_v0  ;;  %6363 = vmatprep.mubr.msk.bf16.mxu1 %vm7214_vm0, %v7213_v0 }
0x170e   :  { %6358 = vmatmul.mubr.msk.bf16.vlgmr.msra.gmra.mrb[72].mxu0 %vm438_vm4, %v2258_v11 }
0x170f   :  { %6369 = vmatprep.mubr.msk.bf16.mxu0 %vm7214_vm0, %v7213_v0 }
0x17d1   :  { %v7825_v12 = vpop.f32.mrb[44].mxu1 }
0x17d2   :  { %v6341_v15 = vpop.f32.mrb[45].mxu1 }
0x17d3   :  { %v2155_v18 = vpop.f32.mrb[46].mxu1 }
0x17d4   :  { %v6342_v25 = vpop.f32.mrb[47].mxu1 }
0x17d9   :  { %v7827_v30 = vpop.f32.mrb[68].mxu0  ;;  %v2251_v22 = vpop.f32.mrb[48].mxu1 }
0x17da   :  { %v6766_v23 = vpack.i.bf16 %v7827_v30, %v7825_v12  ;;  %v6347_v31 = vpop.f32.mrb[69].mxu0  ;;  %v6353_v36 = vpop.f32.mrb[49].mxu1  ;;  %v2307_v33 = vsel %vm283_vm2, %v2251_v22, -inf }
0x17db   :  { %2308 = vmax.xlane.f32.xlu0 %v2307_v33  ;;  %v2204_v37 = vpop.f32.mrb[70].mxu0  ;;  %v2254_v40 = vpop.f32.mrb[50].mxu1 }
0x17dc   :  { %v6348_v42 = vpop.f32.mrb[71].mxu0  ;;  %v6354_v43 = vpop.f32.mrb[51].mxu1 }
0x17e1   :  { %v2301_v44 = vpop.f32.mrb[72].mxu0 }
0x17e2   :  { %v6359_v46 = vpop.f32.mrb[73].mxu0  ;;  %v2310_v47 = vsel %vm283_vm2, %v2301_v44, -inf }
0x17e3   :  { %2311 = vmax.xlane.f32.xlu1 %v2310_v47  ;;  %v2304_v49 = vpop.f32.mrb[74].mxu0 }
0x17e4   :  { %v6360_v50 = vpop.f32.mrb[75].mxu0 }
0x17f4   :  { %2331 = vrot.lane.b32.xlu1 %v7729_v38, %s7219_s21 }
0x17f8   :  { %2429 = vrot.lane.b32.xlu1 %v7727_v32, %s7220_s23 }
0x17fc   :  { %2479 = vrot.lane.b32.xlu1 %v7731_v41, %s7220_s23 }
0x1800   :  { %2477 = vrot.lane.b32.xlu1 %v7731_v41, %s7221_s25 }
0x1868   :  { %v2309_v45 = vpop.xlane.xlu0 %2308 }
0x1869   :  { %v2313_v51 = vsub.f32 %v2251_v22, %v2309_v45 }
0x186b   :  { %v2315_v35 = vmul.f32 1.442695, %v2313_v51 }
0x186d   :  { %6983 = vpow2.f32 %v2315_v35 }
0x1870   :  { %v2312_v52 = vpop.xlane.xlu1 %2311 }
0x1871   :  { %v2314_v20 = vsub.f32 %v2301_v44, %v2312_v52 }
0x1873   :  { %v2317_v53 = vmul.f32 1.442695, %v2314_v20 }
0x1874   :  { %v2332_v21 = vpop.permute.xlu1 %2331 }
0x1875   :  { %6985 = vpow2.f32 %v2317_v53  ;;  %v2337_v10 = vsel %vm287_vm1, %v2332_v21, 0 }
0x1876   :  { %6362 = vmatpush3.bf16.msra.mxu1 %v2337_v10 }
0x1877   :  { %v6984_v13 = vpop.eup %6983  ;;  %6373 = vmatprep.subr.bf16.mxu1 %v7213_v0 }
0x1878   :  { %v2319_v24 = vsel %vm283_vm2, %v6984_v13, 0.0  ;;  %v2430_v59 = vpop.permute.xlu1 %2429 }
0x1879   :  { %2320 = vadd.xlane.f32.xlu0 %v2319_v24  ;;  %v2435_v39 = vsel %vm438_vm4, %v2430_v59, 0  ;;  %v6851_v59 = vld [vmem:[%s8610_s4 + $0x20] sm:$0xff]  }
0x187c   :  { %v2480_v63 = vpop.permute.xlu1 %2479 }
0x187d   :  { %v2485_v6 = vsel %vm438_vm4, %v2480_v63, 0 }
0x187f   :  { %v6986_v28 = vpop.eup %6985 }
0x1880   :  { %v2322_v41 = vsel %vm283_vm2, %v6986_v28, 0.0  ;;  %v2478_v7 = vpop.permute.xlu1 %2477 }
0x1881   :  { %2323 = vadd.xlane.f32.xlu0 %v2322_v41 }
0x1897   :  { %2379 = vrot.lane.b32.xlu0 %v7748_v48, %s7219_s21 }
0x189b   :  { %2427 = vrot.lane.b32.xlu0 %v7727_v32, %s7221_s25 }
0x1906   :  { %v2321_v54 = vpop.xlane.xlu0 %2320 }
0x1907   :  { %6987 = vrcp.f32 %v2321_v54 }
0x190e   :  { %v2324_v55 = vpop.xlane.xlu0 %2323 }
0x190f   :  { %6989 = vrcp.f32 %v2324_v55 }
0x1911   :  { %v6988_v56 = vpop.eup %6987 }
0x1912   :  { %v2380_v57 = vpop.permute.xlu0 %2379  ;;  %v2327_v58 = vmul.f32 %v6988_v56, %v6984_v13 }
0x1913   :  { %v2385_v60 = vsel %vm287_vm1, %v2380_v57, 0 }
0x1914   :  { %6368 = vmatpush3.bf16.msra.mxu0 %v2385_v60  ;;  %v2329_v61 = vpack.c.bf16 %v2327_v58, %v2327_v58  ;;  %v6852_v60 = vld [vmem:[%s8610_s4 + $0x28] sm:$0xff]  }
0x1915   :  { %6379 = vmatprep.subr.bf16.mxu0 %v7213_v0 }
0x1916   :  { %6364 = vmatmul.mubr.msk.bf16.vlgmr.msra.gmra.mrb[52].mxu1 %vm283_vm2, %v2329_v61  ;;  %v2428_v4 = vpop.permute.xlu0 %2427  ;;  %v6853_v61 = vld [vmem:[%s8610_s4 + $0x30] sm:$0xff]  }
0x1917   :  { %6374 = vmatpush3.bf16.xpose.msra.mxu1 %v2435_v39  ;;  %6375 = vmatprep.mubr.msk.bf16.mxu1 %vm7214_vm0, %v7213_v0  ;;  %v6854_v39 = vld [vmem:[%s8610_s4 + $0x38] sm:$0xff]  }
0x1918   :  { %6385 = vmatprep.subr.bf16.mxu1 %v7213_v0 }
0x1919   :  { %v6990_v32 = vpop.eup %6989 }
0x191a   :  { %v2328_v62 = vmul.f32 %v6990_v32, %v6986_v28 }
0x191c   :  { %v2330_v1 = vpack.c.bf16 %v2328_v62, %v2328_v62 }
0x191e   :  { %6370 = vmatmul.mubr.msk.bf16.vlgmr.msra.gmra.mrb[76].mxu0 %vm283_vm2, %v2330_v1  ;;  %6376 = vmatmul.mubr.msk.bf16.vlgmr.msra.gmra.mrb[56].mxu1 %vm438_vm4, %v2428_v4 }
0x191f   :  { %6380 = vmatpush3.bf16.xpose.msra.mxu0 %v2485_v6  ;;  %6381 = vmatprep.mubr.msk.bf16.mxu0 %vm7214_vm0, %v7213_v0 }
0x1920   :  { %6391 = vmatprep.subr.bf16.mxu0 %v7213_v0  ;;  %6387 = vmatprep.mubr.msk.bf16.mxu1 %vm7214_vm0, %v7213_v0 }
0x1926   :  { %6382 = vmatmul.mubr.msk.bf16.vlgmr.msra.gmra.mrb[80].mxu0 %vm438_vm4, %v2478_v7 }
0x1927   :  { %6393 = vmatprep.mubr.msk.bf16.mxu0 %vm7214_vm0, %v7213_v0 }
0x19e9   :  { %v2373_v8 = vpop.f32.mrb[52].mxu1 }
0x19ea   :  { %v6365_v9 = vpop.f32.mrb[53].mxu1 }
0x19eb   :  { %v2376_v11 = vpop.f32.mrb[54].mxu1 }
0x19ec   :  { %v6366_v15 = vpop.f32.mrb[55].mxu1 }
0x19f1   :  { %v2421_v18 = vpop.f32.mrb[76].mxu0  ;;  %v2471_v25 = vpop.f32.mrb[56].mxu1 }
0x19f2   :  { %v6771_v22 = vpack.i.bf16 %v2421_v18, %v2373_v8  ;;  %v6371_v31 = vpop.f32.mrb[77].mxu0  ;;  %v6377_v36 = vpop.f32.mrb[57].mxu1  ;;  %v2527_v33 = vsel %vm283_vm2, %v2471_v25, -inf }
0x19f3   :  { %2528 = vmax.xlane.f32.xlu0 %v2527_v33  ;;  %v2424_v37 = vpop.f32.mrb[78].mxu0  ;;  %v2474_v40 = vpop.f32.mrb[58].mxu1 }
0x19f4   :  { %v6372_v42 = vpop.f32.mrb[79].mxu0  ;;  %v6378_v43 = vpop.f32.mrb[59].mxu1 }
0x19f9   :  { %v2521_v44 = vpop.f32.mrb[80].mxu0 }
0x19fa   :  { %v6383_v46 = vpop.f32.mrb[81].mxu0  ;;  %v2530_v47 = vsel %vm283_vm2, %v2521_v44, -inf }
0x19fb   :  { %2531 = vmax.xlane.f32.xlu1 %v2530_v47  ;;  %v2524_v49 = vpop.f32.mrb[82].mxu0 }
0x19fc   :  { %v6384_v50 = vpop.f32.mrb[83].mxu0 }
0x1a0c   :  { %2551 = vrot.lane.b32.xlu1 %v7729_v38, %s7221_s25 }
0x1a10   :  { %6767 = vrot.lane.b32.xlu1 %v6766_v23, %s7220_s23 }
0x1a14   :  { %6772 = vrot.lane.b32.xlu1 %v6771_v22, %s7218_s24 }
0x1a80   :  { %v2529_v45 = vpop.xlane.xlu0 %2528 }
0x1a81   :  { %v2533_v51 = vsub.f32 %v2471_v25, %v2529_v45 }
0x1a83   :  { %v2535_v35 = vmul.f32 1.442695, %v2533_v51 }
0x1a85   :  { %6991 = vpow2.f32 %v2535_v35 }
0x1a88   :  { %v2532_v52 = vpop.xlane.xlu1 %2531 }
0x1a89   :  { %v2534_v20 = vsub.f32 %v2521_v44, %v2532_v52 }
0x1a8b   :  { %v2537_v53 = vmul.f32 1.442695, %v2534_v20 }
0x1a8c   :  { %v2552_v21 = vpop.permute.xlu1 %2551 }
0x1a8d   :  { %6993 = vpow2.f32 %v2537_v53  ;;  %v2557_v10 = vsel %vm287_vm1, %v2552_v21, 0 }
0x1a8e   :  { %6386 = vmatpush3.bf16.msra.mxu1 %v2557_v10 }
0x1a8f   :  { %v6992_v38 = vpop.eup %6991  ;;  %6397 = vmatprep.subr.bf16.mxu1 %v7213_v0 }
0x1a90   :  { %v2539_v12 = vsel %vm283_vm2, %v6992_v38, 0.0  ;;  %v6768_v11 = vpop.permute.xlu1 %6767 }
0x1a91   :  { %2540 = vadd.xlane.f32.xlu0 %v2539_v12  ;;  %v6770_v18 = vunpack.i.h.bf16 %v6768_v11  ;;  %v6769_v25 = vunpack.i.l.bf16 %v6768_v11 }
0x1a93   :  { %v2672_v33 = vsel %vm438_vm4, %v7787_v27, %v6770_v18  ;;  %v2671_v37 = vsel %vm438_vm4, %v7785_v19, %v6769_v25  ;;  %v7921_v19 = vld [vmem:[%s8615_s9 + $0x8] sm:$0xff] }
0x1a94   :  { %v6773_v15 = vpop.permute.xlu1 %6772  ;;  %v2681_v27 = vrot.slane %v7921_v19, %v7402_v26 }
0x1a95   :  { %v6775_v22 = vunpack.i.h.bf16 %v6773_v15  ;;  %v6774_v31 = vunpack.i.l.bf16 %v6773_v15 }
0x1a97   :  { %v6994_v30 = vpop.eup %6993  ;;  %v2673_v43 = vsel %vm1338_vm5, %v2671_v37, %v6774_v31  ;;  %v2674_v44 = vsel %vm1338_vm5, %v2672_v33, %v6775_v22  ;;  %v2787_v22 = vrot.slane %v7921_v19, %v7650_v3 }
0x1a98   :  { %v2542_v23 = vsel %vm283_vm2, %v6994_v30, 0.0 }
0x1a99   :  { %2543 = vadd.xlane.f32.xlu0 %v2542_v23 }
0x1aaf   :  { %2599 = vrot.lane.b32.xlu0 %v7748_v48, %s7221_s25 }
0x1b1e   :  { %v2541_v13 = vpop.xlane.xlu0 %2540 }
0x1b1f   :  { %6995 = vrcp.f32 %v2541_v13 }
0x1b26   :  { %v2544_v24 = vpop.xlane.xlu0 %2543 }
0x1b27   :  { %6997 = vrcp.f32 %v2544_v24 }
0x1b29   :  { %v6996_v28 = vpop.eup %6995 }
0x1b2a   :  { %v2600_v41 = vpop.permute.xlu0 %2599  ;;  %v2547_v54 = vmul.f32 %v6996_v28, %v6992_v38 }
0x1b2b   :  { %v2605_v55 = vsel %vm287_vm1, %v2600_v41, 0 }
0x1b2c   :  { %6392 = vmatpush3.bf16.msra.mxu0 %v2605_v55  ;;  %v2549_v56 = vpack.c.bf16 %v2547_v54, %v2547_v54 }
0x1b2d   :  { %6409 = vmatprep.subr.bf16.mxu0 %v7213_v0 }
0x1b2e   :  { %6388 = vmatmul.mubr.msk.bf16.vlgmr.msra.gmra.mrb[60].mxu1 %vm283_vm2, %v2549_v56  ;;  %v6855_v56 = vld [vmem:[#allocation7 + $0x20] sm:$0xff]  }
0x1b2f   :  { %6405 = vmatprep.mubr.msk.bf16.mxu1 %vm7214_vm0, %v7213_v0  ;;  %6398 = vmatpush3.bf16.msra.mxu1 %v6851_v59  ;;  %v6860_v59 = vld [vmem:[%s8612_s6 + $0x48] sm:$0xff]  }
0x1b30   :  { %6399 = vmatprep.subr.bf16.mxu1 %v7213_v0 }
0x1b31   :  { %v6998_v57 = vpop.eup %6997 }
0x1b32   :  { %v2548_v48 = vmul.f32 %v6998_v57, %v6994_v30  ;;  %v6857_v57 = vld [vmem:[#allocation7 + $0x30] sm:$0xff]  }
0x1b33   :  { %6400 = vmatpush3.bf16.msra.mxu1 %v6852_v60  ;;  %v6861_v60 = vld [vmem:[%s8612_s6 + $0x50] sm:$0xff]  }
0x1b34   :  { %v2550_v58 = vpack.c.bf16 %v2548_v48, %v2548_v48  ;;  %6401 = vmatprep.subr.bf16.mxu1 %v7213_v0  ;;  %v6858_v48 = vld [vmem:[#allocation7 + $0x38] sm:$0xff]  }
0x1b36   :  { %6394 = vmatmul.mubr.msk.bf16.vlgmr.msra.gmra.mrb[84].mxu0 %vm283_vm2, %v2550_v58  ;;  %v6859_v58 = vld [vmem:[%s8612_s6 + $0x40] sm:$0xff]  }
0x1b37   :  { %6417 = vmatprep.mubr.msk.bf16.mxu0 %vm7214_vm0, %v7213_v0  ;;  %6402 = vmatpush3.bf16.msra.mxu1 %v6853_v61  ;;  %v6862_v61 = vld [vmem:[%s8612_s6 + $0x58] sm:$0xff]  }
0x1b38   :  { %6403 = vmatprep.subr.bf16.mxu1 %v7213_v0  ;;  %6410 = vmatpush3.bf16.msra.mxu0 %v6855_v56 }
0x1b39   :  { %6411 = vmatprep.subr.bf16.mxu0 %v7213_v0 }
0x1b3b   :  { %6404 = vmatpush3.bf16.msra.mxu1 %v6854_v39  ;;  %v6863_v39 = vld [vmem:[%s8612_s6 + $0x60] sm:$0xff]  }
0x1b3c   :  { %6421 = vmatprep.subr.bf16.mxu1 %v7213_v0 }
0x1c01   :  { %v2593_v32 = vpop.f32.mrb[60].mxu1 }
0x1c02   :  { %v6389_v62 = vpop.f32.mrb[61].mxu1 }
0x1c03   :  { %v2596_v63 = vpop.f32.mrb[62].mxu1 }
0x1c04   :  { %v6390_v1 = vpop.f32.mrb[63].mxu1 }
0x1c09   :  { %v2641_v4 = vpop.f32.mrb[84].mxu0 }
0x1c0a   :  { %v6776_v6 = vpack.i.bf16 %v2641_v4, %v2593_v32  ;;  %v6395_v7 = vpop.f32.mrb[85].mxu0  ;;  %v6864_v32 = vld [vmem:[%s8612_s6 + $0x68] sm:$0xff]  }
0x1c0b   :  { %v2644_v8 = vpop.f32.mrb[86].mxu0 }
0x1c0c   :  { %6777 = vrot.lane.b32.xlu0 %v6776_v6, %s7216_s10  ;;  %v6396_v9 = vpop.f32.mrb[87].mxu0  ;;  %v2781_v8 = vrot.slane %v7921_v19, %v7409_v29 }
0x1c7e   :  { %v6778_v36 = vpop.permute.xlu0 %6777 }
0x1c7f   :  { %v6780_v40 = vunpack.i.h.bf16 %v6778_v36  ;;  %v6779_v42 = vunpack.i.l.bf16 %v6778_v36 }
0x1c81   :  { %v2676_v46 = vsel %vm1341_vm6, %v2674_v44, %v6780_v40  ;;  %v2675_v47 = vsel %vm1341_vm6, %v2673_v43, %v6779_v42  ;;  %v6865_v40 = vld [vmem:[%s8612_s6 + $0x70] sm:$0xff]   ;;  %v6866_v42 = vld [vmem:[%s8612_s6 + $0x78] sm:$0xff]   ;;  %v5836_v43 = vld [vmem:[%s8614_s8 + $0x1] ss:$0 sm:$0xff] }
0x1c82   :  { %v2677_v49 = vpack.c.bf16 %v2676_v46, %v2675_v47 }
0x1c84   :  { %6406 = vmatmul.mubr.msk.bf16.vlgmr.msra.gmra.mrb[64].mxu1 %vm384_vm3, %v2677_v49 }
0x1c85   :  { %6437 = vmatprep.mubr.msk.bf16.mxu1 %vm7214_vm0, %v7213_v0  ;;  %6422 = vmatpush3.bf16.msra.mxu1 %v6859_v58 }
0x1c86   :  { %6423 = vmatprep.subr.bf16.mxu1 %v7213_v0 }
0x1c89   :  { %6424 = vmatpush3.bf16.msra.mxu1 %v6860_v59  ;;  %v6869_v59 = vld [vmem:[%s8609_s3 + $0x84] ss:$8 sps:$4 sm:$0xff]  }
0x1c8a   :  { %6425 = vmatprep.subr.bf16.mxu1 %v7213_v0 }
0x1c8d   :  { %6426 = vmatpush3.bf16.msra.mxu1 %v6861_v60  ;;  %v6867_v60 = vld [vmem:[%s8609_s3 + $0x80] ss:$8 sps:$4 sm:$0xff]  }
0x1c8e   :  { %6427 = vmatprep.subr.bf16.mxu1 %v7213_v0 }
0x1c91   :  { %6428 = vmatpush3.bf16.msra.mxu1 %v6862_v61  ;;  %v6872_v61 = vld [vmem:[%s8609_s3 + $0x94] ss:$8 sps:$4 sm:$0xff]  }
0x1c92   :  { %6429 = vmatprep.subr.bf16.mxu1 %v7213_v0 }
0x1c95   :  { %6430 = vmatpush3.bf16.msra.mxu1 %v6863_v39  ;;  %v6870_v39 = vld [vmem:[%s8609_s3 + $0x90] ss:$8 sps:$4 sm:$0xff]  }
0x1c96   :  { %6431 = vmatprep.subr.bf16.mxu1 %v7213_v0 }
0x1c99   :  { %6432 = vmatpush3.bf16.msra.mxu1 %v6864_v32  ;;  %v6875_v32 = vld [vmem:[%s8609_s3 + $0xa4] ss:$8 sps:$4 sm:$0xff]  }
0x1c9a   :  { %6433 = vmatprep.subr.bf16.mxu1 %v7213_v0 }
0x1c9d   :  { %6434 = vmatpush3.bf16.msra.mxu1 %v6865_v40 }
0x1c9e   :  { %6435 = vmatprep.subr.bf16.mxu1 %v7213_v0 }
0x1ca1   :  { %6436 = vmatpush3.bf16.msra.mxu1 %v6866_v42 }
0x1ca2   :  { %6453 = vmatprep.subr.bf16.mxu1 %v7213_v0 }
0x1d57   :  { %v2743_v50 = vpop.f32.mrb[64].mxu1 }
0x1d58   :  { %v2744_v45 = vadd.f32 %v2743_v50, %v2681_v27  ;;  %v6407_v51 = vpop.f32.mrb[65].mxu1 }
0x1d59   :  { %v2746_v35 = vpop.f32.mrb[66].mxu1 }
0x1d5a   :  { %v2747_v52 = vadd.f32 %v2746_v35, %v2681_v27  ;;  %v6408_v20 = vpop.f32.mrb[67].mxu1  ;;  %v2750_v53 = vadd.f32 %v2744_v45, %v7713_v16 }
0x1d5c   :  { %v2752_v21 = vsel %vm384_vm3, %v2750_v53, 0.0  ;;  %v2751_v10 = vadd.f32 %v2747_v52, %v7715_v17  ;;  %v6856_v17 = vld [vmem:[#allocation7 + $0x28] sm:$0xff]   ;;  %v2871_v52 = vrot.slane %v7921_v19, %v7670_v34 }
0x1d5d   :  { %2753 = vadd.xlane.f32.xlu1 %v2752_v21  ;;  %6412 = vmatpush3.bf16.msra.mxu0 %v6856_v17 }
0x1d5e   :  { %v2755_v38 = vsel %vm384_vm3, %v2751_v10, 0.0  ;;  %6413 = vmatprep.subr.bf16.mxu0 %v7213_v0 }
0x1d5f   :  { %2756 = vadd.xlane.f32.xlu0 %v2755_v38 }
0x1d61   :  { %6414 = vmatpush3.bf16.msra.mxu0 %v6857_v57 }
0x1d62   :  { %6415 = vmatprep.subr.bf16.mxu0 %v7213_v0 }
0x1d65   :  { %6416 = vmatpush3.bf16.msra.mxu0 %v6858_v48 }
0x1d66   :  { %3056 = vmatprep.subr.bf16.mxu0 %v6869_v59 }
0x1dea   :  { %v2754_v12 = vpop.xlane.xlu1 %2753 }
0x1deb   :  { %v2758_v30 = vmul.f32 0.015625, %v2754_v12 }
0x1dec   :  { %v2757_v23 = vpop.xlane.xlu0 %2756 }
0x1ded   :  { %v2760_v13 = vsub.f32 %v2750_v53, %v2758_v30  ;;  %v2759_v24 = vmul.f32 0.015625, %v2757_v23 }
0x1def   :  { %v2761_v28 = vsub.f32 %v2751_v10, %v2759_v24  ;;  %v2762_v41 = vmul.f32 %v2760_v13, %v2760_v13 }
0x1df1   :  { %v2764_v54 = vsel %vm384_vm3, %v2762_v41, 0.0  ;;  %v2763_v55 = vmul.f32 %v2761_v28, %v2761_v28 }
0x1df2   :  { %2765 = vadd.xlane.f32.xlu0 %v2764_v54 }
0x1df3   :  { %v2767_v16 = vsel %vm384_vm3, %v2763_v55, 0.0 }
0x1df4   :  { %2768 = vadd.xlane.f32.xlu1 %v2767_v16 }
0x1e7f   :  { %v2766_v62 = vpop.xlane.xlu0 %2765 }
0x1e80   :  { %v2770_v63 = vmul.f32 0.015625, %v2766_v62  ;;  %v6873_v62 = vld [vmem:[%s8609_s3 + $0xa0] ss:$8 sps:$4 sm:$0xff]  }
0x1e81   :  { %v2769_v1 = vpop.xlane.xlu1 %2768 }
0x1e82   :  { %v2772_v4 = vadd.f32 1e-05, %v2770_v63  ;;  %v2771_v6 = vmul.f32 0.015625, %v2769_v1  ;;  %v6876_v63 = vld [vmem:[%s8609_s3 + $0xb0] ss:$8 sps:$4 sm:$0xff]  }
0x1e83   :  { %v6878_v1 = vld [vmem:[%s8609_s3 + $0xb4] ss:$8 sps:$4 sm:$0xff]  }
0x1e84   :  { %6999 = vrsqrt.f32 %v2772_v4  ;;  %v2773_v7 = vadd.f32 1e-05, %v2771_v6 }
0x1e86   :  { %7001 = vrsqrt.f32 %v2773_v7 }
0x1e8e   :  { %v7000_v9 = vpop.eup %6999 }
0x1e8f   :  { %v2776_v11 = vmul.f32 %v7000_v9, %v2760_v13 }
0x1e90   :  { %v7002_v15 = vpop.eup %7001 }
0x1e91   :  { %v2782_v18 = vmul.f32 %v2781_v8, %v2776_v11  ;;  %v2777_v25 = vmul.f32 %v7002_v15, %v2761_v28  ;;  %v2992_v15 = vrot.slane %v7921_v19, %v7704_v2 }
0x1e93   :  { %v2783_v31 = vmul.f32 %v2781_v8, %v2777_v25  ;;  %v2788_v36 = vadd.f32 %v2787_v22, %v2782_v18 }
0x1e95   :  { %v2789_v33 = vadd.f32 %v2787_v22, %v2783_v31 }
0x1e97   :  { %v2790_v37 = vpack.c.bf16 %v2789_v33, %v2788_v36 }
0x1e99   :  { %6418 = vmatmul.mubr.msk.bf16.vlgmr.msra.gmra.mrb[88].mxu0 %vm384_vm3, %v2790_v37 }
0x1e9a   :  { %3088 = vmatprep.mubr.bf16.mxu0 %v7215_v14  ;;  %3057 = vmatpush1.bf16.msra.mxu0 %v6867_v60 }
0x1e9b   :  { %3058 = vmatprep.subr.bf16.mxu0 %v6872_v61 }
0x1e9e   :  { %3059 = vmatpush1.bf16.msra.mxu0 %v6870_v39 }
0x1e9f   :  { %3060 = vmatprep.subr.bf16.mxu0 %v6875_v32 }
0x1ea2   :  { %3061 = vmatpush1.bf16.msra.mxu0 %v6873_v62 }
0x1ea3   :  { %3062 = vmatprep.subr.bf16.mxu0 %v6878_v1 }
0x1ea6   :  { %3063 = vmatpush1.bf16.msra.mxu0 %v6876_v63 }
0x1ea7   :  { %6441 = vmatprep.subr.bf16.mxu0 %v7213_v0 }
0x1f6c   :  { %v2858_v44 = vpop.f32.mrb[88].mxu0 }
0x1f6d   :  { %v2859_v46 = vadd.f32 %v5836_v43, %v2858_v44  ;;  %v6419_v47 = vpop.f32.mrb[89].mxu0  ;;  %v263_v44 = vld [vmem:[%s8613_s7 + $0x4] sm:$0x3] }
0x1f6e   :  { %v2861_v49 = vpop.f32.mrb[90].mxu0 }
0x1f6f   :  { %v2862_v27 = vadd.f32 %v5836_v43, %v2861_v49  ;;  %v6420_v50 = vpop.f32.mrb[91].mxu0  ;;  %v2865_v45 = vmax.f32 %v2859_v46, 0.0  ;;  %v3006_v46 = vrot.slane %v263_v44, %v7402_v26 }
0x1f71   :  { %v2866_v51 = vmax.f32 %v2862_v27, 0.0 }
0x1f73   :  { %v2867_v35 = vpack.c.bf16 %v2866_v51, %v2865_v45 }
0x1f75   :  { %6438 = vmatmul.mubr.bf16.vlgmr.msra.gmra.mrb[68].mxu1 %v2867_v35 }
0x1f76   :  { %6455 = vmatprep.mubr.msk.bf16.mxu1 %vm7214_vm0, %v7213_v0 }
0x2048   :  { %v2954_v20 = vpop.f32.mrb[68].mxu1 }
0x2049   :  { %v2955_v53 = vadd.f32 %v2954_v20, %v2871_v52  ;;  %v6439_v21 = vpop.f32.mrb[69].mxu1 }
0x204a   :  { %v2957_v10 = vpop.f32.mrb[70].mxu1 }
0x204b   :  { %v2958_v38 = vadd.f32 %v2957_v10, %v2871_v52  ;;  %v6440_v12 = vpop.f32.mrb[71].mxu1  ;;  %v2961_v30 = vadd.f32 %v2955_v53, %v2788_v36 }
0x204d   :  { %v2963_v23 = vsel %vm384_vm3, %v2961_v30, 0.0  ;;  %v2962_v13 = vadd.f32 %v2958_v38, %v2789_v33  ;;  %v2998_v33 = vrot.slane %v7921_v19, %v7709_v5  ;;  %v3010_v19 = vrot.slane %v263_v44, %v7409_v29 }
0x204e   :  { %2964 = vadd.xlane.f32.xlu0 %v2963_v23 }
0x204f   :  { %v2966_v24 = vsel %vm384_vm3, %v2962_v13, 0.0 }
0x2050   :  { %2967 = vadd.xlane.f32.xlu1 %v2966_v24 }
0x20db   :  { %v2965_v28 = vpop.xlane.xlu0 %2964 }
0x20dc   :  { %v2969_v41 = vmul.f32 0.015625, %v2965_v28 }
0x20dd   :  { %v2968_v54 = vpop.xlane.xlu1 %2967 }
0x20de   :  { %v2971_v55 = vsub.f32 %v2961_v30, %v2969_v41  ;;  %v2970_v16 = vmul.f32 0.015625, %v2968_v54 }
0x20e0   :  { %v2972_v56 = vsub.f32 %v2962_v13, %v2970_v16  ;;  %v2973_v17 = vmul.f32 %v2971_v55, %v2971_v55 }
0x20e2   :  { %v2975_v57 = vsel %vm384_vm3, %v2973_v17, 0.0  ;;  %v2974_v48 = vmul.f32 %v2972_v56, %v2972_v56 }
0x20e3   :  { %2976 = vadd.xlane.f32.xlu0 %v2975_v57 }
0x20e4   :  { %v2978_v58 = vsel %vm384_vm3, %v2974_v48, 0.0 }
0x20e5   :  { %2979 = vadd.xlane.f32.xlu1 %v2978_v58 }
0x2170   :  { %v2977_v4 = vpop.xlane.xlu0 %2976 }
0x2171   :  { %v2981_v6 = vmul.f32 0.015625, %v2977_v4 }
0x2172   :  { %v2980_v7 = vpop.xlane.xlu1 %2979 }
0x2173   :  { %v2983_v8 = vadd.f32 1e-05, %v2981_v6  ;;  %v2982_v9 = vmul.f32 0.015625, %v2980_v7 }
0x2175   :  { %7003 = vrsqrt.f32 %v2983_v8  ;;  %v2984_v11 = vadd.f32 1e-05, %v2982_v9 }
0x2177   :  { %7005 = vrsqrt.f32 %v2984_v11 }
0x217f   :  { %v7004_v18 = vpop.eup %7003 }
0x2180   :  { %v2987_v25 = vmul.f32 %v7004_v18, %v2971_v55 }
0x2181   :  { %v7006_v22 = vpop.eup %7005 }
0x2182   :  { %v2993_v31 = vmul.f32 %v2992_v15, %v2987_v25  ;;  %v2988_v36 = vmul.f32 %v7006_v22, %v2972_v56 }
0x2184   :  { %v2994_v37 = vmul.f32 %v2992_v15, %v2988_v36  ;;  %v8012_v40 = vadd.f32 %v2998_v33, %v2993_v31 }
0x2186   :  { %v8014_v42 = vadd.f32 %v2998_v33, %v2994_v37 }
0x2188   :  { %v3001_v43 = vpack.c.bf16 %v8014_v42, %v8012_v40 }
0x218a   :  { %5858 = vmatmul.mubr.msk.bf16.vlgmr.msra.gmra.mrb[92].mxu0 %vm384_vm3, %v3001_v43 }
0x218b   :  { %6443 = vmatprep.mubr.msk.bf16.mxu0 %vm7214_vm0, %v7213_v0 }
0x225d   :  { %v3090_v47 = vpop.f32.mrb[92].mxu0 }
0x225e   :  { %v3091_v49 = vadd.f32 %v3090_v47, %v3006_v46  ;;  %v3092_v27 = vpop.f32.mrb[93].mxu0 }
0x225f   :  { %v3093_v50 = vadd.f32 %v3092_v27, %v3010_v19  ;;  %v3094_v45 = vpop.f32.mrb[94].mxu0 }
0x2260   :  { %v8026_v51 = vpack.c.bf16 %v3091_v49, %v3091_v49  ;;  %v3095_v35 = vadd.f32 %v3094_v45, %v3006_v46  ;;  %v3096_v52 = vpop.f32.mrb[95].mxu0 }
0x2261   :  { %v8028_v20 = vpack.c.bf16 %v3093_v50, %v3093_v50  ;;  %v3097_v53 = vadd.f32 %v3096_v52, %v3010_v19 }
0x2262   :  { %v8030_v21 = vpack.c.bf16 %v3095_v35, %v3095_v35  ;;  %3104 = vrot.lane.b32.xlu0 %v8026_v51, %s7210_s1 }
0x2263   :  { %v3229_v10 = vsel %vm287_vm1, %v8028_v20, 0  ;;  %v8047_v13 = vpack.c.bf16 %v3097_v53, %v3097_v53 }
0x2264   :  { %3153 = vrot.lane.b32.xlu1 %v8030_v21, %s7210_s1  ;;  %6454 = vmatpush3.bf16.msra.mxu1 %v3229_v10 }
0x2265   :  { %6465 = vmatprep.subr.bf16.mxu1 %v7213_v0  ;;  %v3275_v24 = vsel %vm287_vm1, %v8047_v13, 0 }
0x22d4   :  { %v3105_v38 = vpop.permute.xlu0 %3104 }
0x22d5   :  { %v3110_v12 = vsel %vm438_vm4, %v3105_v38, 0 }
0x22d6   :  { %6442 = vmatpush3.bf16.xpose.msra.mxu0 %v3110_v12  ;;  %v3154_v30 = vpop.permute.xlu1 %3153 }
0x22d7   :  { %6447 = vmatprep.subr.bf16.mxu0 %v7213_v0  ;;  %v3159_v23 = vsel %vm438_vm4, %v3154_v30, 0 }
0x22dd   :  { %6444 = vmatmul.mubr.msk.bf16.vlgmr.msra.gmra.mrb[96].mxu0 %vm438_vm4, %v8026_v51 }
0x22de   :  { %6448 = vmatpush3.bf16.xpose.msra.mxu0 %v3159_v23  ;;  %6449 = vmatprep.mubr.msk.bf16.mxu0 %vm7214_vm0, %v7213_v0 }
0x22df   :  { %6459 = vmatprep.subr.bf16.mxu0 %v7213_v0 }
0x22e5   :  { %6450 = vmatmul.mubr.msk.bf16.vlgmr.msra.gmra.mrb[100].mxu0 %vm438_vm4, %v8030_v21 }
0x22e6   :  { %6460 = vmatpush3.bf16.msra.mxu0 %v3275_v24  ;;  %6461 = vmatprep.mubr.msk.bf16.mxu0 %vm7214_vm0, %v7213_v0 }
0x22e7   :  { %6471 = vmatprep.subr.bf16.mxu0 %v7213_v0 }
0x23b0   :  { %v3146_v28 = vpop.f32.mrb[96].mxu0 }
0x23b1   :  { %v6445_v41 = vpop.f32.mrb[97].mxu0  ;;  %v3201_v54 = vsel %vm283_vm2, %v3146_v28, -inf }
0x23b2   :  { %3202 = vmax.xlane.f32.xlu1 %v3201_v54  ;;  %v3149_v55 = vpop.f32.mrb[98].mxu0 }
0x23b3   :  { %v6446_v16 = vpop.f32.mrb[99].mxu0 }
0x23b8   :  { %v3195_v56 = vpop.f32.mrb[100].mxu0 }
0x23b9   :  { %v6451_v17 = vpop.f32.mrb[101].mxu0  ;;  %v3204_v57 = vsel %vm283_vm2, %v3195_v56, -inf }
0x23ba   :  { %3205 = vmax.xlane.f32.xlu0 %v3204_v57  ;;  %v3198_v48 = vpop.f32.mrb[102].mxu0 }
0x23bb   :  { %v6452_v58 = vpop.f32.mrb[103].mxu0 }
0x243f   :  { %v3203_v59 = vpop.xlane.xlu1 %3202 }
0x2440   :  { %v3207_v60 = vsub.f32 %v3146_v28, %v3203_v59 }
0x2442   :  { %v3209_v61 = vmul.f32 1.442695, %v3207_v60 }
0x2444   :  { %7007 = vpow2.f32 %v3209_v61 }
0x2447   :  { %v3206_v39 = vpop.xlane.xlu0 %3205 }
0x2448   :  { %v3208_v32 = vsub.f32 %v3195_v56, %v3206_v39 }
0x244a   :  { %v3211_v62 = vmul.f32 1.442695, %v3208_v32 }
0x244c   :  { %7009 = vpow2.f32 %v3211_v62 }
0x244e   :  { %v7008_v63 = vpop.eup %7007 }
0x244f   :  { %v3213_v1 = vsel %vm283_vm2, %v7008_v63, 0.0 }
0x2450   :  { %3214 = vadd.xlane.f32.xlu0 %v3213_v1 }
0x2456   :  { %v7010_v4 = vpop.eup %7009 }
0x2457   :  { %v3216_v6 = vsel %vm283_vm2, %v7010_v4, 0.0 }
0x2458   :  { %3217 = vadd.xlane.f32.xlu1 %v3216_v6 }
0x2466   :  { %3319 = vrot.lane.b32.xlu0 %v8026_v51, %s7216_s10 }
0x2469   :  { %3369 = vrot.lane.b32.xlu1 %v8030_v21, %s7216_s10 }
0x246a   :  { %3367 = vrot.lane.b32.xlu0 %v8030_v21, %s7217_s20 }
0x246d   :  { %3317 = vrot.lane.b32.xlu1 %v8026_v51, %s7217_s20 }
0x24dd   :  { %v3215_v7 = vpop.xlane.xlu0 %3214 }
0x24de   :  { %7011 = vrcp.f32 %v3215_v7 }
0x24e1   :  { %v3320_v15 = vpop.permute.xlu0 %3319 }
0x24e2   :  { %v3325_v25 = vsel %vm438_vm4, %v3320_v15, 0 }
0x24e5   :  { %v3218_v8 = vpop.xlane.xlu1 %3217  ;;  %v3368_v44 = vpop.permute.xlu0 %3367 }
0x24e6   :  { %7013 = vrcp.f32 %v3218_v8 }
0x24e8   :  { %v7012_v9 = vpop.eup %7011 }
0x24e9   :  { %v3221_v11 = vmul.f32 %v7012_v9, %v7008_v63  ;;  %v3370_v22 = vpop.permute.xlu1 %3369 }
0x24ea   :  { %v3375_v43 = vsel %vm438_vm4, %v3370_v22, 0 }
0x24eb   :  { %v3223_v18 = vpack.c.bf16 %v3221_v11, %v3221_v11 }
0x24ed   :  { %6456 = vmatmul.mubr.msk.bf16.vlgmr.msra.gmra.mrb[72].mxu1 %vm283_vm2, %v3223_v18  ;;  %v3318_v37 = vpop.permute.xlu1 %3317 }
0x24ee   :  { %6466 = vmatpush3.bf16.xpose.msra.mxu1 %v3325_v25  ;;  %6467 = vmatprep.mubr.msk.bf16.mxu1 %vm7214_vm0, %v7213_v0 }
0x24ef   :  { %6477 = vmatprep.subr.bf16.mxu1 %v7213_v0 }
0x24f0   :  { %v7014_v31 = vpop.eup %7013 }
0x24f1   :  { %v3222_v36 = vmul.f32 %v7014_v31, %v7010_v4 }
0x24f3   :  { %v3224_v33 = vpack.c.bf16 %v3222_v36, %v3222_v36 }
0x24f5   :  { %6462 = vmatmul.mubr.msk.bf16.vlgmr.msra.gmra.mrb[104].mxu0 %vm283_vm2, %v3224_v33  ;;  %6468 = vmatmul.mubr.msk.bf16.vlgmr.msra.gmra.mrb[76].mxu1 %vm438_vm4, %v3318_v37 }
0x24f6   :  { %6472 = vmatpush3.bf16.xpose.msra.mxu0 %v3375_v43  ;;  %6473 = vmatprep.mubr.msk.bf16.mxu0 %vm7214_vm0, %v7213_v0 }
0x24f7   :  { %6483 = vmatprep.subr.bf16.mxu0 %v7213_v0  ;;  %6479 = vmatprep.mubr.msk.bf16.mxu1 %vm7214_vm0, %v7213_v0 }
0x24fd   :  { %6474 = vmatmul.mubr.msk.bf16.vlgmr.msra.gmra.mrb[108].mxu0 %vm438_vm4, %v3368_v44 }
0x24fe   :  { %6485 = vmatprep.mubr.msk.bf16.mxu0 %vm7214_vm0, %v7213_v0 }
0x25c0   :  { %v8084_v46 = vpop.f32.mrb[72].mxu1 }
0x25c1   :  { %v6457_v19 = vpop.f32.mrb[73].mxu1 }
0x25c2   :  { %v3268_v47 = vpop.f32.mrb[74].mxu1 }
0x25c3   :  { %v6458_v49 = vpop.f32.mrb[75].mxu1 }
0x25c8   :  { %v8086_v27 = vpop.f32.mrb[104].mxu0  ;;  %v3361_v50 = vpop.f32.mrb[76].mxu1 }
0x25c9   :  { %v6463_v45 = vpop.f32.mrb[105].mxu0  ;;  %v6469_v35 = vpop.f32.mrb[77].mxu1  ;;  %v3417_v52 = vsel %vm283_vm2, %v3361_v50, -inf }
0x25ca   :  { %3418 = vmax.xlane.f32.xlu1 %v3417_v52  ;;  %v3314_v53 = vpop.f32.mrb[106].mxu0  ;;  %v3364_v10 = vpop.f32.mrb[78].mxu1 }
0x25cb   :  { %v6464_v38 = vpop.f32.mrb[107].mxu0  ;;  %v6470_v12 = vpop.f32.mrb[79].mxu1 }
0x25d0   :  { %v3411_v30 = vpop.f32.mrb[108].mxu0 }
0x25d1   :  { %v6475_v23 = vpop.f32.mrb[109].mxu0  ;;  %v3420_v24 = vsel %vm283_vm2, %v3411_v30, -inf }
0x25d2   :  { %3421 = vmax.xlane.f32.xlu0 %v3420_v24  ;;  %v3414_v28 = vpop.f32.mrb[110].mxu0 }
0x25d3   :  { %v6476_v41 = vpop.f32.mrb[111].mxu0 }
0x25db   :  { %3491 = vrot.lane.b32.xlu1 %v8047_v13, %s7217_s20 }
0x25e8   :  { %3442 = vrot.lane.b32.xlu0 %v8028_v20, %s7217_s20 }
0x2657   :  { %v3419_v54 = vpop.xlane.xlu1 %3418 }
0x2658   :  { %v3423_v55 = vsub.f32 %v3361_v50, %v3419_v54 }
0x265a   :  { %v3425_v16 = vmul.f32 1.442695, %v3423_v55 }
0x265b   :  { %v3492_v56 = vpop.permute.xlu1 %3491 }
0x265c   :  { %7015 = vpow2.f32 %v3425_v16  ;;  %v3497_v17 = vsel %vm287_vm1, %v3492_v56, 0 }
0x265d   :  { %6484 = vmatpush3.bf16.msra.mxu0 %v3497_v17 }
0x265e   :  { %6495 = vmatprep.subr.bf16.mxu0 %v7213_v0 }
0x265f   :  { %v3422_v57 = vpop.xlane.xlu0 %3421 }
0x2660   :  { %v3424_v48 = vsub.f32 %v3411_v30, %v3422_v57 }
0x2662   :  { %v3427_v58 = vmul.f32 1.442695, %v3424_v48 }
0x2663   :  { %v3443_v59 = vpop.permute.xlu0 %3442 }
0x2664   :  { %7017 = vpow2.f32 %v3427_v58  ;;  %v3448_v60 = vsel %vm287_vm1, %v3443_v59, 0 }
0x2665   :  { %6478 = vmatpush3.bf16.msra.mxu1 %v3448_v60 }
0x2666   :  { %v7016_v61 = vpop.eup %7015  ;;  %6489 = vmatprep.subr.bf16.mxu1 %v7213_v0 }
0x2667   :  { %v3429_v39 = vsel %vm283_vm2, %v7016_v61, 0.0 }
0x2668   :  { %3430 = vadd.xlane.f32.xlu0 %v3429_v39 }
0x266e   :  { %v7018_v32 = vpop.eup %7017 }
0x266f   :  { %v3432_v62 = vsel %vm283_vm2, %v7018_v32, 0.0 }
0x2670   :  { %3433 = vadd.xlane.f32.xlu1 %v3432_v62 }
0x267e   :  { %3591 = vrot.lane.b32.xlu0 %v8030_v21, %s7218_s24 }
0x2681   :  { %3541 = vrot.lane.b32.xlu1 %v8026_v51, %s7218_s24 }
0x2682   :  { %3589 = vrot.lane.b32.xlu0 %v8030_v21, %s7219_s21 }
0x2685   :  { %3539 = vrot.lane.b32.xlu1 %v8026_v51, %s7219_s21 }
0x26f5   :  { %v3431_v63 = vpop.xlane.xlu0 %3430 }
0x26f6   :  { %7019 = vrcp.f32 %v3431_v63 }
0x26f9   :  { %v3592_v18 = vpop.permute.xlu0 %3591 }
0x26fa   :  { %v3597_v31 = vsel %vm438_vm4, %v3592_v18, 0 }
0x26fd   :  { %v3434_v1 = vpop.xlane.xlu1 %3433  ;;  %v3590_v36 = vpop.permute.xlu0 %3589 }
0x26fe   :  { %7021 = vrcp.f32 %v3434_v1 }
0x2700   :  { %v7020_v4 = vpop.eup %7019 }
0x2701   :  { %v3437_v6 = vmul.f32 %v7020_v4, %v7016_v61  ;;  %v3542_v7 = vpop.permute.xlu1 %3541 }
0x2702   :  { %v3547_v9 = vsel %vm438_vm4, %v3542_v7, 0 }
0x2703   :  { %v3439_v8 = vpack.c.bf16 %v3437_v6, %v3437_v6 }
0x2705   :  { %6480 = vmatmul.mubr.msk.bf16.vlgmr.msra.gmra.mrb[80].mxu1 %vm283_vm2, %v3439_v8  ;;  %v3540_v22 = vpop.permute.xlu1 %3539 }
0x2706   :  { %6490 = vmatpush3.bf16.xpose.msra.mxu1 %v3547_v9  ;;  %6491 = vmatprep.mubr.msk.bf16.mxu1 %vm7214_vm0, %v7213_v0 }
0x2707   :  { %6501 = vmatprep.subr.bf16.mxu1 %v7213_v0 }
0x2708   :  { %v7022_v11 = vpop.eup %7021 }
0x2709   :  { %v3438_v15 = vmul.f32 %v7022_v11, %v7018_v32 }
0x270b   :  { %v3440_v25 = vpack.c.bf16 %v3438_v15, %v3438_v15 }
0x270d   :  { %6486 = vmatmul.mubr.msk.bf16.vlgmr.msra.gmra.mrb[112].mxu0 %vm283_vm2, %v3440_v25  ;;  %6492 = vmatmul.mubr.msk.bf16.vlgmr.msra.gmra.mrb[84].mxu1 %vm438_vm4, %v3540_v22 }
0x270e   :  { %6496 = vmatpush3.bf16.xpose.msra.mxu0 %v3597_v31  ;;  %6497 = vmatprep.mubr.msk.bf16.mxu0 %vm7214_vm0, %v7213_v0 }
0x270f   :  { %6507 = vmatprep.subr.bf16.mxu0 %v7213_v0  ;;  %6503 = vmatprep.mubr.msk.bf16.mxu1 %vm7214_vm0, %v7213_v0 }
0x2715   :  { %6498 = vmatmul.mubr.msk.bf16.vlgmr.msra.gmra.mrb[116].mxu0 %vm438_vm4, %v3590_v36 }
0x2716   :  { %6509 = vmatprep.mubr.msk.bf16.mxu0 %vm7214_vm0, %v7213_v0 }
0x27d8   :  { %v8124_v33 = vpop.f32.mrb[80].mxu1 }
0x27d9   :  { %v6481_v37 = vpop.f32.mrb[81].mxu1 }
0x27da   :  { %v3487_v43 = vpop.f32.mrb[82].mxu1 }
0x27db   :  { %v6482_v44 = vpop.f32.mrb[83].mxu1 }
0x27e0   :  { %v8126_v19 = vpop.f32.mrb[112].mxu0  ;;  %v3583_v47 = vpop.f32.mrb[84].mxu1 }
0x27e1   :  { %v6781_v49 = vpack.i.bf16 %v8126_v19, %v8124_v33  ;;  %v6487_v50 = vpop.f32.mrb[113].mxu0  ;;  %v6493_v45 = vpop.f32.mrb[85].mxu1  ;;  %v3639_v35 = vsel %vm283_vm2, %v3583_v47, -inf }
0x27e2   :  { %3640 = vmax.xlane.f32.xlu1 %v3639_v35  ;;  %v3536_v52 = vpop.f32.mrb[114].mxu0  ;;  %v3586_v53 = vpop.f32.mrb[86].mxu1 }
0x27e3   :  { %v6488_v10 = vpop.f32.mrb[115].mxu0  ;;  %v6494_v38 = vpop.f32.mrb[87].mxu1 }
0x27e8   :  { %v3633_v12 = vpop.f32.mrb[116].mxu0 }
0x27e9   :  { %v6499_v30 = vpop.f32.mrb[117].mxu0  ;;  %v3642_v23 = vsel %vm283_vm2, %v3633_v12, -inf }
0x27ea   :  { %3643 = vmax.xlane.f32.xlu0 %v3642_v23  ;;  %v3636_v24 = vpop.f32.mrb[118].mxu0 }
0x27eb   :  { %v6500_v28 = vpop.f32.mrb[119].mxu0 }
0x27f3   :  { %3711 = vrot.lane.b32.xlu1 %v8047_v13, %s7219_s21 }
0x2800   :  { %3663 = vrot.lane.b32.xlu0 %v8028_v20, %s7219_s21 }
0x286f   :  { %v3641_v41 = vpop.xlane.xlu1 %3640 }
0x2870   :  { %v3645_v54 = vsub.f32 %v3583_v47, %v3641_v41 }
0x2872   :  { %v3647_v55 = vmul.f32 1.442695, %v3645_v54 }
0x2873   :  { %v3712_v16 = vpop.permute.xlu1 %3711 }
0x2874   :  { %7023 = vpow2.f32 %v3647_v55  ;;  %v3717_v56 = vsel %vm287_vm1, %v3712_v16, 0 }
0x2875   :  { %6508 = vmatpush3.bf16.msra.mxu0 %v3717_v56 }
0x2876   :  { %6519 = vmatprep.subr.bf16.mxu0 %v7213_v0 }
0x2877   :  { %v3644_v17 = vpop.xlane.xlu0 %3643 }
0x2878   :  { %v3646_v57 = vsub.f32 %v3633_v12, %v3644_v17 }
0x287a   :  { %v3649_v48 = vmul.f32 1.442695, %v3646_v57 }
0x287b   :  { %v3664_v58 = vpop.permute.xlu0 %3663 }
0x287c   :  { %7025 = vpow2.f32 %v3649_v48  ;;  %v3669_v59 = vsel %vm287_vm1, %v3664_v58, 0 }
0x287d   :  { %6502 = vmatpush3.bf16.msra.mxu1 %v3669_v59 }
0x287e   :  { %v7024_v60 = vpop.eup %7023  ;;  %6513 = vmatprep.subr.bf16.mxu1 %v7213_v0 }
0x287f   :  { %v3651_v61 = vsel %vm283_vm2, %v7024_v60, 0.0 }
0x2880   :  { %3652 = vadd.xlane.f32.xlu0 %v3651_v61 }
0x2886   :  { %v7026_v39 = vpop.eup %7025 }
0x2887   :  { %v3654_v32 = vsel %vm283_vm2, %v7026_v39, 0.0 }
0x2888   :  { %3655 = vadd.xlane.f32.xlu1 %v3654_v32 }
0x2896   :  { %3811 = vrot.lane.b32.xlu0 %v8030_v21, %s7220_s23 }
0x2899   :  { %3761 = vrot.lane.b32.xlu1 %v8026_v51, %s7220_s23 }
0x289a   :  { %3809 = vrot.lane.b32.xlu0 %v8030_v21, %s7221_s25 }
0x289d   :  { %3759 = vrot.lane.b32.xlu1 %v8026_v51, %s7221_s25 }
0x290d   :  { %v3653_v62 = vpop.xlane.xlu0 %3652 }
0x290e   :  { %7027 = vrcp.f32 %v3653_v62 }
0x2911   :  { %v3812_v9 = vpop.permute.xlu0 %3811 }
0x2912   :  { %v3817_v18 = vsel %vm438_vm4, %v3812_v9, 0 }
0x2915   :  { %v3656_v63 = vpop.xlane.xlu1 %3655  ;;  %v3810_v25 = vpop.permute.xlu0 %3809 }
0x2916   :  { %7029 = vrcp.f32 %v3656_v63 }
0x2918   :  { %v7028_v1 = vpop.eup %7027 }
0x2919   :  { %v3659_v4 = vmul.f32 %v7028_v1, %v7024_v60  ;;  %v3762_v6 = vpop.permute.xlu1 %3761 }
0x291a   :  { %v3767_v8 = vsel %vm438_vm4, %v3762_v6, 0  ;;  %v6880_v6 = vld [vmem:[%s8610_s4 + $0x48] sm:$0xff]  }
0x291b   :  { %v3661_v7 = vpack.c.bf16 %v3659_v4, %v3659_v4  ;;  %v6879_v4 = vld [vmem:[%s8610_s4 + $0x40] sm:$0xff]  }
0x291d   :  { %6504 = vmatmul.mubr.msk.bf16.vlgmr.msra.gmra.mrb[88].mxu1 %vm283_vm2, %v3661_v7  ;;  %v3760_v15 = vpop.permute.xlu1 %3759  ;;  %v6881_v7 = vld [vmem:[%s8610_s4 + $0x50] sm:$0xff]  }
0x291e   :  { %6514 = vmatpush3.bf16.xpose.msra.mxu1 %v3767_v8  ;;  %6515 = vmatprep.mubr.msk.bf16.mxu1 %vm7214_vm0, %v7213_v0  ;;  %v6882_v8 = vld [vmem:[%s8610_s4 + $0x58] sm:$0xff]  }
0x291f   :  { %6525 = vmatprep.subr.bf16.mxu1 %v7213_v0 }
0x2920   :  { %v7030_v21 = vpop.eup %7029 }
0x2921   :  { %v3660_v51 = vmul.f32 %v7030_v21, %v7026_v39 }
0x2923   :  { %v3662_v11 = vpack.c.bf16 %v3660_v51, %v3660_v51 }
0x2925   :  { %6510 = vmatmul.mubr.msk.bf16.vlgmr.msra.gmra.mrb[120].mxu0 %vm283_vm2, %v3662_v11  ;;  %6516 = vmatmul.mubr.msk.bf16.vlgmr.msra.gmra.mrb[92].mxu1 %vm438_vm4, %v3760_v15 }
0x2926   :  { %6520 = vmatpush3.bf16.xpose.msra.mxu0 %v3817_v18  ;;  %6521 = vmatprep.mubr.msk.bf16.mxu0 %vm7214_vm0, %v7213_v0 }
0x2927   :  { %6531 = vmatprep.subr.bf16.mxu0 %v7213_v0  ;;  %6527 = vmatprep.mubr.msk.bf16.mxu1 %vm7214_vm0, %v7213_v0 }
0x292d   :  { %6522 = vmatmul.mubr.msk.bf16.vlgmr.msra.gmra.mrb[124].mxu0 %vm438_vm4, %v3810_v25 }
0x292e   :  { %6533 = vmatprep.mubr.msk.bf16.mxu0 %vm7214_vm0, %v7213_v0 }
0x29f0   :  { %v3705_v22 = vpop.f32.mrb[88].mxu1 }
0x29f1   :  { %v6505_v31 = vpop.f32.mrb[89].mxu1 }
0x29f2   :  { %v3708_v36 = vpop.f32.mrb[90].mxu1 }
0x29f3   :  { %v6506_v37 = vpop.f32.mrb[91].mxu1 }
0x29f8   :  { %v3753_v43 = vpop.f32.mrb[120].mxu0  ;;  %v3803_v44 = vpop.f32.mrb[92].mxu1 }
0x29f9   :  { %v6786_v47 = vpack.i.bf16 %v3753_v43, %v3705_v22  ;;  %v6511_v50 = vpop.f32.mrb[121].mxu0  ;;  %v6517_v45 = vpop.f32.mrb[93].mxu1  ;;  %v3859_v35 = vsel %vm283_vm2, %v3803_v44, -inf }
0x29fa   :  { %3860 = vmax.xlane.f32.xlu1 %v3859_v35  ;;  %v3756_v52 = vpop.f32.mrb[122].mxu0  ;;  %v3806_v53 = vpop.f32.mrb[94].mxu1 }
0x29fb   :  { %v6512_v10 = vpop.f32.mrb[123].mxu0  ;;  %v6518_v38 = vpop.f32.mrb[95].mxu1 }
0x2a00   :  { %v3853_v12 = vpop.f32.mrb[124].mxu0 }
0x2a01   :  { %v6523_v30 = vpop.f32.mrb[125].mxu0  ;;  %v3862_v23 = vsel %vm283_vm2, %v3853_v12, -inf }
0x2a02   :  { %3863 = vmax.xlane.f32.xlu0 %v3862_v23  ;;  %v3856_v24 = vpop.f32.mrb[126].mxu0 }
0x2a03   :  { %v6524_v28 = vpop.f32.mrb[127].mxu0 }
0x2a87   :  { %v3861_v41 = vpop.xlane.xlu1 %3860 }
0x2a88   :  { %v3865_v54 = vsub.f32 %v3803_v44, %v3861_v41 }
0x2a8a   :  { %v3867_v55 = vmul.f32 1.442695, %v3865_v54 }
0x2a8c   :  { %7031 = vpow2.f32 %v3867_v55 }
0x2a8f   :  { %v3864_v16 = vpop.xlane.xlu0 %3863 }
0x2a90   :  { %v3866_v56 = vsub.f32 %v3853_v12, %v3864_v16 }
0x2a92   :  { %v3869_v17 = vmul.f32 1.442695, %v3866_v56 }
0x2a94   :  { %7033 = vpow2.f32 %v3869_v17 }
0x2a96   :  { %v7032_v57 = vpop.eup %7031 }
0x2a97   :  { %v3871_v48 = vsel %vm283_vm2, %v7032_v57, 0.0 }
0x2a98   :  { %3872 = vadd.xlane.f32.xlu0 %v3871_v48 }
0x2a9e   :  { %v7034_v58 = vpop.eup %7033 }
0x2a9f   :  { %v3874_v59 = vsel %vm283_vm2, %v7034_v58, 0.0 }
0x2aa0   :  { %3875 = vadd.xlane.f32.xlu1 %v3874_v59 }
0x2aae   :  { %3883 = vrot.lane.b32.xlu0 %v8028_v20, %s7221_s25 }
0x2ab1   :  { %3931 = vrot.lane.b32.xlu1 %v8047_v13, %s7221_s25 }
0x2ab2   :  { %6787 = vrot.lane.b32.xlu0 %v6786_v47, %s7218_s24 }
0x2ab5   :  { %6782 = vrot.lane.b32.xlu1 %v6781_v49, %s7220_s23 }
0x2b25   :  { %v3873_v60 = vpop.xlane.xlu0 %3872 }
0x2b26   :  { %7035 = vrcp.f32 %v3873_v60 }
0x2b29   :  { %v3884_v61 = vpop.permute.xlu0 %3883 }
0x2b2a   :  { %v3889_v39 = vsel %vm287_vm1, %v3884_v61, 0 }
0x2b2b   :  { %6526 = vmatpush3.bf16.msra.mxu1 %v3889_v39 }
0x2b2c   :  { %6537 = vmatprep.subr.bf16.mxu1 %v7213_v0 }
0x2b2d   :  { %v3876_v32 = vpop.xlane.xlu1 %3875  ;;  %v6788_v44 = vpop.permute.xlu0 %6787 }
0x2b2e   :  { %7037 = vrcp.f32 %v3876_v32  ;;  %v6790_v45 = vunpack.i.h.bf16 %v6788_v44  ;;  %v6789_v35 = vunpack.i.l.bf16 %v6788_v44 }
0x2b30   :  { %v7036_v20 = vpop.eup %7035 }
0x2b31   :  { %v3879_v62 = vmul.f32 %v7036_v20, %v7032_v57  ;;  %v3932_v13 = vpop.permute.xlu1 %3931 }
0x2b32   :  { %v3937_v63 = vsel %vm287_vm1, %v3932_v13, 0 }
0x2b33   :  { %6532 = vmatpush3.bf16.msra.mxu0 %v3937_v63  ;;  %v3881_v1 = vpack.c.bf16 %v3879_v62, %v3879_v62 }
0x2b34   :  { %6549 = vmatprep.subr.bf16.mxu0 %v7213_v0 }
0x2b35   :  { %6528 = vmatmul.mubr.msk.bf16.vlgmr.msra.gmra.mrb[96].mxu1 %vm283_vm2, %v3881_v1  ;;  %v6783_v36 = vpop.permute.xlu1 %6782  ;;  %v6884_v1 = vld [vmem:[#allocation7 + $0x48] sm:$0xff]  }
0x2b36   :  { %6545 = vmatprep.mubr.msk.bf16.mxu1 %vm7214_vm0, %v7213_v0  ;;  %6538 = vmatpush3.bf16.msra.mxu1 %v6879_v4  ;;  %v6785_v37 = vunpack.i.h.bf16 %v6783_v36  ;;  %v6784_v43 = vunpack.i.l.bf16 %v6783_v36  ;;  %v6888_v4 = vld [vmem:[%s8612_s6 + $0x88] sm:$0xff]  }
0x2b37   :  { %6539 = vmatprep.subr.bf16.mxu1 %v7213_v0 }
0x2b38   :  { %v7038_v33 = vpop.eup %7037  ;;  %v4004_v47 = vsel %vm438_vm4, %v8086_v27, %v6785_v37  ;;  %v4003_v50 = vsel %vm438_vm4, %v8084_v46, %v6784_v43  ;;  %v8220_v46 = vld [vmem:[%s8615_s9 + $0x10] sm:$0xff] }
0x2b39   :  { %v3880_v19 = vmul.f32 %v7038_v33, %v7034_v58  ;;  %v4005_v38 = vsel %vm1338_vm5, %v4003_v50, %v6789_v35  ;;  %v4006_v12 = vsel %vm1338_vm5, %v4004_v47, %v6790_v45  ;;  %v4013_v27 = vrot.slane %v8220_v46, %v7402_v26  ;;  %v6885_v33 = vld [vmem:[#allocation7 + $0x50] sm:$0xff]  }
0x2b3a   :  { %6540 = vmatpush3.bf16.msra.mxu1 %v6880_v6  ;;  %v6889_v6 = vld [vmem:[%s8612_s6 + $0x90] sm:$0xff]   ;;  %v4119_v47 = vrot.slane %v8220_v46, %v7650_v3 }
0x2b3b   :  { %v3882_v49 = vpack.c.bf16 %v3880_v19, %v3880_v19  ;;  %6541 = vmatprep.subr.bf16.mxu1 %v7213_v0  ;;  %v6886_v19 = vld [vmem:[#allocation7 + $0x58] sm:$0xff]  }
0x2b3d   :  { %6534 = vmatmul.mubr.msk.bf16.vlgmr.msra.gmra.mrb[128].mxu0 %vm283_vm2, %v3882_v49  ;;  %v6887_v49 = vld [vmem:[%s8612_s6 + $0x80] sm:$0xff]  }
0x2b3e   :  { %6557 = vmatprep.mubr.msk.bf16.mxu0 %vm7214_vm0, %v7213_v0  ;;  %6542 = vmatpush3.bf16.msra.mxu1 %v6881_v7  ;;  %v6890_v7 = vld [vmem:[%s8612_s6 + $0x98] sm:$0xff]  }
0x2b3f   :  { %6543 = vmatprep.subr.bf16.mxu1 %v7213_v0 }
0x2b42   :  { %6544 = vmatpush3.bf16.msra.mxu1 %v6882_v8  ;;  %v6891_v8 = vld [vmem:[%s8612_s6 + $0xa0] sm:$0xff]  }
0x2b43   :  { %6561 = vmatprep.subr.bf16.mxu1 %v7213_v0 }
0x2c08   :  { %v3925_v21 = vpop.f32.mrb[96].mxu1 }
0x2c09   :  { %v6529_v51 = vpop.f32.mrb[97].mxu1 }
0x2c0a   :  { %v3928_v9 = vpop.f32.mrb[98].mxu1 }
0x2c0b   :  { %v6530_v11 = vpop.f32.mrb[99].mxu1 }
0x2c10   :  { %v3973_v15 = vpop.f32.mrb[128].mxu0 }
0x2c11   :  { %v6791_v18 = vpack.i.bf16 %v3973_v15, %v3925_v21  ;;  %v6535_v25 = vpop.f32.mrb[129].mxu0  ;;  %v6892_v21 = vld [vmem:[%s8612_s6 + $0xa8] sm:$0xff]  }
0x2c12   :  { %v3976_v22 = vpop.f32.mrb[130].mxu0 }
0x2c13   :  { %6792 = vrot.lane.b32.xlu1 %v6791_v18, %s7216_s10  ;;  %v6536_v31 = vpop.f32.mrb[131].mxu0 }
0x2c14   :  { %v4113_v31 = vrot.slane %v8220_v46, %v7409_v29 }
0x2c85   :  { %v6793_v52 = vpop.permute.xlu1 %6792 }
0x2c86   :  { %v6795_v53 = vunpack.i.h.bf16 %v6793_v52  ;;  %v6794_v10 = vunpack.i.l.bf16 %v6793_v52 }
0x2c88   :  { %v4008_v30 = vsel %vm1341_vm6, %v4006_v12, %v6795_v53  ;;  %v4007_v23 = vsel %vm1341_vm6, %v4005_v38, %v6794_v10  ;;  %v6893_v53 = vld [vmem:[%s8612_s6 + $0xb0] sm:$0xff]   ;;  %v6894_v10 = vld [vmem:[%s8612_s6 + $0xb8] sm:$0xff]   ;;  %v5880_v38 = vld [vmem:[%s8614_s8 + $0x2] ss:$0 sm:$0xff] }
0x2c89   :  { %v4009_v24 = vpack.c.bf16 %v4008_v30, %v4007_v23 }
0x2c8b   :  { %6546 = vmatmul.mubr.msk.bf16.vlgmr.msra.gmra.mrb[100].mxu1 %vm384_vm3, %v4009_v24 }
0x2c8c   :  { %6577 = vmatprep.mubr.msk.bf16.mxu1 %vm7214_vm0, %v7213_v0  ;;  %6562 = vmatpush3.bf16.msra.mxu1 %v6887_v49  ;;  %v6897_v49 = vld [vmem:[%s8609_s3 + $0xc4] ss:$8 sps:$4 sm:$0xff]  }
0x2c8d   :  { %6563 = vmatprep.subr.bf16.mxu1 %v7213_v0 }
0x2c90   :  { %6564 = vmatpush3.bf16.msra.mxu1 %v6888_v4  ;;  %v6895_v4 = vld [vmem:[%s8609_s3 + $0xc0] ss:$8 sps:$4 sm:$0xff]  }
0x2c91   :  { %6565 = vmatprep.subr.bf16.mxu1 %v7213_v0 }
0x2c94   :  { %6566 = vmatpush3.bf16.msra.mxu1 %v6889_v6  ;;  %v6900_v6 = vld [vmem:[%s8609_s3 + $0xd4] ss:$8 sps:$4 sm:$0xff]  }
0x2c95   :  { %6567 = vmatprep.subr.bf16.mxu1 %v7213_v0 }
0x2c98   :  { %6568 = vmatpush3.bf16.msra.mxu1 %v6890_v7  ;;  %v6898_v7 = vld [vmem:[%s8609_s3 + $0xd0] ss:$8 sps:$4 sm:$0xff]  }
0x2c99   :  { %6569 = vmatprep.subr.bf16.mxu1 %v7213_v0 }
0x2c9c   :  { %6570 = vmatpush3.bf16.msra.mxu1 %v6891_v8  ;;  %v6903_v8 = vld [vmem:[%s8609_s3 + $0xe4] ss:$8 sps:$4 sm:$0xff]  }
0x2c9d   :  { %6571 = vmatprep.subr.bf16.mxu1 %v7213_v0 }
0x2ca0   :  { %6572 = vmatpush3.bf16.msra.mxu1 %v6892_v21  ;;  %v6901_v21 = vld [vmem:[%s8609_s3 + $0xe0] ss:$8 sps:$4 sm:$0xff]  }
0x2ca1   :  { %6573 = vmatprep.subr.bf16.mxu1 %v7213_v0 }
0x2ca4   :  { %6574 = vmatpush3.bf16.msra.mxu1 %v6893_v53 }
0x2ca5   :  { %6575 = vmatprep.subr.bf16.mxu1 %v7213_v0 }
0x2ca8   :  { %6576 = vmatpush3.bf16.msra.mxu1 %v6894_v10 }
0x2ca9   :  { %6593 = vmatprep.subr.bf16.mxu1 %v7213_v0 }
0x2d5e   :  { %v4075_v28 = vpop.f32.mrb[100].mxu1 }
0x2d5f   :  { %v4076_v41 = vadd.f32 %v4075_v28, %v4013_v27  ;;  %v6547_v54 = vpop.f32.mrb[101].mxu1 }
0x2d60   :  { %v4078_v55 = vpop.f32.mrb[102].mxu1 }
0x2d61   :  { %v4082_v16 = vadd.f32 %v4076_v41, %v8012_v40  ;;  %v4079_v56 = vadd.f32 %v4078_v55, %v4013_v27  ;;  %v6548_v17 = vpop.f32.mrb[103].mxu1  ;;  %v4203_v55 = vrot.slane %v8220_v46, %v7670_v34 }
0x2d63   :  { %v4083_v57 = vadd.f32 %v4079_v56, %v8014_v42  ;;  %v4084_v48 = vsel %vm384_vm3, %v4082_v16, 0.0  ;;  %v6883_v42 = vld [vmem:[#allocation7 + $0x40] sm:$0xff]  }
0x2d64   :  { %4085 = vadd.xlane.f32.xlu0 %v4084_v48  ;;  %6550 = vmatpush3.bf16.msra.mxu0 %v6883_v42 }
0x2d65   :  { %v4087_v58 = vsel %vm384_vm3, %v4083_v57, 0.0  ;;  %6551 = vmatprep.subr.bf16.mxu0 %v7213_v0 }
0x2d66   :  { %4088 = vadd.xlane.f32.xlu1 %v4087_v58 }
0x2d68   :  { %6552 = vmatpush3.bf16.msra.mxu0 %v6884_v1 }
0x2d69   :  { %6553 = vmatprep.subr.bf16.mxu0 %v7213_v0 }
0x2d6c   :  { %6554 = vmatpush3.bf16.msra.mxu0 %v6885_v33 }
0x2d6d   :  { %6555 = vmatprep.subr.bf16.mxu0 %v7213_v0 }
0x2d70   :  { %6556 = vmatpush3.bf16.msra.mxu0 %v6886_v19 }
0x2d71   :  { %4388 = vmatprep.subr.bf16.mxu0 %v6897_v49 }
0x2df1   :  { %v4086_v59 = vpop.xlane.xlu0 %4085 }
0x2df2   :  { %v4090_v60 = vmul.f32 0.015625, %v4086_v59 }
0x2df3   :  { %v4089_v61 = vpop.xlane.xlu1 %4088 }
0x2df4   :  { %v4092_v39 = vsub.f32 %v4082_v16, %v4090_v60  ;;  %v4091_v32 = vmul.f32 0.015625, %v4089_v61 }
0x2df6   :  { %v4093_v20 = vsub.f32 %v4083_v57, %v4091_v32  ;;  %v4094_v62 = vmul.f32 %v4092_v39, %v4092_v39 }
0x2df8   :  { %v4096_v13 = vsel %vm384_vm3, %v4094_v62, 0.0  ;;  %v4095_v40 = vmul.f32 %v4093_v20, %v4093_v20 }
0x2df9   :  { %4097 = vadd.xlane.f32.xlu0 %v4096_v13 }
0x2dfa   :  { %v4099_v63 = vsel %vm384_vm3, %v4095_v40, 0.0 }
0x2dfd   :  { %4100 = vadd.xlane.f32.xlu0 %v4099_v63 }
0x2e86   :  { %v4098_v51 = vpop.xlane.xlu0 %4097 }
0x2e87   :  { %v4102_v9 = vmul.f32 0.015625, %v4098_v51  ;;  %v6904_v51 = vld [vmem:[%s8609_s3 + $0xf0] ss:$8 sps:$4 sm:$0xff]  }
0x2e89   :  { %v4104_v11 = vadd.f32 1e-05, %v4102_v9  ;;  %v6906_v9 = vld [vmem:[%s8609_s3 + $0xf4] ss:$8 sps:$4 sm:$0xff]  }
0x2e8a   :  { %v4101_v15 = vpop.xlane.xlu0 %4100 }
0x2e8b   :  { %7039 = vrsqrt.f32 %v4104_v11  ;;  %v4103_v18 = vmul.f32 0.015625, %v4101_v15 }
0x2e8d   :  { %v4105_v25 = vadd.f32 1e-05, %v4103_v18 }
0x2e8f   :  { %7041 = vrsqrt.f32 %v4105_v25 }
0x2e95   :  { %v7040_v22 = vpop.eup %7039 }
0x2e96   :  { %v4108_v36 = vmul.f32 %v7040_v22, %v4092_v39 }
0x2e98   :  { %v4114_v43 = vmul.f32 %v4113_v31, %v4108_v36  ;;  %v4324_v36 = vrot.slane %v8220_v46, %v7704_v2 }
0x2e99   :  { %v7042_v37 = vpop.eup %7041 }
0x2e9a   :  { %v4109_v44 = vmul.f32 %v7042_v37, %v4093_v20  ;;  %v4120_v45 = vadd.f32 %v4119_v47, %v4114_v43 }
0x2e9c   :  { %v4115_v50 = vmul.f32 %v4113_v31, %v4109_v44 }
0x2e9e   :  { %v4121_v35 = vadd.f32 %v4119_v47, %v4115_v50 }
0x2ea0   :  { %v4122_v52 = vpack.c.bf16 %v4121_v35, %v4120_v45 }
0x2ea2   :  { %6558 = vmatmul.mubr.msk.bf16.vlgmr.msra.gmra.mrb[132].mxu0 %vm384_vm3, %v4122_v52 }
0x2ea3   :  { %4420 = vmatprep.mubr.bf16.mxu0 %v7215_v14  ;;  %4389 = vmatpush1.bf16.msra.mxu0 %v6895_v4 }
0x2ea4   :  { %4390 = vmatprep.subr.bf16.mxu0 %v6900_v6 }
0x2ea7   :  { %4391 = vmatpush1.bf16.msra.mxu0 %v6898_v7 }
0x2ea8   :  { %4392 = vmatprep.subr.bf16.mxu0 %v6903_v8 }
0x2eab   :  { %4393 = vmatpush1.bf16.msra.mxu0 %v6901_v21 }
0x2eac   :  { %4394 = vmatprep.subr.bf16.mxu0 %v6906_v9 }
0x2eaf   :  { %4395 = vmatpush1.bf16.msra.mxu0 %v6904_v51 }
0x2eb0   :  { %6581 = vmatprep.subr.bf16.mxu0 %v7213_v0 }
0x2f75   :  { %v4190_v12 = vpop.f32.mrb[132].mxu0 }
0x2f76   :  { %v4191_v14 = vadd.f32 %v5880_v38, %v4190_v12  ;;  %v6559_v30 = vpop.f32.mrb[133].mxu0 }
0x2f77   :  { %v4193_v23 = vpop.f32.mrb[134].mxu0 }
0x2f78   :  { %v4194_v24 = vadd.f32 %v5880_v38, %v4193_v23  ;;  %v6560_v27 = vpop.f32.mrb[135].mxu0  ;;  %v4197_v28 = vmax.f32 %v4191_v14, 0.0  ;;  %v264_v38 = vld [vmem:[%s8613_s7 + $0x6] sm:$0x3] }
0x2f79   :  { %v4338_v12 = vrot.slane %v264_v38, %v7402_v26 }
0x2f7a   :  { %v4198_v41 = vmax.f32 %v4194_v24, 0.0 }
0x2f7c   :  { %v4199_v54 = vpack.c.bf16 %v4198_v41, %v4197_v28 }
0x2f7e   :  { %6578 = vmatmul.mubr.bf16.vlgmr.msra.gmra.mrb[104].mxu1 %v4199_v54 }
0x2f7f   :  { %6595 = vmatprep.mubr.msk.bf16.mxu1 %vm7214_vm0, %v7213_v0 }
0x3051   :  { %v4286_v16 = vpop.f32.mrb[104].mxu1 }
0x3052   :  { %v4287_v56 = vadd.f32 %v4286_v16, %v4203_v55  ;;  %v6579_v17 = vpop.f32.mrb[105].mxu1 }
0x3053   :  { %v4289_v57 = vpop.f32.mrb[106].mxu1 }
0x3054   :  { %v4293_v48 = vadd.f32 %v4287_v56, %v4120_v45  ;;  %v4290_v58 = vadd.f32 %v4289_v57, %v4203_v55  ;;  %v6580_v59 = vpop.f32.mrb[107].mxu1  ;;  %v4330_v45 = vrot.slane %v8220_v46, %v7709_v5  ;;  %v4342_v46 = vrot.slane %v264_v38, %v7409_v29 }
0x3056   :  { %v4294_v60 = vadd.f32 %v4290_v58, %v4121_v35  ;;  %v4295_v61 = vsel %vm384_vm3, %v4293_v48, 0.0 }
0x3057   :  { %4296 = vadd.xlane.f32.xlu1 %v4295_v61 }
0x3058   :  { %v4298_v39 = vsel %vm384_vm3, %v4294_v60, 0.0 }
0x3059   :  { %4299 = vadd.xlane.f32.xlu0 %v4298_v39 }
0x30e4   :  { %v4297_v32 = vpop.xlane.xlu1 %4296 }
0x30e5   :  { %v4301_v20 = vmul.f32 0.015625, %v4297_v32 }
0x30e6   :  { %v4300_v62 = vpop.xlane.xlu0 %4299 }
0x30e7   :  { %v4303_v13 = vsub.f32 %v4293_v48, %v4301_v20  ;;  %v4302_v40 = vmul.f32 0.015625, %v4300_v62 }
0x30e9   :  { %v4304_v63 = vsub.f32 %v4294_v60, %v4302_v40  ;;  %v4305_v42 = vmul.f32 %v4303_v13, %v4303_v13 }
0x30eb   :  { %v4307_v1 = vsel %vm384_vm3, %v4305_v42, 0.0  ;;  %v4306_v33 = vmul.f32 %v4304_v63, %v4304_v63 }
0x30ec   :  { %4308 = vadd.xlane.f32.xlu1 %v4307_v1 }
0x30ed   :  { %v4310_v19 = vsel %vm384_vm3, %v4306_v33, 0.0 }
0x30ee   :  { %4311 = vadd.xlane.f32.xlu0 %v4310_v19 }
0x3179   :  { %v4309_v11 = vpop.xlane.xlu1 %4308 }
0x317a   :  { %v4313_v15 = vmul.f32 0.015625, %v4309_v11 }
0x317b   :  { %v4312_v18 = vpop.xlane.xlu0 %4311 }
0x317c   :  { %v4315_v25 = vadd.f32 1e-05, %v4313_v15  ;;  %v4314_v22 = vmul.f32 0.015625, %v4312_v18 }
0x317e   :  { %7043 = vrsqrt.f32 %v4315_v25  ;;  %v4316_v31 = vadd.f32 1e-05, %v4314_v22 }
0x3180   :  { %7045 = vrsqrt.f32 %v4316_v31 }
0x3188   :  { %v7044_v37 = vpop.eup %7043 }
0x3189   :  { %v4319_v43 = vmul.f32 %v7044_v37, %v4303_v13 }
0x318a   :  { %v7046_v44 = vpop.eup %7045 }
0x318b   :  { %v4325_v47 = vmul.f32 %v4324_v36, %v4319_v43  ;;  %v4320_v50 = vmul.f32 %v7046_v44, %v4304_v63 }
0x318d   :  { %v4326_v35 = vmul.f32 %v4324_v36, %v4320_v50  ;;  %v8311_v52 = vadd.f32 %v4330_v45, %v4325_v47 }
0x318f   :  { %v8313_v53 = vadd.f32 %v4330_v45, %v4326_v35 }
0x3191   :  { %v4333_v10 = vpack.c.bf16 %v8313_v53, %v8311_v52 }
0x3193   :  { %5902 = vmatmul.mubr.msk.bf16.vlgmr.msra.gmra.mrb[136].mxu0 %vm384_vm3, %v4333_v10 }
0x3194   :  { %6583 = vmatprep.mubr.msk.bf16.mxu0 %vm7214_vm0, %v7213_v0 }
0x3266   :  { %v4422_v14 = vpop.f32.mrb[136].mxu0 }
0x3267   :  { %v4423_v30 = vadd.f32 %v4422_v14, %v4338_v12  ;;  %v4424_v23 = vpop.f32.mrb[137].mxu0 }
0x3268   :  { %v4425_v24 = vadd.f32 %v4424_v23, %v4342_v46  ;;  %v4426_v27 = vpop.f32.mrb[138].mxu0 }
0x3269   :  { %v8325_v28 = vpack.c.bf16 %v4423_v30, %v4423_v30  ;;  %v4427_v41 = vadd.f32 %v4426_v27, %v4338_v12  ;;  %v4428_v54 = vpop.f32.mrb[139].mxu0 }
0x326a   :  { %v8327_v55 = vpack.c.bf16 %v4425_v24, %v4425_v24  ;;  %v4429_v16 = vadd.f32 %v4428_v54, %v4342_v46 }
0x326b   :  { %v8329_v56 = vpack.c.bf16 %v4427_v41, %v4427_v41  ;;  %4436 = vrot.lane.b32.xlu1 %v8325_v28, %s7210_s1 }
0x326c   :  { %v4561_v17 = vsel %vm287_vm1, %v8327_v55, 0  ;;  %v8346_v60 = vpack.c.bf16 %v4429_v16, %v4429_v16 }
0x326d   :  { %4485 = vrot.lane.b32.xlu0 %v8329_v56, %s7210_s1  ;;  %6594 = vmatpush3.bf16.msra.mxu1 %v4561_v17 }
0x326e   :  { %6605 = vmatprep.subr.bf16.mxu1 %v7213_v0  ;;  %v4607_v61 = vsel %vm287_vm1, %v8346_v60, 0 }
0x32dd   :  { %v4437_v57 = vpop.permute.xlu1 %4436 }
0x32de   :  { %v4442_v48 = vsel %vm438_vm4, %v4437_v57, 0 }
0x32df   :  { %6582 = vmatpush3.bf16.xpose.msra.mxu0 %v4442_v48  ;;  %v4486_v58 = vpop.permute.xlu0 %4485 }
0x32e0   :  { %6587 = vmatprep.subr.bf16.mxu0 %v7213_v0  ;;  %v4491_v59 = vsel %vm438_vm4, %v4486_v58, 0 }
0x32e6   :  { %6584 = vmatmul.mubr.msk.bf16.vlgmr.msra.gmra.mrb[140].mxu0 %vm438_vm4, %v8325_v28 }
0x32e7   :  { %6588 = vmatpush3.bf16.xpose.msra.mxu0 %v4491_v59  ;;  %6589 = vmatprep.mubr.msk.bf16.mxu0 %vm7214_vm0, %v7213_v0 }
0x32e8   :  { %6599 = vmatprep.subr.bf16.mxu0 %v7213_v0 }
0x32ee   :  { %6590 = vmatmul.mubr.msk.bf16.vlgmr.msra.gmra.mrb[144].mxu0 %vm438_vm4, %v8329_v56 }
0x32ef   :  { %6600 = vmatpush3.bf16.msra.mxu0 %v4607_v61  ;;  %6601 = vmatprep.mubr.msk.bf16.mxu0 %vm7214_vm0, %v7213_v0 }
0x32f0   :  { %6611 = vmatprep.subr.bf16.mxu0 %v7213_v0 }
0x33b9   :  { %v4478_v39 = vpop.f32.mrb[140].mxu0 }
0x33ba   :  { %v6585_v32 = vpop.f32.mrb[141].mxu0  ;;  %v4533_v20 = vsel %vm283_vm2, %v4478_v39, -inf }
0x33bb   :  { %4534 = vmax.xlane.f32.xlu1 %v4533_v20  ;;  %v4481_v62 = vpop.f32.mrb[142].mxu0 }
0x33bc   :  { %v6586_v13 = vpop.f32.mrb[143].mxu0 }
0x33c1   :  { %v4527_v40 = vpop.f32.mrb[144].mxu0 }
0x33c2   :  { %v6591_v63 = vpop.f32.mrb[145].mxu0  ;;  %v4536_v42 = vsel %vm283_vm2, %v4527_v40, -inf }
0x33c3   :  { %4537 = vmax.xlane.f32.xlu0 %v4536_v42  ;;  %v4530_v1 = vpop.f32.mrb[146].mxu0 }
0x33c4   :  { %v6592_v33 = vpop.f32.mrb[147].mxu0 }
0x33cc   :  { %4651 = vrot.lane.b32.xlu1 %v8325_v28, %s7216_s10 }
0x3448   :  { %v4535_v19 = vpop.xlane.xlu1 %4534 }
0x3449   :  { %v4539_v49 = vsub.f32 %v4478_v39, %v4535_v19 }
0x344b   :  { %v4541_v4 = vmul.f32 1.442695, %v4539_v49 }
0x344c   :  { %v4652_v15 = vpop.permute.xlu1 %4651 }
0x344d   :  { %7047 = vpow2.f32 %v4541_v4  ;;  %v4657_v37 = vsel %vm438_vm4, %v4652_v15, 0 }
0x3450   :  { %v4538_v6 = vpop.xlane.xlu0 %4537 }
0x3451   :  { %v4540_v7 = vsub.f32 %v4527_v40, %v4538_v6 }
0x3453   :  { %v4543_v8 = vmul.f32 1.442695, %v4540_v7 }
0x3455   :  { %7049 = vpow2.f32 %v4543_v8 }
0x3457   :  { %v7048_v21 = vpop.eup %7047 }
0x3458   :  { %v4545_v51 = vsel %vm283_vm2, %v7048_v21, 0.0 }
0x3459   :  { %4546 = vadd.xlane.f32.xlu1 %v4545_v51 }
0x345f   :  { %v7050_v9 = vpop.eup %7049 }
0x3460   :  { %v4548_v11 = vsel %vm283_vm2, %v7050_v9, 0.0 }
0x3461   :  { %4549 = vadd.xlane.f32.xlu0 %v4548_v11 }
0x346a   :  { %4649 = vrot.lane.b32.xlu1 %v8325_v28, %s7217_s20 }
0x346e   :  { %4699 = vrot.lane.b32.xlu1 %v8329_v56, %s7217_s20 }
0x3477   :  { %4701 = vrot.lane.b32.xlu0 %v8329_v56, %s7216_s10 }
0x34e6   :  { %v4547_v18 = vpop.xlane.xlu1 %4546 }
0x34e7   :  { %7051 = vrcp.f32 %v4547_v18 }
0x34ea   :  { %v4650_v45 = vpop.permute.xlu1 %4649 }
0x34ee   :  { %v4550_v25 = vpop.xlane.xlu0 %4549  ;;  %v4700_v10 = vpop.permute.xlu1 %4699 }
0x34ef   :  { %7053 = vrcp.f32 %v4550_v25 }
0x34f1   :  { %v7052_v22 = vpop.eup %7051 }
0x34f2   :  { %v4553_v31 = vmul.f32 %v7052_v22, %v7048_v21  ;;  %v4702_v47 = vpop.permute.xlu0 %4701 }
0x34f3   :  { %v4707_v35 = vsel %vm438_vm4, %v4702_v47, 0 }
0x34f4   :  { %v4555_v36 = vpack.c.bf16 %v4553_v31, %v4553_v31 }
0x34f6   :  { %6596 = vmatmul.mubr.msk.bf16.vlgmr.msra.gmra.mrb[108].mxu1 %vm283_vm2, %v4555_v36 }
0x34f7   :  { %6606 = vmatpush3.bf16.xpose.msra.mxu1 %v4657_v37  ;;  %6607 = vmatprep.mubr.msk.bf16.mxu1 %vm7214_vm0, %v7213_v0 }
0x34f8   :  { %6617 = vmatprep.subr.bf16.mxu1 %v7213_v0 }
0x34f9   :  { %v7054_v43 = vpop.eup %7053 }
0x34fa   :  { %v4554_v44 = vmul.f32 %v7054_v43, %v7050_v9 }
0x34fc   :  { %v4556_v50 = vpack.c.bf16 %v4554_v44, %v4554_v44 }
0x34fe   :  { %6602 = vmatmul.mubr.msk.bf16.vlgmr.msra.gmra.mrb[148].mxu0 %vm283_vm2, %v4556_v50  ;;  %6608 = vmatmul.mubr.msk.bf16.vlgmr.msra.gmra.mrb[112].mxu1 %vm438_vm4, %v4650_v45 }
0x34ff   :  { %6612 = vmatpush3.bf16.xpose.msra.mxu0 %v4707_v35  ;;  %6613 = vmatprep.mubr.msk.bf16.mxu0 %vm7214_vm0, %v7213_v0 }
0x3500   :  { %6623 = vmatprep.subr.bf16.mxu0 %v7213_v0  ;;  %6619 = vmatprep.mubr.msk.bf16.mxu1 %vm7214_vm0, %v7213_v0 }
0x3506   :  { %6614 = vmatmul.mubr.msk.bf16.vlgmr.msra.gmra.mrb[152].mxu0 %vm438_vm4, %v4700_v10 }
0x3507   :  { %6625 = vmatprep.mubr.msk.bf16.mxu0 %vm7214_vm0, %v7213_v0 }
0x35c9   :  { %v8383_v38 = vpop.f32.mrb[108].mxu1 }
0x35ca   :  { %v6597_v12 = vpop.f32.mrb[109].mxu1 }
0x35cb   :  { %v4600_v46 = vpop.f32.mrb[110].mxu1 }
0x35cc   :  { %v6598_v14 = vpop.f32.mrb[111].mxu1 }
0x35d1   :  { %v8385_v30 = vpop.f32.mrb[148].mxu0  ;;  %v4693_v23 = vpop.f32.mrb[112].mxu1 }
0x35d2   :  { %v6603_v24 = vpop.f32.mrb[149].mxu0  ;;  %v6609_v27 = vpop.f32.mrb[113].mxu1  ;;  %v4749_v41 = vsel %vm283_vm2, %v4693_v23, -inf }
0x35d3   :  { %v4696_v54 = vpop.f32.mrb[114].mxu1  ;;  %4750 = vmax.xlane.f32.xlu0 %v4749_v41  ;;  %v4646_v16 = vpop.f32.mrb[150].mxu0 }
0x35d4   :  { %v6604_v17 = vpop.f32.mrb[151].mxu0  ;;  %v6610_v57 = vpop.f32.mrb[115].mxu1 }
0x35d9   :  { %v4743_v48 = vpop.f32.mrb[152].mxu0 }
0x35da   :  { %v6615_v58 = vpop.f32.mrb[153].mxu0  ;;  %v4752_v59 = vsel %vm283_vm2, %v4743_v48, -inf }
0x35db   :  { %4753 = vmax.xlane.f32.xlu1 %v4752_v59  ;;  %v4746_v61 = vpop.f32.mrb[154].mxu0 }
0x35dc   :  { %v6616_v39 = vpop.f32.mrb[155].mxu0 }
0x35ec   :  { %4774 = vrot.lane.b32.xlu1 %v8327_v55, %s7217_s20 }
0x35f0   :  { %4873 = vrot.lane.b32.xlu1 %v8325_v28, %s7218_s24 }
0x35f4   :  { %4923 = vrot.lane.b32.xlu1 %v8329_v56, %s7218_s24 }
0x35f8   :  { %4921 = vrot.lane.b32.xlu1 %v8329_v56, %s7219_s21 }
0x3660   :  { %v4751_v32 = vpop.xlane.xlu0 %4750 }
0x3661   :  { %v4755_v20 = vsub.f32 %v4693_v23, %v4751_v32 }
0x3663   :  { %v4757_v62 = vmul.f32 1.442695, %v4755_v20 }
0x3665   :  { %7055 = vpow2.f32 %v4757_v62 }
0x3668   :  { %v4754_v13 = vpop.xlane.xlu1 %4753 }
0x3669   :  { %v4756_v40 = vsub.f32 %v4743_v48, %v4754_v13 }
0x366b   :  { %v4759_v63 = vmul.f32 1.442695, %v4756_v40 }
0x366c   :  { %v4775_v42 = vpop.permute.xlu1 %4774 }
0x366d   :  { %7057 = vpow2.f32 %v4759_v63  ;;  %v4780_v1 = vsel %vm287_vm1, %v4775_v42, 0 }
0x366e   :  { %6618 = vmatpush3.bf16.msra.mxu1 %v4780_v1 }
0x366f   :  { %v7056_v33 = vpop.eup %7055  ;;  %6629 = vmatprep.subr.bf16.mxu1 %v7213_v0 }
0x3670   :  { %v4761_v19 = vsel %vm283_vm2, %v7056_v33, 0.0  ;;  %v4874_v9 = vpop.permute.xlu1 %4873 }
0x3671   :  { %4762 = vadd.xlane.f32.xlu0 %v4761_v19  ;;  %v4879_v18 = vsel %vm438_vm4, %v4874_v9, 0 }
0x3674   :  { %v4924_v31 = vpop.permute.xlu1 %4923 }
0x3675   :  { %v4929_v43 = vsel %vm438_vm4, %v4924_v31, 0 }
0x3677   :  { %v7058_v49 = vpop.eup %7057 }
0x3678   :  { %v4764_v4 = vsel %vm283_vm2, %v7058_v49, 0.0  ;;  %v4922_v44 = vpop.permute.xlu1 %4921 }
0x3679   :  { %4765 = vadd.xlane.f32.xlu0 %v4764_v4 }
0x368f   :  { %4823 = vrot.lane.b32.xlu0 %v8346_v60, %s7217_s20 }
0x3693   :  { %4871 = vrot.lane.b32.xlu0 %v8325_v28, %s7219_s21 }
0x36fe   :  { %v4763_v6 = vpop.xlane.xlu0 %4762 }
0x36ff   :  { %7059 = vrcp.f32 %v4763_v6 }
0x3706   :  { %v4766_v7 = vpop.xlane.xlu0 %4765 }
0x3707   :  { %7061 = vrcp.f32 %v4766_v7 }
0x3709   :  { %v7060_v8 = vpop.eup %7059 }
0x370a   :  { %v4769_v21 = vmul.f32 %v7060_v8, %v7056_v33  ;;  %v4824_v51 = vpop.permute.xlu0 %4823 }
0x370b   :  { %v4829_v11 = vsel %vm287_vm1, %v4824_v51, 0 }
0x370c   :  { %6624 = vmatpush3.bf16.msra.mxu0 %v4829_v11  ;;  %v4771_v15 = vpack.c.bf16 %v4769_v21, %v4769_v21 }
0x370d   :  { %6635 = vmatprep.subr.bf16.mxu0 %v7213_v0 }
0x370e   :  { %6620 = vmatmul.mubr.msk.bf16.vlgmr.msra.gmra.mrb[116].mxu1 %vm283_vm2, %v4771_v15  ;;  %v4872_v37 = vpop.permute.xlu0 %4871 }
0x370f   :  { %6630 = vmatpush3.bf16.xpose.msra.mxu1 %v4879_v18  ;;  %6631 = vmatprep.mubr.msk.bf16.mxu1 %vm7214_vm0, %v7213_v0 }
0x3710   :  { %6641 = vmatprep.subr.bf16.mxu1 %v7213_v0 }
0x3711   :  { %v7062_v25 = vpop.eup %7061 }
0x3712   :  { %v4770_v22 = vmul.f32 %v7062_v25, %v7058_v49 }
0x3714   :  { %v4772_v36 = vpack.c.bf16 %v4770_v22, %v4770_v22 }
0x3716   :  { %6626 = vmatmul.mubr.msk.bf16.vlgmr.msra.gmra.mrb[156].mxu0 %vm283_vm2, %v4772_v36  ;;  %6632 = vmatmul.mubr.msk.bf16.vlgmr.msra.gmra.mrb[120].mxu1 %vm438_vm4, %v4872_v37 }
0x3717   :  { %6636 = vmatpush3.bf16.xpose.msra.mxu0 %v4929_v43  ;;  %6637 = vmatprep.mubr.msk.bf16.mxu0 %vm7214_vm0, %v7213_v0 }
0x3718   :  { %6647 = vmatprep.subr.bf16.mxu0 %v7213_v0  ;;  %6643 = vmatprep.mubr.msk.bf16.mxu1 %vm7214_vm0, %v7213_v0 }
0x371e   :  { %6638 = vmatmul.mubr.msk.bf16.vlgmr.msra.gmra.mrb[160].mxu0 %vm438_vm4, %v4922_v44 }
0x371f   :  { %6649 = vmatprep.mubr.msk.bf16.mxu0 %vm7214_vm0, %v7213_v0 }
0x37e1   :  { %v8423_v47 = vpop.f32.mrb[116].mxu1 }
0x37e2   :  { %v6621_v50 = vpop.f32.mrb[117].mxu1 }
0x37e3   :  { %v4819_v45 = vpop.f32.mrb[118].mxu1 }
0x37e4   :  { %v6622_v35 = vpop.f32.mrb[119].mxu1 }
0x37e9   :  { %v8425_v10 = vpop.f32.mrb[156].mxu0  ;;  %v4915_v12 = vpop.f32.mrb[120].mxu1 }
0x37ea   :  { %v6796_v46 = vpack.i.bf16 %v8425_v10, %v8423_v47  ;;  %v6627_v14 = vpop.f32.mrb[157].mxu0  ;;  %v6633_v23 = vpop.f32.mrb[121].mxu1  ;;  %v4971_v24 = vsel %vm283_vm2, %v4915_v12, -inf }
0x37eb   :  { %4972 = vmax.xlane.f32.xlu0 %v4971_v24  ;;  %v4868_v27 = vpop.f32.mrb[158].mxu0  ;;  %v4918_v41 = vpop.f32.mrb[122].mxu1 }
0x37ec   :  { %v6628_v54 = vpop.f32.mrb[159].mxu0  ;;  %v6634_v16 = vpop.f32.mrb[123].mxu1 }
0x37f1   :  { %v4965_v17 = vpop.f32.mrb[160].mxu0 }
0x37f2   :  { %v6639_v57 = vpop.f32.mrb[161].mxu0  ;;  %v4974_v48 = vsel %vm283_vm2, %v4965_v17, -inf }
0x37f3   :  { %4975 = vmax.xlane.f32.xlu1 %v4974_v48  ;;  %v4968_v58 = vpop.f32.mrb[162].mxu0 }
0x37f4   :  { %v6640_v59 = vpop.f32.mrb[163].mxu0 }
0x3804   :  { %4995 = vrot.lane.b32.xlu1 %v8327_v55, %s7219_s21 }
0x3808   :  { %5093 = vrot.lane.b32.xlu1 %v8325_v28, %s7220_s23 }
0x380c   :  { %5143 = vrot.lane.b32.xlu1 %v8329_v56, %s7220_s23 }
0x3810   :  { %5141 = vrot.lane.b32.xlu1 %v8329_v56, %s7221_s25 }
0x3878   :  { %v4973_v61 = vpop.xlane.xlu0 %4972 }
0x3879   :  { %v4977_v39 = vsub.f32 %v4915_v12, %v4973_v61 }
0x387b   :  { %v4979_v32 = vmul.f32 1.442695, %v4977_v39 }
0x387d   :  { %7063 = vpow2.f32 %v4979_v32 }
0x3880   :  { %v4976_v20 = vpop.xlane.xlu1 %4975 }
0x3881   :  { %v4978_v62 = vsub.f32 %v4965_v17, %v4976_v20 }
0x3883   :  { %v4981_v13 = vmul.f32 1.442695, %v4978_v62 }
0x3884   :  { %v4996_v40 = vpop.permute.xlu1 %4995 }
0x3885   :  { %7065 = vpow2.f32 %v4981_v13  ;;  %v5001_v63 = vsel %vm287_vm1, %v4996_v40, 0 }
0x3886   :  { %6642 = vmatpush3.bf16.msra.mxu1 %v5001_v63 }
0x3887   :  { %v7064_v42 = vpop.eup %7063  ;;  %6653 = vmatprep.subr.bf16.mxu1 %v7213_v0 }
0x3888   :  { %v4983_v1 = vsel %vm283_vm2, %v7064_v42, 0.0  ;;  %v5094_v8 = vpop.permute.xlu1 %5093 }
0x3889   :  { %4984 = vadd.xlane.f32.xlu0 %v4983_v1  ;;  %v5099_v9 = vsel %vm438_vm4, %v5094_v8, 0  ;;  %v6908_v8 = vld [vmem:[%s8610_s4 + $0x68] sm:$0xff]  }
0x388c   :  { %v5144_v15 = vpop.permute.xlu1 %5143 }
0x388d   :  { %v5149_v22 = vsel %vm438_vm4, %v5144_v15, 0 }
0x388f   :  { %v7066_v33 = vpop.eup %7065 }
0x3890   :  { %v4986_v56 = vsel %vm283_vm2, %v7066_v33, 0.0  ;;  %v5142_v31 = vpop.permute.xlu1 %5141 }
0x3891   :  { %4987 = vadd.xlane.f32.xlu0 %v4986_v56 }
0x38a7   :  { %5043 = vrot.lane.b32.xlu0 %v8346_v60, %s7219_s21 }
0x38ab   :  { %5091 = vrot.lane.b32.xlu0 %v8325_v28, %s7221_s25 }
0x3916   :  { %v4985_v19 = vpop.xlane.xlu0 %4984 }
0x3917   :  { %7067 = vrcp.f32 %v4985_v19 }
0x391e   :  { %v4988_v49 = vpop.xlane.xlu0 %4987 }
0x391f   :  { %7069 = vrcp.f32 %v4988_v49 }
0x3921   :  { %v7068_v4 = vpop.eup %7067 }
0x3922   :  { %v4991_v6 = vmul.f32 %v7068_v4, %v7064_v42  ;;  %v5044_v7 = vpop.permute.xlu0 %5043 }
0x3923   :  { %v5049_v21 = vsel %vm287_vm1, %v5044_v7, 0  ;;  %v6907_v7 = vld [vmem:[%s8610_s4 + $0x60] sm:$0xff]  }
0x3924   :  { %6648 = vmatpush3.bf16.msra.mxu0 %v5049_v21  ;;  %v4993_v51 = vpack.c.bf16 %v4991_v6, %v4991_v6  ;;  %v6909_v21 = vld [vmem:[%s8610_s4 + $0x70] sm:$0xff]  }
0x3925   :  { %6659 = vmatprep.subr.bf16.mxu0 %v7213_v0 }
0x3926   :  { %6644 = vmatmul.mubr.msk.bf16.vlgmr.msra.gmra.mrb[124].mxu1 %vm283_vm2, %v4993_v51  ;;  %v5092_v25 = vpop.permute.xlu0 %5091  ;;  %v6910_v51 = vld [vmem:[%s8610_s4 + $0x78] sm:$0xff]  }
0x3927   :  { %6654 = vmatpush3.bf16.xpose.msra.mxu1 %v5099_v9  ;;  %6655 = vmatprep.mubr.msk.bf16.mxu1 %vm7214_vm0, %v7213_v0 }
0x3928   :  { %6665 = vmatprep.subr.bf16.mxu1 %v7213_v0 }
0x3929   :  { %v7070_v28 = vpop.eup %7069 }
0x392a   :  { %v4992_v11 = vmul.f32 %v7070_v28, %v7066_v33 }
0x392c   :  { %v4994_v18 = vpack.c.bf16 %v4992_v11, %v4992_v11 }
0x392e   :  { %6650 = vmatmul.mubr.msk.bf16.vlgmr.msra.gmra.mrb[164].mxu0 %vm283_vm2, %v4994_v18  ;;  %6656 = vmatmul.mubr.msk.bf16.vlgmr.msra.gmra.mrb[128].mxu1 %vm438_vm4, %v5092_v25 }
0x392f   :  { %6660 = vmatpush3.bf16.xpose.msra.mxu0 %v5149_v22  ;;  %6661 = vmatprep.mubr.msk.bf16.mxu0 %vm7214_vm0, %v7213_v0 }
0x3930   :  { %6671 = vmatprep.subr.bf16.mxu0 %v7213_v0  ;;  %6667 = vmatprep.mubr.msk.bf16.mxu1 %vm7214_vm0, %v7213_v0 }
0x3936   :  { %6662 = vmatmul.mubr.msk.bf16.vlgmr.msra.gmra.mrb[168].mxu0 %vm438_vm4, %v5142_v31 }
0x3937   :  { %6673 = vmatprep.mubr.msk.bf16.mxu0 %vm7214_vm0, %v7213_v0 }
0x39f9   :  { %v5037_v36 = vpop.f32.mrb[124].mxu1 }
0x39fa   :  { %v6645_v37 = vpop.f32.mrb[125].mxu1 }
0x39fb   :  { %v5040_v43 = vpop.f32.mrb[126].mxu1 }
0x39fc   :  { %v6646_v44 = vpop.f32.mrb[127].mxu1 }
0x3a01   :  { %v5085_v50 = vpop.f32.mrb[164].mxu0  ;;  %v5135_v45 = vpop.f32.mrb[128].mxu1 }
0x3a02   :  { %v6801_v35 = vpack.i.bf16 %v5085_v50, %v5037_v36  ;;  %v6651_v12 = vpop.f32.mrb[165].mxu0  ;;  %v6657_v14 = vpop.f32.mrb[129].mxu1  ;;  %v5191_v23 = vsel %vm283_vm2, %v5135_v45, -inf }
0x3a03   :  { %5192 = vmax.xlane.f32.xlu0 %v5191_v23  ;;  %v5088_v24 = vpop.f32.mrb[166].mxu0  ;;  %v5138_v27 = vpop.f32.mrb[130].mxu1 }
0x3a04   :  { %v6652_v41 = vpop.f32.mrb[167].mxu0  ;;  %v6658_v54 = vpop.f32.mrb[131].mxu1 }
0x3a09   :  { %v5185_v16 = vpop.f32.mrb[168].mxu0 }
0x3a0a   :  { %v6663_v17 = vpop.f32.mrb[169].mxu0  ;;  %v5194_v57 = vsel %vm283_vm2, %v5185_v16, -inf }
0x3a0b   :  { %5195 = vmax.xlane.f32.xlu1 %v5194_v57  ;;  %v5188_v48 = vpop.f32.mrb[170].mxu0 }
0x3a0c   :  { %v6664_v58 = vpop.f32.mrb[171].mxu0 }
0x3a1c   :  { %5215 = vrot.lane.b32.xlu1 %v8327_v55, %s7221_s25 }
0x3a20   :  { %6797 = vrot.lane.b32.xlu1 %v6796_v46, %s7220_s23 }
0x3a24   :  { %6802 = vrot.lane.b32.xlu1 %v6801_v35, %s7218_s24  ;;  %s7222_s24 = smov [#allocation10]  }
0x3a25   :  { %s5747_s21 = sshll.u32 %s7222_s24, 4  ;;  %s5748_s21 = int_to_ptr.vmem [resolvable:$true] %s5747_s21 }
0x3a26   :  { %s7175_s23 = scalar_lea.vmem %s5748_s21, 256  ;;  %p7180_p5 = scmp.lt.s32.totalorder %s5748_s21, %s5748_s21 }
0x3a27   :  { %p7176_p4 = scmp.ne.s32.totalorder %s5748_s21, %s7175_s23  ;;  %p7181_p6 = scmp.lt.s32.totalorder %s7175_s23, %s7175_s23 }
0x3a29   :  { %p7182_p7 = por %p7181_p6, %p7180_p5 }
0x3a2b   :  { %p7183_p8 = pnand %p7182_p7, %p7176_p4 }
0x3a90   :  { %v5193_v59 = vpop.xlane.xlu0 %5192 }
0x3a91   :  { %v5197_v61 = vsub.f32 %v5135_v45, %v5193_v59 }
0x3a93   :  { %v5199_v39 = vmul.f32 1.442695, %v5197_v61 }
0x3a95   :  { %7071 = vpow2.f32 %v5199_v39 }
0x3a98   :  { %v5196_v32 = vpop.xlane.xlu1 %5195 }
0x3a99   :  { %v5198_v20 = vsub.f32 %v5185_v16, %v5196_v32 }
0x3a9b   :  { %v5201_v62 = vmul.f32 1.442695, %v5198_v20 }
0x3a9c   :  { %v5216_v13 = vpop.permute.xlu1 %5215 }
0x3a9d   :  { %7073 = vpow2.f32 %v5201_v62  ;;  %v5221_v40 = vsel %vm287_vm1, %v5216_v13, 0 }
0x3a9e   :  { %6666 = vmatpush3.bf16.msra.mxu1 %v5221_v40 }
0x3a9f   :  { %v7072_v55 = vpop.eup %7071  ;;  %6677 = vmatprep.subr.bf16.mxu1 %v7213_v0 }
0x3aa0   :  { %v5203_v47 = vsel %vm283_vm2, %v7072_v55, 0.0  ;;  %v6798_v37 = vpop.permute.xlu1 %6797 }
0x3aa1   :  { %5204 = vadd.xlane.f32.xlu0 %v5203_v47  ;;  %v6800_v44 = vunpack.i.h.bf16 %v6798_v37  ;;  %v6799_v50 = vunpack.i.l.bf16 %v6798_v37 }
0x3aa3   :  { %v5336_v14 = vsel %vm438_vm4, %v8385_v30, %v6800_v44  ;;  %v5335_v23 = vsel %vm438_vm4, %v8383_v38, %v6799_v50  ;;  %v8519_v38 = vld [vmem:[%s8615_s9 + $0x18] sm:$0xff] }
0x3aa4   :  { %v6803_v43 = vpop.permute.xlu1 %6802  ;;  %v5345_v30 = vrot.slane %v8519_v38, %v7402_v26  ;;  %v5451_v44 = vrot.slane %v8519_v38, %v7650_v3  ;;  %v6922_v3 = vld [vmem:[%s8612_s6 + $0xf8] sm:$0xff]  }
0x3aa5   :  { %v6805_v45 = vunpack.i.h.bf16 %v6803_v43  ;;  %v6804_v35 = vunpack.i.l.bf16 %v6803_v43 }
0x3aa7   :  { %v7074_v10 = vpop.eup %7073  ;;  %v5337_v41 = vsel %vm1338_vm5, %v5335_v23, %v6804_v35  ;;  %v5338_v54 = vsel %vm1338_vm5, %v5336_v14, %v6805_v45  ;;  %v5924_v14 = vld [vmem:[%s8614_s8 + $0x3] ss:$0 sm:$0xff] }
0x3aa8   :  { %v5206_v46 = vsel %vm283_vm2, %v7074_v10, 0.0 }
0x3aa9   :  { %5207 = vadd.xlane.f32.xlu0 %v5206_v46 }
0x3abf   :  { %5263 = vrot.lane.b32.xlu0 %v8346_v60, %s7221_s25 }
0x3b2e   :  { %v5205_v63 = vpop.xlane.xlu0 %5204 }
0x3b2f   :  { %7075 = vrcp.f32 %v5205_v63 }
0x3b36   :  { %v5208_v42 = vpop.xlane.xlu0 %5207 }
0x3b37   :  { %7077 = vrcp.f32 %v5208_v42 }
0x3b39   :  { %v7076_v1 = vpop.eup %7075 }
0x3b3a   :  { %v5211_v33 = vmul.f32 %v7076_v1, %v7072_v55  ;;  %v5264_v56 = vpop.permute.xlu0 %5263 }
0x3b3b   :  { %v5269_v19 = vsel %vm287_vm1, %v5264_v56, 0  ;;  %v6912_v56 = vld [vmem:[#allocation7 + $0x68] sm:$0xff]  }
0x3b3c   :  { %6672 = vmatpush3.bf16.msra.mxu0 %v5269_v19  ;;  %v5213_v49 = vpack.c.bf16 %v5211_v33, %v5211_v33  ;;  %v6913_v19 = vld [vmem:[#allocation7 + $0x70] sm:$0xff]  }
0x3b3d   :  { %6689 = vmatprep.subr.bf16.mxu0 %v7213_v0 }
0x3b3e   :  { %6668 = vmatmul.mubr.msk.bf16.vlgmr.msra.gmra.mrb[132].mxu1 %vm283_vm2, %v5213_v49  ;;  %v6914_v49 = vld [vmem:[#allocation7 + $0x78] sm:$0xff]  }
0x3b3f   :  { %6685 = vmatprep.mubr.msk.bf16.mxu1 %vm7214_vm0, %v7213_v0  ;;  %6678 = vmatpush3.bf16.msra.mxu1 %v6907_v7  ;;  %v6918_v7 = vld [vmem:[%s8612_s6 + $0xd8] sm:$0xff]  }
0x3b40   :  { %6679 = vmatprep.subr.bf16.mxu1 %v7213_v0 }
0x3b41   :  { %v7078_v4 = vpop.eup %7077 }
0x3b42   :  { %v5212_v60 = vmul.f32 %v7078_v4, %v7074_v10  ;;  %v6915_v4 = vld [vmem:[%s8612_s6 + $0xc0] sm:$0xff]  }
0x3b43   :  { %6680 = vmatpush3.bf16.msra.mxu1 %v6908_v8  ;;  %v6919_v8 = vld [vmem:[%s8612_s6 + $0xe0] sm:$0xff]  }
0x3b44   :  { %v5214_v6 = vpack.c.bf16 %v5212_v60, %v5212_v60  ;;  %6681 = vmatprep.subr.bf16.mxu1 %v7213_v0  ;;  %v6916_v60 = vld [vmem:[%s8612_s6 + $0xc8] sm:$0xff]  }
0x3b46   :  { %6674 = vmatmul.mubr.msk.bf16.vlgmr.msra.gmra.mrb[172].mxu0 %vm283_vm2, %v5214_v6  ;;  %v6917_v6 = vld [vmem:[%s8612_s6 + $0xd0] sm:$0xff]  }
0x3b47   :  { %6697 = vmatprep.mubr.msk.bf16.mxu0 %vm7214_vm0, %v7213_v0  ;;  %6682 = vmatpush3.bf16.msra.mxu1 %v6909_v21  ;;  %v6920_v21 = vld [vmem:[%s8612_s6 + $0xe8] sm:$0xff]  }
0x3b48   :  { %6683 = vmatprep.subr.bf16.mxu1 %v7213_v0 }
0x3b4b   :  { %6684 = vmatpush3.bf16.msra.mxu1 %v6910_v51 }
0x3b4c   :  { %6701 = vmatprep.subr.bf16.mxu1 %v7213_v0 }
0x3c11   :  { %v5257_v9 = vpop.f32.mrb[132].mxu1 }
0x3c12   :  { %v6669_v28 = vpop.f32.mrb[133].mxu1 }
0x3c13   :  { %v5260_v11 = vpop.f32.mrb[134].mxu1 }
0x3c14   :  { %v6670_v15 = vpop.f32.mrb[135].mxu1 }
0x3c19   :  { %v5305_v18 = vpop.f32.mrb[172].mxu0 }
0x3c1a   :  { %v6806_v25 = vpack.i.bf16 %v5305_v18, %v5257_v9  ;;  %v6675_v22 = vpop.f32.mrb[173].mxu0 }
0x3c1b   :  { %v5308_v31 = vpop.f32.mrb[174].mxu0 }
0x3c1c   :  { %6807 = vrot.lane.b32.xlu0 %v6806_v25, %s7216_s10  ;;  %v6676_v36 = vpop.f32.mrb[175].mxu0  ;;  %v5445_v25 = vrot.slane %v8519_v38, %v7409_v29  ;;  %v6921_v29 = vld [vmem:[%s8612_s6 + $0xf0] sm:$0xff]  }
0x3c8e   :  { %v6808_v12 = vpop.permute.xlu0 %6807 }
0x3c8f   :  { %v6810_v24 = vunpack.i.h.bf16 %v6808_v12  ;;  %v6809_v27 = vunpack.i.l.bf16 %v6808_v12 }
0x3c91   :  { %v5340_v16 = vsel %vm1341_vm6, %v5338_v54, %v6810_v24  ;;  %v5339_v17 = vsel %vm1341_vm6, %v5337_v41, %v6809_v27 }
0x3c92   :  { %v5341_v57 = vpack.c.bf16 %v5340_v16, %v5339_v17 }
0x3c94   :  { %6686 = vmatmul.mubr.msk.bf16.vlgmr.msra.gmra.mrb[136].mxu1 %vm384_vm3, %v5341_v57 }
0x3c95   :  { %6717 = vmatprep.mubr.msk.bf16.mxu1 %vm7214_vm0, %v7213_v0  ;;  %6702 = vmatpush3.bf16.msra.mxu1 %v6915_v4 }
0x3c96   :  { %6703 = vmatprep.subr.bf16.mxu1 %v7213_v0 }
0x3c99   :  { %6704 = vmatpush3.bf16.msra.mxu1 %v6916_v60 }
0x3c9a   :  { %6705 = vmatprep.subr.bf16.mxu1 %v7213_v0 }
0x3c9d   :  { %6706 = vmatpush3.bf16.msra.mxu1 %v6917_v6 }
0x3c9e   :  { %6707 = vmatprep.subr.bf16.mxu1 %v7213_v0 }
0x3ca1   :  { %6708 = vmatpush3.bf16.msra.mxu1 %v6918_v7 }
0x3ca2   :  { %6709 = vmatprep.subr.bf16.mxu1 %v7213_v0 }
0x3ca5   :  { %6710 = vmatpush3.bf16.msra.mxu1 %v6919_v8 }
0x3ca6   :  { %6711 = vmatprep.subr.bf16.mxu1 %v7213_v0 }
0x3ca9   :  { %6712 = vmatpush3.bf16.msra.mxu1 %v6920_v21 }
0x3caa   :  { %6713 = vmatprep.subr.bf16.mxu1 %v7213_v0 }
0x3cad   :  { %6714 = vmatpush3.bf16.msra.mxu1 %v6921_v29 }
0x3cae   :  { %6715 = vmatprep.subr.bf16.mxu1 %v7213_v0 }
0x3cb1   :  { %6716 = vmatpush3.bf16.msra.mxu1 %v6922_v3 }
0x3d67   :  { %v5407_v48 = vpop.f32.mrb[136].mxu1 }
0x3d68   :  { %v5408_v58 = vadd.f32 %v5407_v48, %v5345_v30  ;;  %v6687_v59 = vpop.f32.mrb[137].mxu1  ;;  %v5535_v48 = vrot.slane %v8519_v38, %v7670_v34 }
0x3d69   :  { %v5410_v61 = vpop.f32.mrb[138].mxu1 }
0x3d6a   :  { %v5414_v39 = vadd.f32 %v5408_v58, %v8311_v52  ;;  %v5411_v32 = vadd.f32 %v5410_v61, %v5345_v30  ;;  %v6688_v20 = vpop.f32.mrb[139].mxu1 }
0x3d6c   :  { %v5415_v62 = vadd.f32 %v5411_v32, %v8313_v53  ;;  %v5416_v13 = vsel %vm384_vm3, %v5414_v39, 0.0  ;;  %v6911_v53 = vld [vmem:[#allocation7 + $0x60] sm:$0xff]  }
0x3d6d   :  { %5417 = vadd.xlane.f32.xlu1 %v5416_v13  ;;  %6690 = vmatpush3.bf16.msra.mxu0 %v6911_v53  ;;  %v6923_v53 = vld [vmem:[#allocation8] sm:$0xff]  }
0x3d6e   :  { %v5419_v40 = vsel %vm384_vm3, %v5415_v62, 0.0  ;;  %6691 = vmatprep.subr.bf16.mxu0 %v7213_v0 }
0x3d6f   :  { %5420 = vadd.xlane.f32.xlu0 %v5419_v40 }
0x3d71   :  { %6692 = vmatpush3.bf16.msra.mxu0 %v6912_v56  ;;  %v6924_v56 = vld [vmem:[#allocation8 + $0x8] sm:$0xff]  }
0x3d72   :  { %6693 = vmatprep.subr.bf16.mxu0 %v7213_v0 }
0x3d75   :  { %6694 = vmatpush3.bf16.msra.mxu0 %v6913_v19  ;;  %v6925_v19 = vld [vmem:[#allocation8 + $0x10] sm:$0xff]  }
0x3d76   :  { %6695 = vmatprep.subr.bf16.mxu0 %v7213_v0 }
0x3d79   :  { %6696 = vmatpush3.bf16.msra.mxu0 %v6914_v49  ;;  %v6926_v49 = vld [vmem:[#allocation8 + $0x18] sm:$0xff]  }
0x3d7a   :  { %6721 = vmatprep.subr.bf16.mxu0 %v7213_v0 }
0x3dfa   :  { %v5418_v55 = vpop.xlane.xlu1 %5417 }
0x3dfb   :  { %v5422_v47 = vmul.f32 0.015625, %v5418_v55 }
0x3dfc   :  { %v5421_v10 = vpop.xlane.xlu0 %5420 }
0x3dfd   :  { %v5424_v26 = vsub.f32 %v5414_v39, %v5422_v47  ;;  %v5423_v46 = vmul.f32 0.015625, %v5421_v10 }
0x3dff   :  { %v5425_v63 = vsub.f32 %v5415_v62, %v5423_v46  ;;  %v5426_v42 = vmul.f32 %v5424_v26, %v5424_v26 }
0x3e01   :  { %v5428_v1 = vsel %vm384_vm3, %v5426_v42, 0.0  ;;  %v5427_v52 = vmul.f32 %v5425_v63, %v5425_v63 }
0x3e02   :  { %5429 = vadd.xlane.f32.xlu0 %v5428_v1 }
0x3e03   :  { %v5431_v33 = vsel %vm384_vm3, %v5427_v52, 0.0 }
0x3e04   :  { %5432 = vadd.xlane.f32.xlu1 %v5431_v33 }
0x3e8f   :  { %v5430_v51 = vpop.xlane.xlu0 %5429 }
0x3e90   :  { %v5434_v9 = vmul.f32 0.015625, %v5430_v51  ;;  %v5656_v51 = vrot.slane %v8519_v38, %v7704_v2 }
0x3e91   :  { %v5433_v28 = vpop.xlane.xlu1 %5432 }
0x3e92   :  { %v5436_v11 = vadd.f32 1e-05, %v5434_v9  ;;  %v5435_v15 = vmul.f32 0.015625, %v5433_v28 }
0x3e94   :  { %7079 = vrsqrt.f32 %v5436_v11  ;;  %v5437_v18 = vadd.f32 1e-05, %v5435_v15 }
0x3e96   :  { %7081 = vrsqrt.f32 %v5437_v18 }
0x3e9e   :  { %v7080_v22 = vpop.eup %7079 }
0x3e9f   :  { %v5440_v31 = vmul.f32 %v7080_v22, %v5424_v26 }
0x3ea0   :  { %v7082_v36 = vpop.eup %7081 }
0x3ea1   :  { %v5446_v37 = vmul.f32 %v5445_v25, %v5440_v31  ;;  %v5441_v43 = vmul.f32 %v7082_v36, %v5425_v63 }
0x3ea3   :  { %v5447_v50 = vmul.f32 %v5445_v25, %v5441_v43  ;;  %v5452_v45 = vadd.f32 %v5451_v44, %v5446_v37  ;;  %v5938_v37 = vld [vmem:[%s8617_s11] ss:$0 sm:$0xff] }
0x3ea5   :  { %v5453_v35 = vadd.f32 %v5451_v44, %v5447_v50 }
0x3ea7   :  { %v5454_v12 = vpack.c.bf16 %v5453_v35, %v5452_v45 }
0x3ea9   :  { %6698 = vmatmul.mubr.msk.bf16.vlgmr.msra.gmra.mrb[176].mxu0 %vm384_vm3, %v5454_v12 }
0x3eaa   :  { %6729 = vmatprep.mubr.msk.bf16.mxu0 %vm7214_vm0, %v7213_v0  ;;  %6722 = vmatpush3.bf16.msra.mxu0 %v6923_v53 }
0x3eab   :  { %6723 = vmatprep.subr.bf16.mxu0 %v7213_v0 }
0x3eae   :  { %6724 = vmatpush3.bf16.msra.mxu0 %v6924_v56 }
0x3eaf   :  { %6725 = vmatprep.subr.bf16.mxu0 %v7213_v0 }
0x3eb2   :  { %6726 = vmatpush3.bf16.msra.mxu0 %v6925_v19 }
0x3eb3   :  { %6727 = vmatprep.subr.bf16.mxu0 %v7213_v0  ;;  %v5662_v0 = vrot.slane %v8519_v38, %v7709_v5 }
0x3eb6   :  { %6728 = vmatpush3.bf16.msra.mxu0 %v6926_v49 }
0x3f7c   :  { %v5522_v23 = vpop.f32.mrb[176].mxu0 }
0x3f7d   :  { %v5523_v24 = vadd.f32 %v5924_v14, %v5522_v23  ;;  %v6699_v27 = vpop.f32.mrb[177].mxu0 }
0x3f7e   :  { %v5525_v41 = vpop.f32.mrb[178].mxu0 }
0x3f7f   :  { %v5526_v54 = vadd.f32 %v5924_v14, %v5525_v41  ;;  %v6700_v16 = vpop.f32.mrb[179].mxu0  ;;  %v5529_v17 = vmax.f32 %v5523_v24, 0.0 }
0x3f81   :  { %v5530_v57 = vmax.f32 %v5526_v54, 0.0 }
0x3f83   :  { %v5531_v30 = vpack.c.bf16 %v5530_v57, %v5529_v17 }
0x3f85   :  { %6718 = vmatmul.mubr.bf16.vlgmr.msra.gmra.mrb[140].mxu1 %v5531_v30 }
0x4058   :  { %v5618_v58 = vpop.f32.mrb[140].mxu1 }
0x4059   :  { %v5619_v59 = vadd.f32 %v5618_v58, %v5535_v48  ;;  %v6719_v61 = vpop.f32.mrb[141].mxu1 }
0x405a   :  { %v5621_v39 = vpop.f32.mrb[142].mxu1 }
0x405b   :  { %v5625_v32 = vadd.f32 %v5619_v59, %v5452_v45  ;;  %v5622_v20 = vadd.f32 %v5621_v39, %v5535_v48  ;;  %v6720_v62 = vpop.f32.mrb[143].mxu1 }
0x405d   :  { %v5626_v13 = vadd.f32 %v5622_v20, %v5453_v35  ;;  %v5627_v40 = vsel %vm384_vm3, %v5625_v32, 0.0 }
0x405e   :  { %5628 = vadd.xlane.f32.xlu0 %v5627_v40 }
0x405f   :  { %v5630_v55 = vsel %vm384_vm3, %v5626_v13, 0.0 }
0x4060   :  { %5631 = vadd.xlane.f32.xlu1 %v5630_v55 }
0x40eb   :  { %v5629_v47 = vpop.xlane.xlu0 %5628 }
0x40ec   :  { %v5633_v10 = vmul.f32 0.015625, %v5629_v47 }
0x40ed   :  { %v5632_v26 = vpop.xlane.xlu1 %5631 }
0x40ee   :  { %v5635_v46 = vsub.f32 %v5625_v32, %v5633_v10  ;;  %v5634_v63 = vmul.f32 0.015625, %v5632_v26 }
0x40f0   :  { %v5636_v34 = vsub.f32 %v5626_v13, %v5634_v63  ;;  %v5637_v42 = vmul.f32 %v5635_v46, %v5635_v46 }
0x40f2   :  { %v5639_v1 = vsel %vm384_vm3, %v5637_v42, 0.0  ;;  %v5638_v52 = vmul.f32 %v5636_v34, %v5636_v34 }
0x40f3   :  { %5640 = vadd.xlane.f32.xlu0 %v5639_v1 }
0x40f4   :  { %v5642_v33 = vsel %vm384_vm3, %v5638_v52, 0.0 }
0x40f5   :  { %5643 = vadd.xlane.f32.xlu1 %v5642_v33 }
0x4180   :  { %v5641_v4 = vpop.xlane.xlu0 %5640 }
0x4181   :  { %v5645_v60 = vmul.f32 0.015625, %v5641_v4 }
0x4182   :  { %v5644_v6 = vpop.xlane.xlu1 %5643 }
0x4183   :  { %v5647_v7 = vadd.f32 1e-05, %v5645_v60  ;;  %v5646_v8 = vmul.f32 0.015625, %v5644_v6 }
0x4185   :  { %7083 = vrsqrt.f32 %v5647_v7  ;;  %v5648_v21 = vadd.f32 1e-05, %v5646_v8 }
0x4187   :  { %7085 = vrsqrt.f32 %v5648_v21 }
0x418f   :  { %v7084_v9 = vpop.eup %7083 }
0x4190   :  { %v5651_v28 = vmul.f32 %v7084_v9, %v5635_v46 }
0x4191   :  { %v7086_v11 = vpop.eup %7085 }
0x4192   :  { %v5657_v15 = vmul.f32 %v5656_v51, %v5651_v28  ;;  %v5652_v18 = vmul.f32 %v7086_v11, %v5636_v34 }
0x4194   :  { %v5658_v25 = vmul.f32 %v5656_v51, %v5652_v18  ;;  %v5663_v22 = vadd.f32 %v5662_v0, %v5657_v15 }
0x4196   :  { %v5664_v31 = vadd.f32 %v5662_v0, %v5658_v25 }
0x4198   :  { %v5665_v36 = vpack.c.bf16 %v5664_v31, %v5663_v22 }
0x419a   :  { %6730 = vmatmul.mubr.msk.bf16.vlgmr.msra.gmra.mrb[180].mxu0 %vm384_vm3, %v5665_v36 }
0x426d   :  { %v5733_v43 = vpop.f32.mrb[180].mxu0 }
0x426e   :  { %v5734_v2 = vadd.f32 %v5938_v37, %v5733_v43  ;;  %v6731_v44 = vpop.f32.mrb[181].mxu0 }
0x426f   :  { %v5736_v50 = vpop.f32.mrb[182].mxu0 }
0x4270   :  { %5740 = vst [vmem:[#allocation10] sm:$0xff] %v5734_v2  ;;  %v5737_v45 = vadd.f32 %v5938_v37, %v5736_v50  ;;  %v6732_v35 = vpop.f32.mrb[183].mxu0 }
0x4272   :  { %5741 = vst [vmem:[#allocation10 + $0x8] sm:$0xff] %v5737_v45 }
0x4273   :  { %7186 = shalt.err (!%p7183_p8)
}
0x4274   :  { %s7187_s30 = scalar_lea.hbm %s8618_s12, 256 }
0x4275   :  { %p7188_p9 = scmp.ne.s32.totalorder %s8618_s12, %s7187_s30  ;;  %p7191_p10 = scmp.lt.u32.totalorder %s7187_s30, %s8618_s12 }
0x4277   :  { %p7193_p11 = pnand %p7191_p10, %p7188_p9 }
0x4279   :  { %7196 = shalt.err (!%p7193_p11)
}
0x427a   :  { %5753 = dma.vmem_to_hbm [thread:$0]  %s5748_s21, 256, %s8618_s12, [#allocation4], %s7207_s2, %s7207_s2, %s7208_s22  }
0x427b   :  { %7203 = dma.done.wait [#allocation4], 256  }
0x427c   :  { %7204 = vsyncadd [#allocation4], 4294967040 }
0x427d   :  { %5757 = vsyncpa [#allocation3], 1 }
0x427e   :  { %5758 = vsyncpa [#allocation6], 1 }
0x427f   :  { %5759 = vsyncpa [#allocation9], 1 }
0x4280   :  { %5760 = vsyncpa [#allocation4], 1 }

</bundles_post_ra>
